<compile_context>
chip_gen: v7x
topology: tpu7x:2x2x1
jax: 0.10.0
libtpu: 0.0.40
codegen_flags: <defaults>
</compile_context>

<pallas_src>
import math

import jax
import jax.numpy as jnp
import numpy as np
from jax.experimental import pallas as pl
from jax.experimental.pallas import tpu as pltpu

# ----------------------------- scaled hyper-parameters -----------------------------
D_MODEL = 128            # original 512
N_HEADS = 4              # original 8
D_K = D_V = 32           # original 64
D_FF = 256               # original 2048
N_LAYERS = 2             # original 6
TGT_VOCAB = 12
SRC_VOCAB = 20
BATCH = 2
TGT_LEN = 1              # the module's hard-coded torch.zeros((B, 1, 49)) concat implies tgt_len == 1
SRC_LEN = 6
N_IMG = 49               # hard-coded image-token count appended to the encoder sequence
LK = SRC_LEN + N_IMG     # 55 real encoder keys
SEQ_PAD = 8              # decoder rows padded to a full sublane group
LK_PAD = 128             # encoder keys padded to a full lane group (padded cols carry -1e9 bias)
NEG_INF = -1e9
LN_EPS = 1e-5


# =========================== fused whole-decoder kernel ===========================
def _decoder_kernel(dec_x_ref, enc_x_ref, self_bias_ref, enc_bias_ref,
                    w_qkv_ref, w_sfc_ref, w_q_ref, w_kv_ref, w_cfc_ref,
                    w1_ref, w2_ref, ln_ref,
                    dec_out_ref, self_attn_ref, enc_attn_ref):
    scale = 1.0 / math.sqrt(D_K)

    def layer_norm(y, g, b):
        mu = jnp.mean(y, axis=-1, keepdims=True)
        var = jnp.mean(jnp.square(y - mu), axis=-1, keepdims=True)
        return (y - mu) * jax.lax.rsqrt(var + LN_EPS) * g + b

    def attention(q, k, v, bias, attn_ref, l):
        # q:[SEQ_PAD,H*Dk] bf16, k:[Lk,H*Dk] bf16, v:[Lk,H*Dv] bf16, bias:[SEQ_PAD,Lk] f32.
        # Writes the per-head attention maps (module return value) and returns the
        # head-concatenated context [SEQ_PAD, H*Dv = 128] (lane-dense) in f32.
        ctx_heads = []
        for h in range(N_HEADS):                       # static unroll, H=4
            qh = q[:, h * D_K:(h + 1) * D_K]
            kh = k[:, h * D_K:(h + 1) * D_K]
            vh = v[:, h * D_V:(h + 1) * D_V]
            # "NT" matmul: contract last dims of q and k (no explicit transpose).
            s = jax.lax.dot_general(qh, kh, (((1,), (1,)), ((), ())),
                                    preferred_element_type=jnp.float32)
            s = s * scale + bias                       # additive pad/causal mask
            s = s - jnp.max(s, axis=-1, keepdims=True)
            p = jnp.exp(s)
            attn = p / jnp.sum(p, axis=-1, keepdims=True)   # exact softmax (returned)
            attn_ref[0, l * N_HEADS + h] = attn
            ctx_heads.append(jnp.dot(attn.astype(jnp.bfloat16), vh,
                                     preferred_element_type=jnp.float32))
        return jnp.concatenate(ctx_heads, axis=-1)     # [SEQ_PAD, 128]

    x = dec_x_ref[0]                  # [SEQ_PAD, D_MODEL] f32 (residual stream)
    enc = enc_x_ref[0]                # [LK_PAD, D_MODEL] bf16
    sbias = self_bias_ref[0]          # [SEQ_PAD, SEQ_PAD] f32
    ebias = enc_bias_ref[0]           # [SEQ_PAD, LK_PAD] f32

    for l in range(N_LAYERS):         # static unroll, weights stay VMEM-resident
        ln = ln_ref[l]                # [6, D_MODEL] f32

        # ---- masked multi-head self-attention (single fused QKV projection) ----
        qkv = jnp.dot(x.astype(jnp.bfloat16), w_qkv_ref[l],
                      preferred_element_type=jnp.float32)      # [SEQ_PAD, 3*128]
        q = qkv[:, :D_MODEL].astype(jnp.bfloat16)
        k = qkv[:, D_MODEL:2 * D_MODEL].astype(jnp.bfloat16)
        v = qkv[:, 2 * D_MODEL:].astype(jnp.bfloat16)
        ctx = attention(q, k, v, sbias, self_attn_ref, l)
        sa = jnp.dot(ctx.astype(jnp.bfloat16), w_sfc_ref[l],
                     preferred_element_type=jnp.float32)
        x = layer_norm(sa + x, ln[0:1, :], ln[1:2, :])

        # ---- multi-head enc-dec cross-attention (fused KV projection) ----
        q = jnp.dot(x.astype(jnp.bfloat16), w_q_ref[l],
                    preferred_element_type=jnp.float32).astype(jnp.bfloat16)
        kv = jnp.dot(enc, w_kv_ref[l],
                     preferred_element_type=jnp.float32)       # [LK_PAD, 2*128]
        k = kv[:, :D_MODEL].astype(jnp.bfloat16)
        v = kv[:, D_MODEL:].astype(jnp.bfloat16)
        ctx = attention(q, k, v, ebias, enc_attn_ref, l)
        ca = jnp.dot(ctx.astype(jnp.bfloat16), w_cfc_ref[l],
                     preferred_element_type=jnp.float32)
        x = layer_norm(ca + x, ln[2:3, :], ln[3:4, :])

        # ---- position-wise FFN: Linear -> ReLU -> Linear (+ residual + LN) ----
        h1 = jnp.maximum(jnp.dot(x.astype(jnp.bfloat16), w1_ref[l],
                                 preferred_element_type=jnp.float32), 0.0)
        h2 = jnp.dot(h1.astype(jnp.bfloat16), w2_ref[l],
                     preferred_element_type=jnp.float32)
        x = layer_norm(h2 + x, ln[4:5, :], ln[5:6, :])

    dec_out_ref[0] = x


def decoder_pallas(dec_x, enc_x, self_bias, enc_bias, w):
    """Single pallas_call for the whole decoder stack; grid=(B,) parallel over batch."""
    B = dec_x.shape[0]
    const3 = lambda b: (0, 0, 0)
    data3 = lambda b: (b, 0, 0)
    data4 = lambda b: (b, 0, 0, 0)

    out_shape = (
        jax.ShapeDtypeStruct((B, SEQ_PAD, D_MODEL), jnp.float32),
        jax.ShapeDtypeStruct((B, N_LAYERS * N_HEADS, SEQ_PAD, SEQ_PAD), jnp.float32),
        jax.ShapeDtypeStruct((B, N_LAYERS * N_HEADS, SEQ_PAD, LK_PAD), jnp.float32),
    )
    in_specs = [
        pl.BlockSpec((1, SEQ_PAD, D_MODEL), data3),
        pl.BlockSpec((1, LK_PAD, D_MODEL), data3),
        pl.BlockSpec((1, SEQ_PAD, SEQ_PAD), data3),
        pl.BlockSpec((1, SEQ_PAD, LK_PAD), data3),
        pl.BlockSpec(w["w_qkv"].shape, const3),     # weights: same block every step
        pl.BlockSpec(w["w_sfc"].shape, const3),     # -> stay resident in VMEM
        pl.BlockSpec(w["w_q"].shape, const3),
        pl.BlockSpec(w["w_kv"].shape, const3),
        pl.BlockSpec(w["w_cfc"].shape, const3),
        pl.BlockSpec(w["w1"].shape, const3),
        pl.BlockSpec(w["w2"].shape, const3),
        pl.BlockSpec(w["ln"].shape, const3),
    ]
    out_specs = (
        pl.BlockSpec((1, SEQ_PAD, D_MODEL), data3),
        pl.BlockSpec((1, N_LAYERS * N_HEADS, SEQ_PAD, SEQ_PAD), data4),
        pl.BlockSpec((1, N_LAYERS * N_HEADS, SEQ_PAD, LK_PAD), data4),
    )
    return pl.pallas_call(
        _decoder_kernel,
        out_shape=out_shape,
        grid=(B,),
        in_specs=in_specs,
        out_specs=out_specs,
        compiler_params=pltpu.CompilerParams(
            dimension_semantics=("parallel",),          # v7x: one batch element per TC
            vmem_limit_bytes=32 * 1024 * 1024,
        ),
    )(dec_x, enc_x, self_bias, enc_bias,
      w["w_qkv"], w["w_sfc"], w["w_q"], w["w_kv"], w["w_cfc"],
      w["w1"], w["w2"], w["ln"])


# =========================== masks / embeddings (XLA glue) ===========================
def get_attn_pad_mask(seq_q, seq_k):
    B, len_q = seq_q.shape
    len_k = seq_k.shape[1]
    pad = (seq_k == 0)[:, None, :]
    return jnp.broadcast_to(pad, (B, len_q, len_k))


def get_attn_subsequence_mask(seq):
    B, L = seq.shape
    sub = jnp.triu(jnp.ones((L, L), jnp.int32), k=1)
    return jnp.broadcast_to(sub[None], (B, L, L))


def sinusoid_table(n_position, d_model):
    pos = np.arange(n_position)[:, None].astype(np.float64)
    hid = np.arange(d_model)[None, :]
    angle = pos / np.power(10000, 2 * (hid // 2) / d_model)
    table = np.zeros((n_position, d_model), np.float64)
    table[:, 0::2] = np.sin(angle[:, 0::2])
    table[:, 1::2] = np.cos(angle[:, 1::2])
    return jnp.asarray(table, jnp.float32)


# =========================== Decoder forward (wrapper) ===========================
def decoder_forward(params, packed, dec_inputs, enc_inputs, enc_outputs):
    B, T = dec_inputs.shape
    # TODO(synk): embedding gathers and boolean-mask construction are tiny scalar/gather
    # glue left to XLA; everything dense runs inside the single Pallas kernel below.
    word = params["tgt_emb"][dec_inputs]
    pos = params["tgt_pos"][dec_inputs]      # frozen sinusoid table indexed by token ids (as in torch)
    dec0 = (word + pos).astype(jnp.float32)  # [B, T, D_MODEL]
    dec_x = jnp.zeros((B, SEQ_PAD, D_MODEL), jnp.float32).at[:, :T, :].set(dec0)

    # self-attention mask: pad + causal, padded rows/cols fully masked
    pad = get_attn_pad_mask(dec_inputs, dec_inputs).astype(jnp.int32)
    sub = get_attn_subsequence_mask(dec_inputs)
    self_mask = (pad + sub) > 0                                   # [B, T, T]
    self_bias = jnp.full((B, SEQ_PAD, SEQ_PAD), NEG_INF, jnp.float32)
    self_bias = self_bias.at[:, :T, :T].set(jnp.where(self_mask, NEG_INF, 0.0))

    # enc-attention mask: pad mask ++ hard-coded all-unmasked 49 image tokens, padded keys masked
    enc_mask = get_attn_pad_mask(dec_inputs, enc_inputs)          # [B, T, SRC_LEN]
    add_mask = jnp.zeros((B, T, N_IMG), bool)                     # torch.zeros((B, 1, 49)).bool(); T == 1
    enc_mask = jnp.concatenate([enc_mask, add_mask], axis=2)      # [B, T, LK]
    enc_bias = jnp.full((B, SEQ_PAD, LK_PAD), NEG_INF, jnp.float32)
    enc_bias = enc_bias.at[:, :T, :LK].set(jnp.where(enc_mask, NEG_INF, 0.0))

    # encoder outputs: pad keys to 128 lanes once, bf16 (only ever an MXU operand)
    enc_x = jnp.zeros((B, LK_PAD, D_MODEL), jnp.bfloat16)
    enc_x = enc_x.at[:, :LK, :].set(enc_outputs.astype(jnp.bfloat16))

    dec_out_p, self_attn_p, enc_attn_p = decoder_pallas(dec_x, enc_x, self_bias, enc_bias, packed)

    dec_out = dec_out_p[:, :T, :]
    self_attn_p = self_attn_p.reshape(B, N_LAYERS, N_HEADS, SEQ_PAD, SEQ_PAD)
    enc_attn_p = enc_attn_p.reshape(B, N_LAYERS, N_HEADS, SEQ_PAD, LK_PAD)
    self_attns = [self_attn_p[:, l, :, :T, :T] for l in range(N_LAYERS)]
    enc_attns = [enc_attn_p[:, l, :, :T, :LK] for l in range(N_LAYERS)]
    return dec_out, self_attns, enc_attns


# =========================== deterministic parameter init ===========================
def init_params(key):
    keys = iter(jax.random.split(key, 64))

    def nk():
        return next(keys)

    def linear_w(din, dout):                    # nn.Linear default init, stored [din, dout]
        std = 1.0 / math.sqrt(din)
        return jax.random.uniform(nk(), (din, dout), jnp.float32, -std, std)

    def mha_self():
        return {"W_QKV": jnp.concatenate([linear_w(D_MODEL, N_HEADS * D_K),
                                          linear_w(D_MODEL, N_HEADS * D_K),
                                          linear_w(D_MODEL, N_HEADS * D_V)], axis=1),
                "fc": linear_w(N_HEADS * D_V, D_MODEL),
                "ln_g": jnp.ones((D_MODEL,), jnp.float32),
                "ln_b": jnp.zeros((D_MODEL,), jnp.float32)}

    def mha_cross():
        return {"W_Q": linear_w(D_MODEL, N_HEADS * D_K),
                "W_KV": jnp.concatenate([linear_w(D_MODEL, N_HEADS * D_K),
                                         linear_w(D_MODEL, N_HEADS * D_V)], axis=1),
                "fc": linear_w(N_HEADS * D_V, D_MODEL),
                "ln_g": jnp.ones((D_MODEL,), jnp.float32),
                "ln_b": jnp.zeros((D_MODEL,), jnp.float32)}

    def ffn():
        return {"W1": linear_w(D_MODEL, D_FF),
                "W2": linear_w(D_FF, D_MODEL),
                "ln_g": jnp.ones((D_MODEL,), jnp.float32),
                "ln_b": jnp.zeros((D_MODEL,), jnp.float32)}

    return {"tgt_emb": jax.random.normal(nk(), (TGT_VOCAB, D_MODEL), jnp.float32),
            "tgt_pos": sinusoid_table(TGT_VOCAB, D_MODEL),
            "layers": [{"self_attn": mha_self(), "enc_attn": mha_cross(), "ffn": ffn()}
                       for _ in range(N_LAYERS)]}


def pack_layer_params(params):
    """Stack per-layer weights so the whole decoder is one pallas_call (weights VMEM-resident)."""
    layers = params["layers"]

    def stack(get, dtype):
        return jnp.stack([get(lp) for lp in layers]).astype(dtype)

    return {
        "w_qkv": stack(lambda lp: lp["self_attn"]["W_QKV"], jnp.bfloat16),   # [L,128,384]
        "w_sfc": stack(lambda lp: lp["self_attn"]["fc"], jnp.bfloat16),       # [L,128,128]
        "w_q":   stack(lambda lp: lp["enc_attn"]["W_Q"], jnp.bfloat16),       # [L,128,128]
        "w_kv":  stack(lambda lp: lp["enc_attn"]["W_KV"], jnp.bfloat16),      # [L,128,256]
        "w_cfc": stack(lambda lp: lp["enc_attn"]["fc"], jnp.bfloat16),        # [L,128,128]
        "w1":    stack(lambda lp: lp["ffn"]["W1"], jnp.bfloat16),             # [L,128,256]
        "w2":    stack(lambda lp: lp["ffn"]["W2"], jnp.bfloat16),             # [L,256,128]
        "ln":    jnp.stack([jnp.stack([lp["self_attn"]["ln_g"], lp["self_attn"]["ln_b"],
                                       lp["enc_attn"]["ln_g"], lp["enc_attn"]["ln_b"],
                                       lp["ffn"]["ln_g"], lp["ffn"]["ln_b"]])
                            for lp in layers]).astype(jnp.float32),           # [L,6,128]
    }


# =========================== pure-JAX reference (correctness check) ===========================
def _layer_norm_ref(y, g, b):
    mu = y.mean(-1, keepdims=True)
    var = ((y - mu) ** 2).mean(-1, keepdims=True)
    return (y - mu) / jnp.sqrt(var + LN_EPS) * g + b


def _mha_ref(x_q, x_kv, mask, W_Q, W_K, W_V, fc, g, b):
    B, Lq, _ = x_q.shape
    Lk = x_kv.shape[1]
    Q = (x_q @ W_Q).reshape(B, Lq, N_HEADS, D_K).transpose(0, 2, 1, 3)
    K = (x_kv @ W_K).reshape(B, Lk, N_HEADS, D_K).transpose(0, 2, 1, 3)
    V = (x_kv @ W_V).reshape(B, Lk, N_HEADS, D_V).transpose(0, 2, 1, 3)
    s = jnp.einsum("bhqd,bhkd->bhqk", Q, K) / math.sqrt(D_K)
    s = jnp.where(mask[:, None], NEG_INF, s)
    attn = jax.nn.softmax(s, axis=-1)
    ctx = jnp.einsum("bhqk,bhkd->bhqd", attn, V).transpose(0, 2, 1, 3).reshape(B, Lq, N_HEADS * D_V)
    return _layer_norm_ref(ctx @ fc + x_q, g, b), attn


def reference_forward(params, dec_inputs, enc_inputs, enc_outputs):
    B, T = dec_inputs.shape
    x = (params["tgt_emb"][dec_inputs] + params["tgt_pos"][dec_inputs]).astype(jnp.float32)
    self_mask = (get_attn_pad_mask(dec_inputs, dec_inputs).astype(jnp.int32)
                 + get_attn_subsequence_mask(dec_inputs)) > 0
    enc_mask = jnp.concatenate([get_attn_pad_mask(dec_inputs, enc_inputs),
                                jnp.zeros((B, T, N_IMG), bool)], axis=2)
    self_attns, enc_attns = [], []
    for lp in params["layers"]:
        sa = lp["self_attn"]
        Wq, Wk, Wv = jnp.split(sa["W_QKV"], 3, axis=1)
        x, a = _mha_ref(x, x, self_mask, Wq, Wk, Wv, sa["fc"], sa["ln_g"], sa["ln_b"])
        self_attns.append(a)
        ca = lp["enc_attn"]
        Wk2, Wv2 = jnp.split(ca["W_KV"], 2, axis=1)
        x, a = _mha_ref(x, enc_outputs, enc_mask, ca["W_Q"], Wk2, Wv2, ca["fc"], ca["ln_g"], ca["ln_b"])
        enc_attns.append(a)
        fp = lp["ffn"]
        h = jnp.maximum(x @ fp["W1"], 0.0) @ fp["W2"]
        x = _layer_norm_ref(h + x, fp["ln_g"], fp["ln_b"])
    return x, self_attns, enc_attns


# =========================== main ===========================
if __name__ == "__main__":
    key = jax.random.PRNGKey(0)
    k_param, k_dec, k_enc, k_encout = jax.random.split(key, 4)
    params = init_params(k_param)
    packed = pack_layer_params(params)

    dec_inputs = jax.random.randint(k_dec, (BATCH, TGT_LEN), 1, TGT_VOCAB)
    enc_inputs = jax.random.randint(k_enc, (BATCH, SRC_LEN), 1, SRC_VOCAB)
    enc_inputs = enc_inputs.at[:, -1].set(0)        # one pad token to exercise the pad mask
    enc_outputs = jax.random.normal(k_encout, (BATCH, LK, D_MODEL), jnp.float32)

    fwd = jax.jit(lambda di, ei, eo: decoder_forward(params, packed, di, ei, eo))
    dec_out, self_attns, enc_attns = fwd(dec_inputs, enc_inputs, enc_outputs)
    dec_out = jax.block_until_ready(dec_out)

    # shape checks (mirror the PyTorch module's return structure)
    assert dec_out.shape == (BATCH, TGT_LEN, D_MODEL), dec_out.shape
    assert len(self_attns) == N_LAYERS and len(enc_attns) == N_LAYERS
    assert self_attns[0].shape == (BATCH, N_HEADS, TGT_LEN, TGT_LEN)
    assert enc_attns[0].shape == (BATCH, N_HEADS, TGT_LEN, LK)
    assert bool(jnp.all(jnp.isfinite(dec_out)))

    # numerical check against a pure-JAX f32 reference (kernel uses bf16 MXU operands)
    ref_out, ref_sa, ref_ea = reference_forward(params, dec_inputs, enc_inputs, enc_outputs)
    assert float(jnp.max(jnp.abs(dec_out - ref_out))) < 0.15
    for l in range(N_LAYERS):
        assert float(jnp.max(jnp.abs(self_attns[l] - ref_sa[l]))) < 0.05
        assert float(jnp.max(jnp.abs(enc_attns[l] - ref_ea[l]))) < 0.05

    print("KERNEL_OK")
</pallas_src>

<mosaic_0001>
module attributes {stable_mosaic.version = 11 : i64} {
  func.func @_decoder_kernel(%arg0: i32, %arg1: memref<1x8x128xf32, #tpu.memory_space<vmem>>, %arg2: memref<1x128x128xbf16, #tpu.memory_space<vmem>>, %arg3: memref<1x8x8xf32, #tpu.memory_space<vmem>>, %arg4: memref<1x8x128xf32, #tpu.memory_space<vmem>>, %arg5: memref<2x128x384xbf16, #tpu.memory_space<vmem>>, %arg6: memref<2x128x128xbf16, #tpu.memory_space<vmem>>, %arg7: memref<2x128x128xbf16, #tpu.memory_space<vmem>>, %arg8: memref<2x128x256xbf16, #tpu.memory_space<vmem>>, %arg9: memref<2x128x128xbf16, #tpu.memory_space<vmem>>, %arg10: memref<2x128x256xbf16, #tpu.memory_space<vmem>>, %arg11: memref<2x256x128xbf16, #tpu.memory_space<vmem>>, %arg12: memref<2x6x128xf32, #tpu.memory_space<vmem>>, %arg13: memref<1x8x128xf32, #tpu.memory_space<vmem>>, %arg14: memref<1x8x8x8xf32, #tpu.memory_space<vmem>>, %arg15: memref<1x8x8x128xf32, #tpu.memory_space<vmem>>) attributes {dimension_semantics = [#tpu.dimension_semantics<parallel>], iteration_bounds = array<i64: 2>, scalar_prefetch = 0 : i64, scratch_operands = 0 : i64, tpu.core_type = #tpu.core_type<tc>, window_params = [{transform_indices = @transform_0, window_bounds = array<i64: 1, 8, 128>}, {transform_indices = @transform_1, window_bounds = array<i64: 1, 128, 128>}, {transform_indices = @transform_2, window_bounds = array<i64: 1, 8, 8>}, {transform_indices = @transform_3, window_bounds = array<i64: 1, 8, 128>}, {pipeline_mode = #tpu.pipeline_mode<synchronous>, transform_indices = @transform_4, window_bounds = array<i64: 2, 128, 384>}, {pipeline_mode = #tpu.pipeline_mode<synchronous>, transform_indices = @transform_5, window_bounds = array<i64: 2, 128, 128>}, {pipeline_mode = #tpu.pipeline_mode<synchronous>, transform_indices = @transform_6, window_bounds = array<i64: 2, 128, 128>}, {pipeline_mode = #tpu.pipeline_mode<synchronous>, transform_indices = @transform_7, window_bounds = array<i64: 2, 128, 256>}, {pipeline_mode = #tpu.pipeline_mode<synchronous>, transform_indices = @transform_8, window_bounds = array<i64: 2, 128, 128>}, {pipeline_mode = #tpu.pipeline_mode<synchronous>, transform_indices = @transform_9, window_bounds = array<i64: 2, 128, 256>}, {pipeline_mode = #tpu.pipeline_mode<synchronous>, transform_indices = @transform_10, window_bounds = array<i64: 2, 256, 128>}, {pipeline_mode = #tpu.pipeline_mode<synchronous>, transform_indices = @transform_11, window_bounds = array<i64: 2, 6, 128>}, {transform_indices = @transform_12, window_bounds = array<i64: 1, 8, 128>}, {transform_indices = @transform_13, window_bounds = array<i64: 1, 8, 8, 8>}, {transform_indices = @transform_14, window_bounds = array<i64: 1, 8, 8, 128>}]} {
    %c0 = arith.constant 0 : index
    %c0_0 = arith.constant 0 : index
    %c0_1 = arith.constant 0 : index
    %0 = vector.load %arg1[%c0, %c0_0, %c0_1] : memref<1x8x128xf32, #tpu.memory_space<vmem>>, vector<1x8x128xf32>
    %1 = vector.shape_cast %0 : vector<1x8x128xf32> to vector<8x128xf32>
    %c0_2 = arith.constant 0 : index
    %c0_3 = arith.constant 0 : index
    %c0_4 = arith.constant 0 : index
    %2 = vector.load %arg2[%c0_2, %c0_3, %c0_4] : memref<1x128x128xbf16, #tpu.memory_space<vmem>>, vector<1x128x128xbf16>
    %3 = vector.shape_cast %2 : vector<1x128x128xbf16> to vector<128x128xbf16>
    %c0_5 = arith.constant 0 : index
    %c0_6 = arith.constant 0 : index
    %c0_7 = arith.constant 0 : index
    %4 = vector.load %arg3[%c0_5, %c0_6, %c0_7] : memref<1x8x8xf32, #tpu.memory_space<vmem>>, vector<1x8x8xf32>
    %5 = vector.shape_cast %4 : vector<1x8x8xf32> to vector<8x8xf32>
    %c0_8 = arith.constant 0 : index
    %c0_9 = arith.constant 0 : index
    %c0_10 = arith.constant 0 : index
    %6 = vector.load %arg4[%c0_8, %c0_9, %c0_10] : memref<1x8x128xf32, #tpu.memory_space<vmem>>, vector<1x8x128xf32>
    %7 = vector.shape_cast %6 : vector<1x8x128xf32> to vector<8x128xf32>
    %c0_11 = arith.constant 0 : index
    %c0_12 = arith.constant 0 : index
    %c0_13 = arith.constant 0 : index
    %8 = vector.load %arg12[%c0_11, %c0_12, %c0_13] : memref<2x6x128xf32, #tpu.memory_space<vmem>>, vector<1x6x128xf32>
    %9 = vector.shape_cast %8 : vector<1x6x128xf32> to vector<6x128xf32>
    %10 = arith.truncf %1 : vector<8x128xf32> to vector<8x128xbf16>
    %c0_14 = arith.constant 0 : index
    %c0_15 = arith.constant 0 : index
    %c0_16 = arith.constant 0 : index
    %11 = vector.load %arg5[%c0_14, %c0_15, %c0_16] : memref<2x128x384xbf16, #tpu.memory_space<vmem>>, vector<1x128x384xbf16>
    %12 = vector.shape_cast %11 : vector<1x128x384xbf16> to vector<128x384xbf16>
    %cst = arith.constant dense<0.000000e+00> : vector<8x384xf32>
    %13 = tpu.matmul %10, %12, %cst {dimension_numbers = #tpu.dot_dimension_numbers<[1], [0], [0], [1], [0, 0, 1, 1], [], []>} : vector<8x128xbf16>, vector<128x384xbf16>, vector<8x384xf32> -> vector<8x384xf32>
    %14 = vector.extract_strided_slice %13 {offsets = [0, 0], sizes = [8, 128], strides = [1, 1]} : vector<8x384xf32> to vector<8x128xf32>
    %15 = arith.truncf %14 : vector<8x128xf32> to vector<8x128xbf16>
    %16 = vector.extract_strided_slice %13 {offsets = [0, 128], sizes = [8, 128], strides = [1, 1]} : vector<8x384xf32> to vector<8x128xf32>
    %17 = arith.truncf %16 : vector<8x128xf32> to vector<8x128xbf16>
    %18 = vector.extract_strided_slice %13 {offsets = [0, 256], sizes = [8, 128], strides = [1, 1]} : vector<8x384xf32> to vector<8x128xf32>
    %19 = arith.truncf %18 : vector<8x128xf32> to vector<8x128xbf16>
    %20 = vector.extract_strided_slice %15 {offsets = [0, 0], sizes = [8, 32], strides = [1, 1]} : vector<8x128xbf16> to vector<8x32xbf16>
    %21 = vector.extract_strided_slice %17 {offsets = [0, 0], sizes = [8, 32], strides = [1, 1]} : vector<8x128xbf16> to vector<8x32xbf16>
    %22 = vector.extract_strided_slice %19 {offsets = [0, 0], sizes = [8, 32], strides = [1, 1]} : vector<8x128xbf16> to vector<8x32xbf16>
    %cst_17 = arith.constant dense<0.000000e+00> : vector<8x8xf32>
    %23 = tpu.matmul %20, %21, %cst_17 {dimension_numbers = #tpu.dot_dimension_numbers<[1], [1], [0], [0], [0, 0, 1, 0], [], []>} : vector<8x32xbf16>, vector<8x32xbf16>, vector<8x8xf32> -> vector<8x8xf32>
    %cst_18 = arith.constant 0.176776692 : f32
    %24 = vector.broadcast %cst_18 : f32 to vector<8x8xf32>
    %25 = arith.mulf %23, %24 : vector<8x8xf32>
    %26 = arith.addf %25, %5 : vector<8x8xf32>
    %cst_19 = arith.constant dense<0xFF800000> : vector<8xf32>
    %27 = vector.multi_reduction <maximumf>, %26, %cst_19 [1] : vector<8x8xf32> to vector<8xf32>
    %28 = vector.shape_cast %27 : vector<8xf32> to vector<8x1xf32>
    %29 = vector.broadcast %28 : vector<8x1xf32> to vector<8x8xf32>
    %30 = arith.subf %26, %29 : vector<8x8xf32>
    %31 = math.exp %30 : vector<8x8xf32>
    %cst_20 = arith.constant dense<0.000000e+00> : vector<8xf32>
    %32 = vector.multi_reduction <add>, %31, %cst_20 [1] : vector<8x8xf32> to vector<8xf32>
    %33 = vector.shape_cast %32 : vector<8xf32> to vector<8x1xf32>
    %34 = vector.broadcast %33 : vector<8x1xf32> to vector<8x8xf32>
    %35 = arith.divf %31, %34 : vector<8x8xf32>
    %c0_21 = arith.constant 0 : index
    %c0_22 = arith.constant 0 : index
    %c0_23 = arith.constant 0 : index
    %c0_24 = arith.constant 0 : index
    %36 = vector.load %arg14[%c0_21, %c0_22, %c0_23, %c0_24] : memref<1x8x8x8xf32, #tpu.memory_space<vmem>>, vector<1x1x8x8xf32>
    %37 = vector.shape_cast %36 : vector<1x1x8x8xf32> to vector<8x8xf32>
    %38 = vector.shape_cast %35 : vector<8x8xf32> to vector<1x1x8x8xf32>
    tpu.vector_store %arg14[%c0_21, %c0_22, %c0_23, %c0_24], %38 {strides = array<i32>} : memref<1x8x8x8xf32, #tpu.memory_space<vmem>>, vector<1x1x8x8xf32>,
    %39 = arith.truncf %35 : vector<8x8xf32> to vector<8x8xbf16>
    %cst_25 = arith.constant dense<0.000000e+00> : vector<8x32xf32>
    %40 = tpu.matmul %39, %22, %cst_25 {dimension_numbers = #tpu.dot_dimension_numbers<[1], [0], [0], [1], [0, 0, 1, 1], [], []>} : vector<8x8xbf16>, vector<8x32xbf16>, vector<8x32xf32> -> vector<8x32xf32>
    %41 = vector.extract_strided_slice %15 {offsets = [0, 32], sizes = [8, 32], strides = [1, 1]} : vector<8x128xbf16> to vector<8x32xbf16>
    %42 = vector.extract_strided_slice %17 {offsets = [0, 32], sizes = [8, 32], strides = [1, 1]} : vector<8x128xbf16> to vector<8x32xbf16>
    %43 = vector.extract_strided_slice %19 {offsets = [0, 32], sizes = [8, 32], strides = [1, 1]} : vector<8x128xbf16> to vector<8x32xbf16>
    %cst_26 = arith.constant dense<0.000000e+00> : vector<8x8xf32>
    %44 = tpu.matmul %41, %42, %cst_26 {dimension_numbers = #tpu.dot_dimension_numbers<[1], [1], [0], [0], [0, 0, 1, 0], [], []>} : vector<8x32xbf16>, vector<8x32xbf16>, vector<8x8xf32> -> vector<8x8xf32>
    %cst_27 = arith.constant 0.176776692 : f32
    %45 = vector.broadcast %cst_27 : f32 to vector<8x8xf32>
    %46 = arith.mulf %44, %45 : vector<8x8xf32>
    %47 = arith.addf %46, %5 : vector<8x8xf32>
    %cst_28 = arith.constant dense<0xFF800000> : vector<8xf32>
    %48 = vector.multi_reduction <maximumf>, %47, %cst_28 [1] : vector<8x8xf32> to vector<8xf32>
    %49 = vector.shape_cast %48 : vector<8xf32> to vector<8x1xf32>
    %50 = vector.broadcast %49 : vector<8x1xf32> to vector<8x8xf32>
    %51 = arith.subf %47, %50 : vector<8x8xf32>
    %52 = math.exp %51 : vector<8x8xf32>
    %cst_29 = arith.constant dense<0.000000e+00> : vector<8xf32>
    %53 = vector.multi_reduction <add>, %52, %cst_29 [1] : vector<8x8xf32> to vector<8xf32>
    %54 = vector.shape_cast %53 : vector<8xf32> to vector<8x1xf32>
    %55 = vector.broadcast %54 : vector<8x1xf32> to vector<8x8xf32>
    %56 = arith.divf %52, %55 : vector<8x8xf32>
    %c0_30 = arith.constant 0 : index
    %c1 = arith.constant 1 : index
    %c0_31 = arith.constant 0 : index
    %c0_32 = arith.constant 0 : index
    %57 = vector.load %arg14[%c0_30, %c1, %c0_31, %c0_32] : memref<1x8x8x8xf32, #tpu.memory_space<vmem>>, vector<1x1x8x8xf32>
    %58 = vector.shape_cast %57 : vector<1x1x8x8xf32> to vector<8x8xf32>
    %59 = vector.shape_cast %56 : vector<8x8xf32> to vector<1x1x8x8xf32>
    tpu.vector_store %arg14[%c0_30, %c1, %c0_31, %c0_32], %59 {strides = array<i32>} : memref<1x8x8x8xf32, #tpu.memory_space<vmem>>, vector<1x1x8x8xf32>,
    %60 = arith.truncf %56 : vector<8x8xf32> to vector<8x8xbf16>
    %cst_33 = arith.constant dense<0.000000e+00> : vector<8x32xf32>
    %61 = tpu.matmul %60, %43, %cst_33 {dimension_numbers = #tpu.dot_dimension_numbers<[1], [0], [0], [1], [0, 0, 1, 1], [], []>} : vector<8x8xbf16>, vector<8x32xbf16>, vector<8x32xf32> -> vector<8x32xf32>
    %62 = vector.extract_strided_slice %15 {offsets = [0, 64], sizes = [8, 32], strides = [1, 1]} : vector<8x128xbf16> to vector<8x32xbf16>
    %63 = vector.extract_strided_slice %17 {offsets = [0, 64], sizes = [8, 32], strides = [1, 1]} : vector<8x128xbf16> to vector<8x32xbf16>
    %64 = vector.extract_strided_slice %19 {offsets = [0, 64], sizes = [8, 32], strides = [1, 1]} : vector<8x128xbf16> to vector<8x32xbf16>
    %cst_34 = arith.constant dense<0.000000e+00> : vector<8x8xf32>
    %65 = tpu.matmul %62, %63, %cst_34 {dimension_numbers = #tpu.dot_dimension_numbers<[1], [1], [0], [0], [0, 0, 1, 0], [], []>} : vector<8x32xbf16>, vector<8x32xbf16>, vector<8x8xf32> -> vector<8x8xf32>
    %cst_35 = arith.constant 0.176776692 : f32
    %66 = vector.broadcast %cst_35 : f32 to vector<8x8xf32>
    %67 = arith.mulf %65, %66 : vector<8x8xf32>
    %68 = arith.addf %67, %5 : vector<8x8xf32>
    %cst_36 = arith.constant dense<0xFF800000> : vector<8xf32>
    %69 = vector.multi_reduction <maximumf>, %68, %cst_36 [1] : vector<8x8xf32> to vector<8xf32>
    %70 = vector.shape_cast %69 : vector<8xf32> to vector<8x1xf32>
    %71 = vector.broadcast %70 : vector<8x1xf32> to vector<8x8xf32>
    %72 = arith.subf %68, %71 : vector<8x8xf32>
    %73 = math.exp %72 : vector<8x8xf32>
    %cst_37 = arith.constant dense<0.000000e+00> : vector<8xf32>
    %74 = vector.multi_reduction <add>, %73, %cst_37 [1] : vector<8x8xf32> to vector<8xf32>
    %75 = vector.shape_cast %74 : vector<8xf32> to vector<8x1xf32>
    %76 = vector.broadcast %75 : vector<8x1xf32> to vector<8x8xf32>
    %77 = arith.divf %73, %76 : vector<8x8xf32>
    %c0_38 = arith.constant 0 : index
    %c2 = arith.constant 2 : index
    %c0_39 = arith.constant 0 : index
    %c0_40 = arith.constant 0 : index
    %78 = vector.load %arg14[%c0_38, %c2, %c0_39, %c0_40] : memref<1x8x8x8xf32, #tpu.memory_space<vmem>>, vector<1x1x8x8xf32>
    %79 = vector.shape_cast %78 : vector<1x1x8x8xf32> to vector<8x8xf32>
    %80 = vector.shape_cast %77 : vector<8x8xf32> to vector<1x1x8x8xf32>
    tpu.vector_store %arg14[%c0_38, %c2, %c0_39, %c0_40], %80 {strides = array<i32>} : memref<1x8x8x8xf32, #tpu.memory_space<vmem>>, vector<1x1x8x8xf32>,
    %81 = arith.truncf %77 : vector<8x8xf32> to vector<8x8xbf16>
    %cst_41 = arith.constant dense<0.000000e+00> : vector<8x32xf32>
    %82 = tpu.matmul %81, %64, %cst_41 {dimension_numbers = #tpu.dot_dimension_numbers<[1], [0], [0], [1], [0, 0, 1, 1], [], []>} : vector<8x8xbf16>, vector<8x32xbf16>, vector<8x32xf32> -> vector<8x32xf32>
    %83 = vector.extract_strided_slice %15 {offsets = [0, 96], sizes = [8, 32], strides = [1, 1]} : vector<8x128xbf16> to vector<8x32xbf16>
    %84 = vector.extract_strided_slice %17 {offsets = [0, 96], sizes = [8, 32], strides = [1, 1]} : vector<8x128xbf16> to vector<8x32xbf16>
    %85 = vector.extract_strided_slice %19 {offsets = [0, 96], sizes = [8, 32], strides = [1, 1]} : vector<8x128xbf16> to vector<8x32xbf16>
    %cst_42 = arith.constant dense<0.000000e+00> : vector<8x8xf32>
    %86 = tpu.matmul %83, %84, %cst_42 {dimension_numbers = #tpu.dot_dimension_numbers<[1], [1], [0], [0], [0, 0, 1, 0], [], []>} : vector<8x32xbf16>, vector<8x32xbf16>, vector<8x8xf32> -> vector<8x8xf32>
    %cst_43 = arith.constant 0.176776692 : f32
    %87 = vector.broadcast %cst_43 : f32 to vector<8x8xf32>
    %88 = arith.mulf %86, %87 : vector<8x8xf32>
    %89 = arith.addf %88, %5 : vector<8x8xf32>
    %cst_44 = arith.constant dense<0xFF800000> : vector<8xf32>
    %90 = vector.multi_reduction <maximumf>, %89, %cst_44 [1] : vector<8x8xf32> to vector<8xf32>
    %91 = vector.shape_cast %90 : vector<8xf32> to vector<8x1xf32>
    %92 = vector.broadcast %91 : vector<8x1xf32> to vector<8x8xf32>
    %93 = arith.subf %89, %92 : vector<8x8xf32>
    %94 = math.exp %93 : vector<8x8xf32>
    %cst_45 = arith.constant dense<0.000000e+00> : vector<8xf32>
    %95 = vector.multi_reduction <add>, %94, %cst_45 [1] : vector<8x8xf32> to vector<8xf32>
    %96 = vector.shape_cast %95 : vector<8xf32> to vector<8x1xf32>
    %97 = vector.broadcast %96 : vector<8x1xf32> to vector<8x8xf32>
    %98 = arith.divf %94, %97 : vector<8x8xf32>
    %c0_46 = arith.constant 0 : index
    %c3 = arith.constant 3 : index
    %c0_47 = arith.constant 0 : index
    %c0_48 = arith.constant 0 : index
    %99 = vector.load %arg14[%c0_46, %c3, %c0_47, %c0_48] : memref<1x8x8x8xf32, #tpu.memory_space<vmem>>, vector<1x1x8x8xf32>
    %100 = vector.shape_cast %99 : vector<1x1x8x8xf32> to vector<8x8xf32>
    %101 = vector.shape_cast %98 : vector<8x8xf32> to vector<1x1x8x8xf32>
    tpu.vector_store %arg14[%c0_46, %c3, %c0_47, %c0_48], %101 {strides = array<i32>} : memref<1x8x8x8xf32, #tpu.memory_space<vmem>>, vector<1x1x8x8xf32>,
    %102 = arith.truncf %98 : vector<8x8xf32> to vector<8x8xbf16>
    %cst_49 = arith.constant dense<0.000000e+00> : vector<8x32xf32>
    %103 = tpu.matmul %102, %85, %cst_49 {dimension_numbers = #tpu.dot_dimension_numbers<[1], [0], [0], [1], [0, 0, 1, 1], [], []>} : vector<8x8xbf16>, vector<8x32xbf16>, vector<8x32xf32> -> vector<8x32xf32>
    %104 = tpu.concatenate %40, %61, %82, %103 in 1 : vector<8x32xf32>, vector<8x32xf32>, vector<8x32xf32>, vector<8x32xf32> -> vector<8x128xf32>
    %105 = arith.truncf %104 : vector<8x128xf32> to vector<8x128xbf16>
    %c0_50 = arith.constant 0 : index
    %c0_51 = arith.constant 0 : index
    %c0_52 = arith.constant 0 : index
    %106 = vector.load %arg6[%c0_50, %c0_51, %c0_52] : memref<2x128x128xbf16, #tpu.memory_space<vmem>>, vector<1x128x128xbf16>
    %107 = vector.shape_cast %106 : vector<1x128x128xbf16> to vector<128x128xbf16>
    %cst_53 = arith.constant dense<0.000000e+00> : vector<8x128xf32>
    %108 = tpu.matmul %105, %107, %cst_53 {dimension_numbers = #tpu.dot_dimension_numbers<[1], [0], [0], [1], [0, 0, 1, 1], [], []>} : vector<8x128xbf16>, vector<128x128xbf16>, vector<8x128xf32> -> vector<8x128xf32>
    %109 = arith.addf %108, %1 : vector<8x128xf32>
    %110 = vector.extract_strided_slice %9 {offsets = [0, 0], sizes = [1, 128], strides = [1, 1]} : vector<6x128xf32> to vector<1x128xf32>
    %111 = vector.extract_strided_slice %9 {offsets = [1, 0], sizes = [1, 128], strides = [1, 1]} : vector<6x128xf32> to vector<1x128xf32>
    %cst_54 = arith.constant dense<0.000000e+00> : vector<8xf32>
    %112 = vector.multi_reduction <add>, %109, %cst_54 [1] : vector<8x128xf32> to vector<8xf32>
    %113 = vector.shape_cast %112 : vector<8xf32> to vector<8x1xf32>
    %cst_55 = arith.constant 1.280000e+02 : f32
    %114 = vector.broadcast %cst_55 : f32 to vector<8x1xf32>
    %115 = arith.divf %113, %114 : vector<8x1xf32>
    %116 = vector.broadcast %115 : vector<8x1xf32> to vector<8x128xf32>
    %117 = arith.subf %109, %116 : vector<8x128xf32>
    %118 = arith.mulf %117, %117 : vector<8x128xf32>
    %cst_56 = arith.constant dense<0.000000e+00> : vector<8xf32>
    %119 = vector.multi_reduction <add>, %118, %cst_56 [1] : vector<8x128xf32> to vector<8xf32>
    %120 = vector.shape_cast %119 : vector<8xf32> to vector<8x1xf32>
    %cst_57 = arith.constant 1.280000e+02 : f32
    %121 = vector.broadcast %cst_57 : f32 to vector<8x1xf32>
    %122 = arith.divf %120, %121 : vector<8x1xf32>
    %123 = vector.broadcast %115 : vector<8x1xf32> to vector<8x128xf32>
    %124 = arith.subf %109, %123 : vector<8x128xf32>
    %cst_58 = arith.constant 9.99999974E-6 : f32
    %125 = vector.broadcast %cst_58 : f32 to vector<8x1xf32>
    %126 = arith.addf %122, %125 : vector<8x1xf32>
    %127 = math.rsqrt %126 : vector<8x1xf32>
    %128 = vector.broadcast %127 : vector<8x1xf32> to vector<8x128xf32>
    %129 = arith.mulf %124, %128 : vector<8x128xf32>
    %130 = vector.broadcast %110 : vector<1x128xf32> to vector<8x128xf32>
    %131 = arith.mulf %129, %130 : vector<8x128xf32>
    %132 = vector.broadcast %111 : vector<1x128xf32> to vector<8x128xf32>
    %133 = arith.addf %131, %132 : vector<8x128xf32>
    %134 = arith.truncf %133 : vector<8x128xf32> to vector<8x128xbf16>
    %c0_59 = arith.constant 0 : index
    %c0_60 = arith.constant 0 : index
    %c0_61 = arith.constant 0 : index
    %135 = vector.load %arg7[%c0_59, %c0_60, %c0_61] : memref<2x128x128xbf16, #tpu.memory_space<vmem>>, vector<1x128x128xbf16>
    %136 = vector.shape_cast %135 : vector<1x128x128xbf16> to vector<128x128xbf16>
    %cst_62 = arith.constant dense<0.000000e+00> : vector<8x128xf32>
    %137 = tpu.matmul %134, %136, %cst_62 {dimension_numbers = #tpu.dot_dimension_numbers<[1], [0], [0], [1], [0, 0, 1, 1], [], []>} : vector<8x128xbf16>, vector<128x128xbf16>, vector<8x128xf32> -> vector<8x128xf32>
    %138 = arith.truncf %137 : vector<8x128xf32> to vector<8x128xbf16>
    %c0_63 = arith.constant 0 : index
    %c0_64 = arith.constant 0 : index
    %c0_65 = arith.constant 0 : index
    %139 = vector.load %arg8[%c0_63, %c0_64, %c0_65] : memref<2x128x256xbf16, #tpu.memory_space<vmem>>, vector<1x128x256xbf16>
    %140 = vector.shape_cast %139 : vector<1x128x256xbf16> to vector<128x256xbf16>
    %cst_66 = arith.constant dense<0.000000e+00> : vector<128x256xf32>
    %141 = tpu.matmul %3, %140, %cst_66 {dimension_numbers = #tpu.dot_dimension_numbers<[1], [0], [0], [1], [0, 0, 1, 1], [], []>} : vector<128x128xbf16>, vector<128x256xbf16>, vector<128x256xf32> -> vector<128x256xf32>
    %142 = vector.extract_strided_slice %141 {offsets = [0, 0], sizes = [128, 128], strides = [1, 1]} : vector<128x256xf32> to vector<128x128xf32>
    %143 = arith.truncf %142 : vector<128x128xf32> to vector<128x128xbf16>
    %144 = vector.extract_strided_slice %141 {offsets = [0, 128], sizes = [128, 128], strides = [1, 1]} : vector<128x256xf32> to vector<128x128xf32>
    %145 = arith.truncf %144 : vector<128x128xf32> to vector<128x128xbf16>
    %146 = vector.extract_strided_slice %138 {offsets = [0, 0], sizes = [8, 32], strides = [1, 1]} : vector<8x128xbf16> to vector<8x32xbf16>
    %147 = vector.extract_strided_slice %143 {offsets = [0, 0], sizes = [128, 32], strides = [1, 1]} : vector<128x128xbf16> to vector<128x32xbf16>
    %148 = vector.extract_strided_slice %145 {offsets = [0, 0], sizes = [128, 32], strides = [1, 1]} : vector<128x128xbf16> to vector<128x32xbf16>
    %cst_67 = arith.constant dense<0.000000e+00> : vector<8x128xf32>
    %149 = tpu.matmul %146, %147, %cst_67 {dimension_numbers = #tpu.dot_dimension_numbers<[1], [1], [0], [0], [0, 0, 1, 0], [], []>} : vector<8x32xbf16>, vector<128x32xbf16>, vector<8x128xf32> -> vector<8x128xf32>
    %cst_68 = arith.constant 0.176776692 : f32
    %150 = vector.broadcast %cst_68 : f32 to vector<8x128xf32>
    %151 = arith.mulf %149, %150 : vector<8x128xf32>
    %152 = arith.addf %151, %7 : vector<8x128xf32>
    %cst_69 = arith.constant dense<0xFF800000> : vector<8xf32>
    %153 = vector.multi_reduction <maximumf>, %152, %cst_69 [1] : vector<8x128xf32> to vector<8xf32>
    %154 = vector.shape_cast %153 : vector<8xf32> to vector<8x1xf32>
    %155 = vector.broadcast %154 : vector<8x1xf32> to vector<8x128xf32>
    %156 = arith.subf %152, %155 : vector<8x128xf32>
    %157 = math.exp %156 : vector<8x128xf32>
    %cst_70 = arith.constant dense<0.000000e+00> : vector<8xf32>
    %158 = vector.multi_reduction <add>, %157, %cst_70 [1] : vector<8x128xf32> to vector<8xf32>
    %159 = vector.shape_cast %158 : vector<8xf32> to vector<8x1xf32>
    %160 = vector.broadcast %159 : vector<8x1xf32> to vector<8x128xf32>
    %161 = arith.divf %157, %160 : vector<8x128xf32>
    %c0_71 = arith.constant 0 : index
    %c0_72 = arith.constant 0 : index
    %c0_73 = arith.constant 0 : index
    %c0_74 = arith.constant 0 : index
    %162 = vector.load %arg15[%c0_71, %c0_72, %c0_73, %c0_74] : memref<1x8x8x128xf32, #tpu.memory_space<vmem>>, vector<1x1x8x128xf32>
    %163 = vector.shape_cast %162 : vector<1x1x8x128xf32> to vector<8x128xf32>
    %164 = vector.shape_cast %161 : vector<8x128xf32> to vector<1x1x8x128xf32>
    tpu.vector_store %arg15[%c0_71, %c0_72, %c0_73, %c0_74], %164 {strides = array<i32>} : memref<1x8x8x128xf32, #tpu.memory_space<vmem>>, vector<1x1x8x128xf32>,
    %165 = arith.truncf %161 : vector<8x128xf32> to vector<8x128xbf16>
    %cst_75 = arith.constant dense<0.000000e+00> : vector<8x32xf32>
    %166 = tpu.matmul %165, %148, %cst_75 {dimension_numbers = #tpu.dot_dimension_numbers<[1], [0], [0], [1], [0, 0, 1, 1], [], []>} : vector<8x128xbf16>, vector<128x32xbf16>, vector<8x32xf32> -> vector<8x32xf32>
    %167 = vector.extract_strided_slice %138 {offsets = [0, 32], sizes = [8, 32], strides = [1, 1]} : vector<8x128xbf16> to vector<8x32xbf16>
    %168 = vector.extract_strided_slice %143 {offsets = [0, 32], sizes = [128, 32], strides = [1, 1]} : vector<128x128xbf16> to vector<128x32xbf16>
    %169 = vector.extract_strided_slice %145 {offsets = [0, 32], sizes = [128, 32], strides = [1, 1]} : vector<128x128xbf16> to vector<128x32xbf16>
    %cst_76 = arith.constant dense<0.000000e+00> : vector<8x128xf32>
    %170 = tpu.matmul %167, %168, %cst_76 {dimension_numbers = #tpu.dot_dimension_numbers<[1], [1], [0], [0], [0, 0, 1, 0], [], []>} : vector<8x32xbf16>, vector<128x32xbf16>, vector<8x128xf32> -> vector<8x128xf32>
    %cst_77 = arith.constant 0.176776692 : f32
    %171 = vector.broadcast %cst_77 : f32 to vector<8x128xf32>
    %172 = arith.mulf %170, %171 : vector<8x128xf32>
    %173 = arith.addf %172, %7 : vector<8x128xf32>
    %cst_78 = arith.constant dense<0xFF800000> : vector<8xf32>
    %174 = vector.multi_reduction <maximumf>, %173, %cst_78 [1] : vector<8x128xf32> to vector<8xf32>
    %175 = vector.shape_cast %174 : vector<8xf32> to vector<8x1xf32>
    %176 = vector.broadcast %175 : vector<8x1xf32> to vector<8x128xf32>
    %177 = arith.subf %173, %176 : vector<8x128xf32>
    %178 = math.exp %177 : vector<8x128xf32>
    %cst_79 = arith.constant dense<0.000000e+00> : vector<8xf32>
    %179 = vector.multi_reduction <add>, %178, %cst_79 [1] : vector<8x128xf32> to vector<8xf32>
    %180 = vector.shape_cast %179 : vector<8xf32> to vector<8x1xf32>
    %181 = vector.broadcast %180 : vector<8x1xf32> to vector<8x128xf32>
    %182 = arith.divf %178, %181 : vector<8x128xf32>
    %c0_80 = arith.constant 0 : index
    %c1_81 = arith.constant 1 : index
    %c0_82 = arith.constant 0 : index
    %c0_83 = arith.constant 0 : index
    %183 = vector.load %arg15[%c0_80, %c1_81, %c0_82, %c0_83] : memref<1x8x8x128xf32, #tpu.memory_space<vmem>>, vector<1x1x8x128xf32>
    %184 = vector.shape_cast %183 : vector<1x1x8x128xf32> to vector<8x128xf32>
    %185 = vector.shape_cast %182 : vector<8x128xf32> to vector<1x1x8x128xf32>
    tpu.vector_store %arg15[%c0_80, %c1_81, %c0_82, %c0_83], %185 {strides = array<i32>} : memref<1x8x8x128xf32, #tpu.memory_space<vmem>>, vector<1x1x8x128xf32>,
    %186 = arith.truncf %182 : vector<8x128xf32> to vector<8x128xbf16>
    %cst_84 = arith.constant dense<0.000000e+00> : vector<8x32xf32>
    %187 = tpu.matmul %186, %169, %cst_84 {dimension_numbers = #tpu.dot_dimension_numbers<[1], [0], [0], [1], [0, 0, 1, 1], [], []>} : vector<8x128xbf16>, vector<128x32xbf16>, vector<8x32xf32> -> vector<8x32xf32>
    %188 = vector.extract_strided_slice %138 {offsets = [0, 64], sizes = [8, 32], strides = [1, 1]} : vector<8x128xbf16> to vector<8x32xbf16>
    %189 = vector.extract_strided_slice %143 {offsets = [0, 64], sizes = [128, 32], strides = [1, 1]} : vector<128x128xbf16> to vector<128x32xbf16>
    %190 = vector.extract_strided_slice %145 {offsets = [0, 64], sizes = [128, 32], strides = [1, 1]} : vector<128x128xbf16> to vector<128x32xbf16>
    %cst_85 = arith.constant dense<0.000000e+00> : vector<8x128xf32>
    %191 = tpu.matmul %188, %189, %cst_85 {dimension_numbers = #tpu.dot_dimension_numbers<[1], [1], [0], [0], [0, 0, 1, 0], [], []>} : vector<8x32xbf16>, vector<128x32xbf16>, vector<8x128xf32> -> vector<8x128xf32>
    %cst_86 = arith.constant 0.176776692 : f32
    %192 = vector.broadcast %cst_86 : f32 to vector<8x128xf32>
    %193 = arith.mulf %191, %192 : vector<8x128xf32>
    %194 = arith.addf %193, %7 : vector<8x128xf32>
    %cst_87 = arith.constant dense<0xFF800000> : vector<8xf32>
    %195 = vector.multi_reduction <maximumf>, %194, %cst_87 [1] : vector<8x128xf32> to vector<8xf32>
    %196 = vector.shape_cast %195 : vector<8xf32> to vector<8x1xf32>
    %197 = vector.broadcast %196 : vector<8x1xf32> to vector<8x128xf32>
    %198 = arith.subf %194, %197 : vector<8x128xf32>
    %199 = math.exp %198 : vector<8x128xf32>
    %cst_88 = arith.constant dense<0.000000e+00> : vector<8xf32>
    %200 = vector.multi_reduction <add>, %199, %cst_88 [1] : vector<8x128xf32> to vector<8xf32>
    %201 = vector.shape_cast %200 : vector<8xf32> to vector<8x1xf32>
    %202 = vector.broadcast %201 : vector<8x1xf32> to vector<8x128xf32>
    %203 = arith.divf %199, %202 : vector<8x128xf32>
    %c0_89 = arith.constant 0 : index
    %c2_90 = arith.constant 2 : index
    %c0_91 = arith.constant 0 : index
    %c0_92 = arith.constant 0 : index
    %204 = vector.load %arg15[%c0_89, %c2_90, %c0_91, %c0_92] : memref<1x8x8x128xf32, #tpu.memory_space<vmem>>, vector<1x1x8x128xf32>
    %205 = vector.shape_cast %204 : vector<1x1x8x128xf32> to vector<8x128xf32>
    %206 = vector.shape_cast %203 : vector<8x128xf32> to vector<1x1x8x128xf32>
    tpu.vector_store %arg15[%c0_89, %c2_90, %c0_91, %c0_92], %206 {strides = array<i32>} : memref<1x8x8x128xf32, #tpu.memory_space<vmem>>, vector<1x1x8x128xf32>,
    %207 = arith.truncf %203 : vector<8x128xf32> to vector<8x128xbf16>
    %cst_93 = arith.constant dense<0.000000e+00> : vector<8x32xf32>
    %208 = tpu.matmul %207, %190, %cst_93 {dimension_numbers = #tpu.dot_dimension_numbers<[1], [0], [0], [1], [0, 0, 1, 1], [], []>} : vector<8x128xbf16>, vector<128x32xbf16>, vector<8x32xf32> -> vector<8x32xf32>
    %209 = vector.extract_strided_slice %138 {offsets = [0, 96], sizes = [8, 32], strides = [1, 1]} : vector<8x128xbf16> to vector<8x32xbf16>
    %210 = vector.extract_strided_slice %143 {offsets = [0, 96], sizes = [128, 32], strides = [1, 1]} : vector<128x128xbf16> to vector<128x32xbf16>
    %211 = vector.extract_strided_slice %145 {offsets = [0, 96], sizes = [128, 32], strides = [1, 1]} : vector<128x128xbf16> to vector<128x32xbf16>
    %cst_94 = arith.constant dense<0.000000e+00> : vector<8x128xf32>
    %212 = tpu.matmul %209, %210, %cst_94 {dimension_numbers = #tpu.dot_dimension_numbers<[1], [1], [0], [0], [0, 0, 1, 0], [], []>} : vector<8x32xbf16>, vector<128x32xbf16>, vector<8x128xf32> -> vector<8x128xf32>
    %cst_95 = arith.constant 0.176776692 : f32
    %213 = vector.broadcast %cst_95 : f32 to vector<8x128xf32>
    %214 = arith.mulf %212, %213 : vector<8x128xf32>
    %215 = arith.addf %214, %7 : vector<8x128xf32>
    %cst_96 = arith.constant dense<0xFF800000> : vector<8xf32>
    %216 = vector.multi_reduction <maximumf>, %215, %cst_96 [1] : vector<8x128xf32> to vector<8xf32>
    %217 = vector.shape_cast %216 : vector<8xf32> to vector<8x1xf32>
    %218 = vector.broadcast %217 : vector<8x1xf32> to vector<8x128xf32>
    %219 = arith.subf %215, %218 : vector<8x128xf32>
    %220 = math.exp %219 : vector<8x128xf32>
    %cst_97 = arith.constant dense<0.000000e+00> : vector<8xf32>
    %221 = vector.multi_reduction <add>, %220, %cst_97 [1] : vector<8x128xf32> to vector<8xf32>
    %222 = vector.shape_cast %221 : vector<8xf32> to vector<8x1xf32>
    %223 = vector.broadcast %222 : vector<8x1xf32> to vector<8x128xf32>
    %224 = arith.divf %220, %223 : vector<8x128xf32>
    %c0_98 = arith.constant 0 : index
    %c3_99 = arith.constant 3 : index
    %c0_100 = arith.constant 0 : index
    %c0_101 = arith.constant 0 : index
    %225 = vector.load %arg15[%c0_98, %c3_99, %c0_100, %c0_101] : memref<1x8x8x128xf32, #tpu.memory_space<vmem>>, vector<1x1x8x128xf32>
    %226 = vector.shape_cast %225 : vector<1x1x8x128xf32> to vector<8x128xf32>
    %227 = vector.shape_cast %224 : vector<8x128xf32> to vector<1x1x8x128xf32>
    tpu.vector_store %arg15[%c0_98, %c3_99, %c0_100, %c0_101], %227 {strides = array<i32>} : memref<1x8x8x128xf32, #tpu.memory_space<vmem>>, vector<1x1x8x128xf32>,
    %228 = arith.truncf %224 : vector<8x128xf32> to vector<8x128xbf16>
    %cst_102 = arith.constant dense<0.000000e+00> : vector<8x32xf32>
    %229 = tpu.matmul %228, %211, %cst_102 {dimension_numbers = #tpu.dot_dimension_numbers<[1], [0], [0], [1], [0, 0, 1, 1], [], []>} : vector<8x128xbf16>, vector<128x32xbf16>, vector<8x32xf32> -> vector<8x32xf32>
    %230 = tpu.concatenate %166, %187, %208, %229 in 1 : vector<8x32xf32>, vector<8x32xf32>, vector<8x32xf32>, vector<8x32xf32> -> vector<8x128xf32>
    %231 = arith.truncf %230 : vector<8x128xf32> to vector<8x128xbf16>
    %c0_103 = arith.constant 0 : index
    %c0_104 = arith.constant 0 : index
    %c0_105 = arith.constant 0 : index
    %232 = vector.load %arg9[%c0_103, %c0_104, %c0_105] : memref<2x128x128xbf16, #tpu.memory_space<vmem>>, vector<1x128x128xbf16>
    %233 = vector.shape_cast %232 : vector<1x128x128xbf16> to vector<128x128xbf16>
    %cst_106 = arith.constant dense<0.000000e+00> : vector<8x128xf32>
    %234 = tpu.matmul %231, %233, %cst_106 {dimension_numbers = #tpu.dot_dimension_numbers<[1], [0], [0], [1], [0, 0, 1, 1], [], []>} : vector<8x128xbf16>, vector<128x128xbf16>, vector<8x128xf32> -> vector<8x128xf32>
    %235 = arith.addf %234, %133 : vector<8x128xf32>
    %236 = vector.extract_strided_slice %9 {offsets = [2, 0], sizes = [1, 128], strides = [1, 1]} : vector<6x128xf32> to vector<1x128xf32>
    %237 = vector.extract_strided_slice %9 {offsets = [3, 0], sizes = [1, 128], strides = [1, 1]} : vector<6x128xf32> to vector<1x128xf32>
    %cst_107 = arith.constant dense<0.000000e+00> : vector<8xf32>
    %238 = vector.multi_reduction <add>, %235, %cst_107 [1] : vector<8x128xf32> to vector<8xf32>
    %239 = vector.shape_cast %238 : vector<8xf32> to vector<8x1xf32>
    %cst_108 = arith.constant 1.280000e+02 : f32
    %240 = vector.broadcast %cst_108 : f32 to vector<8x1xf32>
    %241 = arith.divf %239, %240 : vector<8x1xf32>
    %242 = vector.broadcast %241 : vector<8x1xf32> to vector<8x128xf32>
    %243 = arith.subf %235, %242 : vector<8x128xf32>
    %244 = arith.mulf %243, %243 : vector<8x128xf32>
    %cst_109 = arith.constant dense<0.000000e+00> : vector<8xf32>
    %245 = vector.multi_reduction <add>, %244, %cst_109 [1] : vector<8x128xf32> to vector<8xf32>
    %246 = vector.shape_cast %245 : vector<8xf32> to vector<8x1xf32>
    %cst_110 = arith.constant 1.280000e+02 : f32
    %247 = vector.broadcast %cst_110 : f32 to vector<8x1xf32>
    %248 = arith.divf %246, %247 : vector<8x1xf32>
    %249 = vector.broadcast %241 : vector<8x1xf32> to vector<8x128xf32>
    %250 = arith.subf %235, %249 : vector<8x128xf32>
    %cst_111 = arith.constant 9.99999974E-6 : f32
    %251 = vector.broadcast %cst_111 : f32 to vector<8x1xf32>
    %252 = arith.addf %248, %251 : vector<8x1xf32>
    %253 = math.rsqrt %252 : vector<8x1xf32>
    %254 = vector.broadcast %253 : vector<8x1xf32> to vector<8x128xf32>
    %255 = arith.mulf %250, %254 : vector<8x128xf32>
    %256 = vector.broadcast %236 : vector<1x128xf32> to vector<8x128xf32>
    %257 = arith.mulf %255, %256 : vector<8x128xf32>
    %258 = vector.broadcast %237 : vector<1x128xf32> to vector<8x128xf32>
    %259 = arith.addf %257, %258 : vector<8x128xf32>
    %260 = arith.truncf %259 : vector<8x128xf32> to vector<8x128xbf16>
    %c0_112 = arith.constant 0 : index
    %c0_113 = arith.constant 0 : index
    %c0_114 = arith.constant 0 : index
    %261 = vector.load %arg10[%c0_112, %c0_113, %c0_114] : memref<2x128x256xbf16, #tpu.memory_space<vmem>>, vector<1x128x256xbf16>
    %262 = vector.shape_cast %261 : vector<1x128x256xbf16> to vector<128x256xbf16>
    %cst_115 = arith.constant dense<0.000000e+00> : vector<8x256xf32>
    %263 = tpu.matmul %260, %262, %cst_115 {dimension_numbers = #tpu.dot_dimension_numbers<[1], [0], [0], [1], [0, 0, 1, 1], [], []>} : vector<8x128xbf16>, vector<128x256xbf16>, vector<8x256xf32> -> vector<8x256xf32>
    %cst_116 = arith.constant 0.000000e+00 : f32
    %264 = vector.broadcast %cst_116 : f32 to vector<8x256xf32>
    %265 = arith.maximumf %263, %264 : vector<8x256xf32>
    %266 = arith.truncf %265 : vector<8x256xf32> to vector<8x256xbf16>
    %c0_117 = arith.constant 0 : index
    %c0_118 = arith.constant 0 : index
    %c0_119 = arith.constant 0 : index
    %267 = vector.load %arg11[%c0_117, %c0_118, %c0_119] : memref<2x256x128xbf16, #tpu.memory_space<vmem>>, vector<1x256x128xbf16>
    %268 = vector.shape_cast %267 : vector<1x256x128xbf16> to vector<256x128xbf16>
    %cst_120 = arith.constant dense<0.000000e+00> : vector<8x128xf32>
    %269 = tpu.matmul %266, %268, %cst_120 {dimension_numbers = #tpu.dot_dimension_numbers<[1], [0], [0], [1], [0, 0, 1, 1], [], []>} : vector<8x256xbf16>, vector<256x128xbf16>, vector<8x128xf32> -> vector<8x128xf32>
    %270 = arith.addf %269, %259 : vector<8x128xf32>
    %271 = vector.extract_strided_slice %9 {offsets = [4, 0], sizes = [1, 128], strides = [1, 1]} : vector<6x128xf32> to vector<1x128xf32>
    %272 = vector.extract_strided_slice %9 {offsets = [5, 0], sizes = [1, 128], strides = [1, 1]} : vector<6x128xf32> to vector<1x128xf32>
    %cst_121 = arith.constant dense<0.000000e+00> : vector<8xf32>
    %273 = vector.multi_reduction <add>, %270, %cst_121 [1] : vector<8x128xf32> to vector<8xf32>
    %274 = vector.shape_cast %273 : vector<8xf32> to vector<8x1xf32>
    %cst_122 = arith.constant 1.280000e+02 : f32
    %275 = vector.broadcast %cst_122 : f32 to vector<8x1xf32>
    %276 = arith.divf %274, %275 : vector<8x1xf32>
    %277 = vector.broadcast %276 : vector<8x1xf32> to vector<8x128xf32>
    %278 = arith.subf %270, %277 : vector<8x128xf32>
    %279 = arith.mulf %278, %278 : vector<8x128xf32>
    %cst_123 = arith.constant dense<0.000000e+00> : vector<8xf32>
    %280 = vector.multi_reduction <add>, %279, %cst_123 [1] : vector<8x128xf32> to vector<8xf32>
    %281 = vector.shape_cast %280 : vector<8xf32> to vector<8x1xf32>
    %cst_124 = arith.constant 1.280000e+02 : f32
    %282 = vector.broadcast %cst_124 : f32 to vector<8x1xf32>
    %283 = arith.divf %281, %282 : vector<8x1xf32>
    %284 = vector.broadcast %276 : vector<8x1xf32> to vector<8x128xf32>
    %285 = arith.subf %270, %284 : vector<8x128xf32>
    %cst_125 = arith.constant 9.99999974E-6 : f32
    %286 = vector.broadcast %cst_125 : f32 to vector<8x1xf32>
    %287 = arith.addf %283, %286 : vector<8x1xf32>
    %288 = math.rsqrt %287 : vector<8x1xf32>
    %289 = vector.broadcast %288 : vector<8x1xf32> to vector<8x128xf32>
    %290 = arith.mulf %285, %289 : vector<8x128xf32>
    %291 = vector.broadcast %271 : vector<1x128xf32> to vector<8x128xf32>
    %292 = arith.mulf %290, %291 : vector<8x128xf32>
    %293 = vector.broadcast %272 : vector<1x128xf32> to vector<8x128xf32>
    %294 = arith.addf %292, %293 : vector<8x128xf32>
    %c1_126 = arith.constant 1 : index
    %c0_127 = arith.constant 0 : index
    %c0_128 = arith.constant 0 : index
    %295 = vector.load %arg12[%c1_126, %c0_127, %c0_128] : memref<2x6x128xf32, #tpu.memory_space<vmem>>, vector<1x6x128xf32>
    %296 = vector.shape_cast %295 : vector<1x6x128xf32> to vector<6x128xf32>
    %297 = arith.truncf %294 : vector<8x128xf32> to vector<8x128xbf16>
    %c1_129 = arith.constant 1 : index
    %c0_130 = arith.constant 0 : index
    %c0_131 = arith.constant 0 : index
    %298 = vector.load %arg5[%c1_129, %c0_130, %c0_131] : memref<2x128x384xbf16, #tpu.memory_space<vmem>>, vector<1x128x384xbf16>
    %299 = vector.shape_cast %298 : vector<1x128x384xbf16> to vector<128x384xbf16>
    %cst_132 = arith.constant dense<0.000000e+00> : vector<8x384xf32>
    %300 = tpu.matmul %297, %299, %cst_132 {dimension_numbers = #tpu.dot_dimension_numbers<[1], [0], [0], [1], [0, 0, 1, 1], [], []>} : vector<8x128xbf16>, vector<128x384xbf16>, vector<8x384xf32> -> vector<8x384xf32>
    %301 = vector.extract_strided_slice %300 {offsets = [0, 0], sizes = [8, 128], strides = [1, 1]} : vector<8x384xf32> to vector<8x128xf32>
    %302 = arith.truncf %301 : vector<8x128xf32> to vector<8x128xbf16>
    %303 = vector.extract_strided_slice %300 {offsets = [0, 128], sizes = [8, 128], strides = [1, 1]} : vector<8x384xf32> to vector<8x128xf32>
    %304 = arith.truncf %303 : vector<8x128xf32> to vector<8x128xbf16>
    %305 = vector.extract_strided_slice %300 {offsets = [0, 256], sizes = [8, 128], strides = [1, 1]} : vector<8x384xf32> to vector<8x128xf32>
    %306 = arith.truncf %305 : vector<8x128xf32> to vector<8x128xbf16>
    %307 = vector.extract_strided_slice %302 {offsets = [0, 0], sizes = [8, 32], strides = [1, 1]} : vector<8x128xbf16> to vector<8x32xbf16>
    %308 = vector.extract_strided_slice %304 {offsets = [0, 0], sizes = [8, 32], strides = [1, 1]} : vector<8x128xbf16> to vector<8x32xbf16>
    %309 = vector.extract_strided_slice %306 {offsets = [0, 0], sizes = [8, 32], strides = [1, 1]} : vector<8x128xbf16> to vector<8x32xbf16>
    %cst_133 = arith.constant dense<0.000000e+00> : vector<8x8xf32>
    %310 = tpu.matmul %307, %308, %cst_133 {dimension_numbers = #tpu.dot_dimension_numbers<[1], [1], [0], [0], [0, 0, 1, 0], [], []>} : vector<8x32xbf16>, vector<8x32xbf16>, vector<8x8xf32> -> vector<8x8xf32>
    %cst_134 = arith.constant 0.176776692 : f32
    %311 = vector.broadcast %cst_134 : f32 to vector<8x8xf32>
    %312 = arith.mulf %310, %311 : vector<8x8xf32>
    %313 = arith.addf %312, %5 : vector<8x8xf32>
    %cst_135 = arith.constant dense<0xFF800000> : vector<8xf32>
    %314 = vector.multi_reduction <maximumf>, %313, %cst_135 [1] : vector<8x8xf32> to vector<8xf32>
    %315 = vector.shape_cast %314 : vector<8xf32> to vector<8x1xf32>
    %316 = vector.broadcast %315 : vector<8x1xf32> to vector<8x8xf32>
    %317 = arith.subf %313, %316 : vector<8x8xf32>
    %318 = math.exp %317 : vector<8x8xf32>
    %cst_136 = arith.constant dense<0.000000e+00> : vector<8xf32>
    %319 = vector.multi_reduction <add>, %318, %cst_136 [1] : vector<8x8xf32> to vector<8xf32>
    %320 = vector.shape_cast %319 : vector<8xf32> to vector<8x1xf32>
    %321 = vector.broadcast %320 : vector<8x1xf32> to vector<8x8xf32>
    %322 = arith.divf %318, %321 : vector<8x8xf32>
    %c0_137 = arith.constant 0 : index
    %c4 = arith.constant 4 : index
    %c0_138 = arith.constant 0 : index
    %c0_139 = arith.constant 0 : index
    %323 = vector.load %arg14[%c0_137, %c4, %c0_138, %c0_139] : memref<1x8x8x8xf32, #tpu.memory_space<vmem>>, vector<1x1x8x8xf32>
    %324 = vector.shape_cast %323 : vector<1x1x8x8xf32> to vector<8x8xf32>
    %325 = vector.shape_cast %322 : vector<8x8xf32> to vector<1x1x8x8xf32>
    tpu.vector_store %arg14[%c0_137, %c4, %c0_138, %c0_139], %325 {strides = array<i32>} : memref<1x8x8x8xf32, #tpu.memory_space<vmem>>, vector<1x1x8x8xf32>,
    %326 = arith.truncf %322 : vector<8x8xf32> to vector<8x8xbf16>
    %cst_140 = arith.constant dense<0.000000e+00> : vector<8x32xf32>
    %327 = tpu.matmul %326, %309, %cst_140 {dimension_numbers = #tpu.dot_dimension_numbers<[1], [0], [0], [1], [0, 0, 1, 1], [], []>} : vector<8x8xbf16>, vector<8x32xbf16>, vector<8x32xf32> -> vector<8x32xf32>
    %328 = vector.extract_strided_slice %302 {offsets = [0, 32], sizes = [8, 32], strides = [1, 1]} : vector<8x128xbf16> to vector<8x32xbf16>
    %329 = vector.extract_strided_slice %304 {offsets = [0, 32], sizes = [8, 32], strides = [1, 1]} : vector<8x128xbf16> to vector<8x32xbf16>
    %330 = vector.extract_strided_slice %306 {offsets = [0, 32], sizes = [8, 32], strides = [1, 1]} : vector<8x128xbf16> to vector<8x32xbf16>
    %cst_141 = arith.constant dense<0.000000e+00> : vector<8x8xf32>
    %331 = tpu.matmul %328, %329, %cst_141 {dimension_numbers = #tpu.dot_dimension_numbers<[1], [1], [0], [0], [0, 0, 1, 0], [], []>} : vector<8x32xbf16>, vector<8x32xbf16>, vector<8x8xf32> -> vector<8x8xf32>
    %cst_142 = arith.constant 0.176776692 : f32
    %332 = vector.broadcast %cst_142 : f32 to vector<8x8xf32>
    %333 = arith.mulf %331, %332 : vector<8x8xf32>
    %334 = arith.addf %333, %5 : vector<8x8xf32>
    %cst_143 = arith.constant dense<0xFF800000> : vector<8xf32>
    %335 = vector.multi_reduction <maximumf>, %334, %cst_143 [1] : vector<8x8xf32> to vector<8xf32>
    %336 = vector.shape_cast %335 : vector<8xf32> to vector<8x1xf32>
    %337 = vector.broadcast %336 : vector<8x1xf32> to vector<8x8xf32>
    %338 = arith.subf %334, %337 : vector<8x8xf32>
    %339 = math.exp %338 : vector<8x8xf32>
    %cst_144 = arith.constant dense<0.000000e+00> : vector<8xf32>
    %340 = vector.multi_reduction <add>, %339, %cst_144 [1] : vector<8x8xf32> to vector<8xf32>
    %341 = vector.shape_cast %340 : vector<8xf32> to vector<8x1xf32>
    %342 = vector.broadcast %341 : vector<8x1xf32> to vector<8x8xf32>
    %343 = arith.divf %339, %342 : vector<8x8xf32>
    %c0_145 = arith.constant 0 : index
    %c5 = arith.constant 5 : index
    %c0_146 = arith.constant 0 : index
    %c0_147 = arith.constant 0 : index
    %344 = vector.load %arg14[%c0_145, %c5, %c0_146, %c0_147] : memref<1x8x8x8xf32, #tpu.memory_space<vmem>>, vector<1x1x8x8xf32>
    %345 = vector.shape_cast %344 : vector<1x1x8x8xf32> to vector<8x8xf32>
    %346 = vector.shape_cast %343 : vector<8x8xf32> to vector<1x1x8x8xf32>
    tpu.vector_store %arg14[%c0_145, %c5, %c0_146, %c0_147], %346 {strides = array<i32>} : memref<1x8x8x8xf32, #tpu.memory_space<vmem>>, vector<1x1x8x8xf32>,
    %347 = arith.truncf %343 : vector<8x8xf32> to vector<8x8xbf16>
    %cst_148 = arith.constant dense<0.000000e+00> : vector<8x32xf32>
    %348 = tpu.matmul %347, %330, %cst_148 {dimension_numbers = #tpu.dot_dimension_numbers<[1], [0], [0], [1], [0, 0, 1, 1], [], []>} : vector<8x8xbf16>, vector<8x32xbf16>, vector<8x32xf32> -> vector<8x32xf32>
    %349 = vector.extract_strided_slice %302 {offsets = [0, 64], sizes = [8, 32], strides = [1, 1]} : vector<8x128xbf16> to vector<8x32xbf16>
    %350 = vector.extract_strided_slice %304 {offsets = [0, 64], sizes = [8, 32], strides = [1, 1]} : vector<8x128xbf16> to vector<8x32xbf16>
    %351 = vector.extract_strided_slice %306 {offsets = [0, 64], sizes = [8, 32], strides = [1, 1]} : vector<8x128xbf16> to vector<8x32xbf16>
    %cst_149 = arith.constant dense<0.000000e+00> : vector<8x8xf32>
    %352 = tpu.matmul %349, %350, %cst_149 {dimension_numbers = #tpu.dot_dimension_numbers<[1], [1], [0], [0], [0, 0, 1, 0], [], []>} : vector<8x32xbf16>, vector<8x32xbf16>, vector<8x8xf32> -> vector<8x8xf32>
    %cst_150 = arith.constant 0.176776692 : f32
    %353 = vector.broadcast %cst_150 : f32 to vector<8x8xf32>
    %354 = arith.mulf %352, %353 : vector<8x8xf32>
    %355 = arith.addf %354, %5 : vector<8x8xf32>
    %cst_151 = arith.constant dense<0xFF800000> : vector<8xf32>
    %356 = vector.multi_reduction <maximumf>, %355, %cst_151 [1] : vector<8x8xf32> to vector<8xf32>
    %357 = vector.shape_cast %356 : vector<8xf32> to vector<8x1xf32>
    %358 = vector.broadcast %357 : vector<8x1xf32> to vector<8x8xf32>
    %359 = arith.subf %355, %358 : vector<8x8xf32>
    %360 = math.exp %359 : vector<8x8xf32>
    %cst_152 = arith.constant dense<0.000000e+00> : vector<8xf32>
    %361 = vector.multi_reduction <add>, %360, %cst_152 [1] : vector<8x8xf32> to vector<8xf32>
    %362 = vector.shape_cast %361 : vector<8xf32> to vector<8x1xf32>
    %363 = vector.broadcast %362 : vector<8x1xf32> to vector<8x8xf32>
    %364 = arith.divf %360, %363 : vector<8x8xf32>
    %c0_153 = arith.constant 0 : index
    %c6 = arith.constant 6 : index
    %c0_154 = arith.constant 0 : index
    %c0_155 = arith.constant 0 : index
    %365 = vector.load %arg14[%c0_153, %c6, %c0_154, %c0_155] : memref<1x8x8x8xf32, #tpu.memory_space<vmem>>, vector<1x1x8x8xf32>
    %366 = vector.shape_cast %365 : vector<1x1x8x8xf32> to vector<8x8xf32>
    %367 = vector.shape_cast %364 : vector<8x8xf32> to vector<1x1x8x8xf32>
    tpu.vector_store %arg14[%c0_153, %c6, %c0_154, %c0_155], %367 {strides = array<i32>} : memref<1x8x8x8xf32, #tpu.memory_space<vmem>>, vector<1x1x8x8xf32>,
    %368 = arith.truncf %364 : vector<8x8xf32> to vector<8x8xbf16>
    %cst_156 = arith.constant dense<0.000000e+00> : vector<8x32xf32>
    %369 = tpu.matmul %368, %351, %cst_156 {dimension_numbers = #tpu.dot_dimension_numbers<[1], [0], [0], [1], [0, 0, 1, 1], [], []>} : vector<8x8xbf16>, vector<8x32xbf16>, vector<8x32xf32> -> vector<8x32xf32>
    %370 = vector.extract_strided_slice %302 {offsets = [0, 96], sizes = [8, 32], strides = [1, 1]} : vector<8x128xbf16> to vector<8x32xbf16>
    %371 = vector.extract_strided_slice %304 {offsets = [0, 96], sizes = [8, 32], strides = [1, 1]} : vector<8x128xbf16> to vector<8x32xbf16>
    %372 = vector.extract_strided_slice %306 {offsets = [0, 96], sizes = [8, 32], strides = [1, 1]} : vector<8x128xbf16> to vector<8x32xbf16>
    %cst_157 = arith.constant dense<0.000000e+00> : vector<8x8xf32>
    %373 = tpu.matmul %370, %371, %cst_157 {dimension_numbers = #tpu.dot_dimension_numbers<[1], [1], [0], [0], [0, 0, 1, 0], [], []>} : vector<8x32xbf16>, vector<8x32xbf16>, vector<8x8xf32> -> vector<8x8xf32>
    %cst_158 = arith.constant 0.176776692 : f32
    %374 = vector.broadcast %cst_158 : f32 to vector<8x8xf32>
    %375 = arith.mulf %373, %374 : vector<8x8xf32>
    %376 = arith.addf %375, %5 : vector<8x8xf32>
    %cst_159 = arith.constant dense<0xFF800000> : vector<8xf32>
    %377 = vector.multi_reduction <maximumf>, %376, %cst_159 [1] : vector<8x8xf32> to vector<8xf32>
    %378 = vector.shape_cast %377 : vector<8xf32> to vector<8x1xf32>
    %379 = vector.broadcast %378 : vector<8x1xf32> to vector<8x8xf32>
    %380 = arith.subf %376, %379 : vector<8x8xf32>
    %381 = math.exp %380 : vector<8x8xf32>
    %cst_160 = arith.constant dense<0.000000e+00> : vector<8xf32>
    %382 = vector.multi_reduction <add>, %381, %cst_160 [1] : vector<8x8xf32> to vector<8xf32>
    %383 = vector.shape_cast %382 : vector<8xf32> to vector<8x1xf32>
    %384 = vector.broadcast %383 : vector<8x1xf32> to vector<8x8xf32>
    %385 = arith.divf %381, %384 : vector<8x8xf32>
    %c0_161 = arith.constant 0 : index
    %c7 = arith.constant 7 : index
    %c0_162 = arith.constant 0 : index
    %c0_163 = arith.constant 0 : index
    %386 = vector.load %arg14[%c0_161, %c7, %c0_162, %c0_163] : memref<1x8x8x8xf32, #tpu.memory_space<vmem>>, vector<1x1x8x8xf32>
    %387 = vector.shape_cast %386 : vector<1x1x8x8xf32> to vector<8x8xf32>
    %388 = vector.shape_cast %385 : vector<8x8xf32> to vector<1x1x8x8xf32>
    tpu.vector_store %arg14[%c0_161, %c7, %c0_162, %c0_163], %388 {strides = array<i32>} : memref<1x8x8x8xf32, #tpu.memory_space<vmem>>, vector<1x1x8x8xf32>,
    %389 = arith.truncf %385 : vector<8x8xf32> to vector<8x8xbf16>
    %cst_164 = arith.constant dense<0.000000e+00> : vector<8x32xf32>
    %390 = tpu.matmul %389, %372, %cst_164 {dimension_numbers = #tpu.dot_dimension_numbers<[1], [0], [0], [1], [0, 0, 1, 1], [], []>} : vector<8x8xbf16>, vector<8x32xbf16>, vector<8x32xf32> -> vector<8x32xf32>
    %391 = tpu.concatenate %327, %348, %369, %390 in 1 : vector<8x32xf32>, vector<8x32xf32>, vector<8x32xf32>, vector<8x32xf32> -> vector<8x128xf32>
    %392 = arith.truncf %391 : vector<8x128xf32> to vector<8x128xbf16>
    %c1_165 = arith.constant 1 : index
    %c0_166 = arith.constant 0 : index
    %c0_167 = arith.constant 0 : index
    %393 = vector.load %arg6[%c1_165, %c0_166, %c0_167] : memref<2x128x128xbf16, #tpu.memory_space<vmem>>, vector<1x128x128xbf16>
    %394 = vector.shape_cast %393 : vector<1x128x128xbf16> to vector<128x128xbf16>
    %cst_168 = arith.constant dense<0.000000e+00> : vector<8x128xf32>
    %395 = tpu.matmul %392, %394, %cst_168 {dimension_numbers = #tpu.dot_dimension_numbers<[1], [0], [0], [1], [0, 0, 1, 1], [], []>} : vector<8x128xbf16>, vector<128x128xbf16>, vector<8x128xf32> -> vector<8x128xf32>
    %396 = arith.addf %395, %294 : vector<8x128xf32>
    %397 = vector.extract_strided_slice %296 {offsets = [0, 0], sizes = [1, 128], strides = [1, 1]} : vector<6x128xf32> to vector<1x128xf32>
    %398 = vector.extract_strided_slice %296 {offsets = [1, 0], sizes = [1, 128], strides = [1, 1]} : vector<6x128xf32> to vector<1x128xf32>
    %cst_169 = arith.constant dense<0.000000e+00> : vector<8xf32>
    %399 = vector.multi_reduction <add>, %396, %cst_169 [1] : vector<8x128xf32> to vector<8xf32>
    %400 = vector.shape_cast %399 : vector<8xf32> to vector<8x1xf32>
    %cst_170 = arith.constant 1.280000e+02 : f32
    %401 = vector.broadcast %cst_170 : f32 to vector<8x1xf32>
    %402 = arith.divf %400, %401 : vector<8x1xf32>
    %403 = vector.broadcast %402 : vector<8x1xf32> to vector<8x128xf32>
    %404 = arith.subf %396, %403 : vector<8x128xf32>
    %405 = arith.mulf %404, %404 : vector<8x128xf32>
    %cst_171 = arith.constant dense<0.000000e+00> : vector<8xf32>
    %406 = vector.multi_reduction <add>, %405, %cst_171 [1] : vector<8x128xf32> to vector<8xf32>
    %407 = vector.shape_cast %406 : vector<8xf32> to vector<8x1xf32>
    %cst_172 = arith.constant 1.280000e+02 : f32
    %408 = vector.broadcast %cst_172 : f32 to vector<8x1xf32>
    %409 = arith.divf %407, %408 : vector<8x1xf32>
    %410 = vector.broadcast %402 : vector<8x1xf32> to vector<8x128xf32>
    %411 = arith.subf %396, %410 : vector<8x128xf32>
    %cst_173 = arith.constant 9.99999974E-6 : f32
    %412 = vector.broadcast %cst_173 : f32 to vector<8x1xf32>
    %413 = arith.addf %409, %412 : vector<8x1xf32>
    %414 = math.rsqrt %413 : vector<8x1xf32>
    %415 = vector.broadcast %414 : vector<8x1xf32> to vector<8x128xf32>
    %416 = arith.mulf %411, %415 : vector<8x128xf32>
    %417 = vector.broadcast %397 : vector<1x128xf32> to vector<8x128xf32>
    %418 = arith.mulf %416, %417 : vector<8x128xf32>
    %419 = vector.broadcast %398 : vector<1x128xf32> to vector<8x128xf32>
    %420 = arith.addf %418, %419 : vector<8x128xf32>
    %421 = arith.truncf %420 : vector<8x128xf32> to vector<8x128xbf16>
    %c1_174 = arith.constant 1 : index
    %c0_175 = arith.constant 0 : index
    %c0_176 = arith.constant 0 : index
    %422 = vector.load %arg7[%c1_174, %c0_175, %c0_176] : memref<2x128x128xbf16, #tpu.memory_space<vmem>>, vector<1x128x128xbf16>
    %423 = vector.shape_cast %422 : vector<1x128x128xbf16> to vector<128x128xbf16>
    %cst_177 = arith.constant dense<0.000000e+00> : vector<8x128xf32>
    %424 = tpu.matmul %421, %423, %cst_177 {dimension_numbers = #tpu.dot_dimension_numbers<[1], [0], [0], [1], [0, 0, 1, 1], [], []>} : vector<8x128xbf16>, vector<128x128xbf16>, vector<8x128xf32> -> vector<8x128xf32>
    %425 = arith.truncf %424 : vector<8x128xf32> to vector<8x128xbf16>
    %c1_178 = arith.constant 1 : index
    %c0_179 = arith.constant 0 : index
    %c0_180 = arith.constant 0 : index
    %426 = vector.load %arg8[%c1_178, %c0_179, %c0_180] : memref<2x128x256xbf16, #tpu.memory_space<vmem>>, vector<1x128x256xbf16>
    %427 = vector.shape_cast %426 : vector<1x128x256xbf16> to vector<128x256xbf16>
    %cst_181 = arith.constant dense<0.000000e+00> : vector<128x256xf32>
    %428 = tpu.matmul %3, %427, %cst_181 {dimension_numbers = #tpu.dot_dimension_numbers<[1], [0], [0], [1], [0, 0, 1, 1], [], []>} : vector<128x128xbf16>, vector<128x256xbf16>, vector<128x256xf32> -> vector<128x256xf32>
    %429 = vector.extract_strided_slice %428 {offsets = [0, 0], sizes = [128, 128], strides = [1, 1]} : vector<128x256xf32> to vector<128x128xf32>
    %430 = arith.truncf %429 : vector<128x128xf32> to vector<128x128xbf16>
    %431 = vector.extract_strided_slice %428 {offsets = [0, 128], sizes = [128, 128], strides = [1, 1]} : vector<128x256xf32> to vector<128x128xf32>
    %432 = arith.truncf %431 : vector<128x128xf32> to vector<128x128xbf16>
    %433 = vector.extract_strided_slice %425 {offsets = [0, 0], sizes = [8, 32], strides = [1, 1]} : vector<8x128xbf16> to vector<8x32xbf16>
    %434 = vector.extract_strided_slice %430 {offsets = [0, 0], sizes = [128, 32], strides = [1, 1]} : vector<128x128xbf16> to vector<128x32xbf16>
    %435 = vector.extract_strided_slice %432 {offsets = [0, 0], sizes = [128, 32], strides = [1, 1]} : vector<128x128xbf16> to vector<128x32xbf16>
    %cst_182 = arith.constant dense<0.000000e+00> : vector<8x128xf32>
    %436 = tpu.matmul %433, %434, %cst_182 {dimension_numbers = #tpu.dot_dimension_numbers<[1], [1], [0], [0], [0, 0, 1, 0], [], []>} : vector<8x32xbf16>, vector<128x32xbf16>, vector<8x128xf32> -> vector<8x128xf32>
    %cst_183 = arith.constant 0.176776692 : f32
    %437 = vector.broadcast %cst_183 : f32 to vector<8x128xf32>
    %438 = arith.mulf %436, %437 : vector<8x128xf32>
    %439 = arith.addf %438, %7 : vector<8x128xf32>
    %cst_184 = arith.constant dense<0xFF800000> : vector<8xf32>
    %440 = vector.multi_reduction <maximumf>, %439, %cst_184 [1] : vector<8x128xf32> to vector<8xf32>
    %441 = vector.shape_cast %440 : vector<8xf32> to vector<8x1xf32>
    %442 = vector.broadcast %441 : vector<8x1xf32> to vector<8x128xf32>
    %443 = arith.subf %439, %442 : vector<8x128xf32>
    %444 = math.exp %443 : vector<8x128xf32>
    %cst_185 = arith.constant dense<0.000000e+00> : vector<8xf32>
    %445 = vector.multi_reduction <add>, %444, %cst_185 [1] : vector<8x128xf32> to vector<8xf32>
    %446 = vector.shape_cast %445 : vector<8xf32> to vector<8x1xf32>
    %447 = vector.broadcast %446 : vector<8x1xf32> to vector<8x128xf32>
    %448 = arith.divf %444, %447 : vector<8x128xf32>
    %c0_186 = arith.constant 0 : index
    %c4_187 = arith.constant 4 : index
    %c0_188 = arith.constant 0 : index
    %c0_189 = arith.constant 0 : index
    %449 = vector.load %arg15[%c0_186, %c4_187, %c0_188, %c0_189] : memref<1x8x8x128xf32, #tpu.memory_space<vmem>>, vector<1x1x8x128xf32>
    %450 = vector.shape_cast %449 : vector<1x1x8x128xf32> to vector<8x128xf32>
    %451 = vector.shape_cast %448 : vector<8x128xf32> to vector<1x1x8x128xf32>
    tpu.vector_store %arg15[%c0_186, %c4_187, %c0_188, %c0_189], %451 {strides = array<i32>} : memref<1x8x8x128xf32, #tpu.memory_space<vmem>>, vector<1x1x8x128xf32>,
    %452 = arith.truncf %448 : vector<8x128xf32> to vector<8x128xbf16>
    %cst_190 = arith.constant dense<0.000000e+00> : vector<8x32xf32>
    %453 = tpu.matmul %452, %435, %cst_190 {dimension_numbers = #tpu.dot_dimension_numbers<[1], [0], [0], [1], [0, 0, 1, 1], [], []>} : vector<8x128xbf16>, vector<128x32xbf16>, vector<8x32xf32> -> vector<8x32xf32>
    %454 = vector.extract_strided_slice %425 {offsets = [0, 32], sizes = [8, 32], strides = [1, 1]} : vector<8x128xbf16> to vector<8x32xbf16>
    %455 = vector.extract_strided_slice %430 {offsets = [0, 32], sizes = [128, 32], strides = [1, 1]} : vector<128x128xbf16> to vector<128x32xbf16>
    %456 = vector.extract_strided_slice %432 {offsets = [0, 32], sizes = [128, 32], strides = [1, 1]} : vector<128x128xbf16> to vector<128x32xbf16>
    %cst_191 = arith.constant dense<0.000000e+00> : vector<8x128xf32>
    %457 = tpu.matmul %454, %455, %cst_191 {dimension_numbers = #tpu.dot_dimension_numbers<[1], [1], [0], [0], [0, 0, 1, 0], [], []>} : vector<8x32xbf16>, vector<128x32xbf16>, vector<8x128xf32> -> vector<8x128xf32>
    %cst_192 = arith.constant 0.176776692 : f32
    %458 = vector.broadcast %cst_192 : f32 to vector<8x128xf32>
    %459 = arith.mulf %457, %458 : vector<8x128xf32>
    %460 = arith.addf %459, %7 : vector<8x128xf32>
    %cst_193 = arith.constant dense<0xFF800000> : vector<8xf32>
    %461 = vector.multi_reduction <maximumf>, %460, %cst_193 [1] : vector<8x128xf32> to vector<8xf32>
    %462 = vector.shape_cast %461 : vector<8xf32> to vector<8x1xf32>
    %463 = vector.broadcast %462 : vector<8x1xf32> to vector<8x128xf32>
    %464 = arith.subf %460, %463 : vector<8x128xf32>
    %465 = math.exp %464 : vector<8x128xf32>
    %cst_194 = arith.constant dense<0.000000e+00> : vector<8xf32>
    %466 = vector.multi_reduction <add>, %465, %cst_194 [1] : vector<8x128xf32> to vector<8xf32>
    %467 = vector.shape_cast %466 : vector<8xf32> to vector<8x1xf32>
    %468 = vector.broadcast %467 : vector<8x1xf32> to vector<8x128xf32>
    %469 = arith.divf %465, %468 : vector<8x128xf32>
    %c0_195 = arith.constant 0 : index
    %c5_196 = arith.constant 5 : index
    %c0_197 = arith.constant 0 : index
    %c0_198 = arith.constant 0 : index
    %470 = vector.load %arg15[%c0_195, %c5_196, %c0_197, %c0_198] : memref<1x8x8x128xf32, #tpu.memory_space<vmem>>, vector<1x1x8x128xf32>
    %471 = vector.shape_cast %470 : vector<1x1x8x128xf32> to vector<8x128xf32>
    %472 = vector.shape_cast %469 : vector<8x128xf32> to vector<1x1x8x128xf32>
    tpu.vector_store %arg15[%c0_195, %c5_196, %c0_197, %c0_198], %472 {strides = array<i32>} : memref<1x8x8x128xf32, #tpu.memory_space<vmem>>, vector<1x1x8x128xf32>,
    %473 = arith.truncf %469 : vector<8x128xf32> to vector<8x128xbf16>
    %cst_199 = arith.constant dense<0.000000e+00> : vector<8x32xf32>
    %474 = tpu.matmul %473, %456, %cst_199 {dimension_numbers = #tpu.dot_dimension_numbers<[1], [0], [0], [1], [0, 0, 1, 1], [], []>} : vector<8x128xbf16>, vector<128x32xbf16>, vector<8x32xf32> -> vector<8x32xf32>
    %475 = vector.extract_strided_slice %425 {offsets = [0, 64], sizes = [8, 32], strides = [1, 1]} : vector<8x128xbf16> to vector<8x32xbf16>
    %476 = vector.extract_strided_slice %430 {offsets = [0, 64], sizes = [128, 32], strides = [1, 1]} : vector<128x128xbf16> to vector<128x32xbf16>
    %477 = vector.extract_strided_slice %432 {offsets = [0, 64], sizes = [128, 32], strides = [1, 1]} : vector<128x128xbf16> to vector<128x32xbf16>
    %cst_200 = arith.constant dense<0.000000e+00> : vector<8x128xf32>
    %478 = tpu.matmul %475, %476, %cst_200 {dimension_numbers = #tpu.dot_dimension_numbers<[1], [1], [0], [0], [0, 0, 1, 0], [], []>} : vector<8x32xbf16>, vector<128x32xbf16>, vector<8x128xf32> -> vector<8x128xf32>
    %cst_201 = arith.constant 0.176776692 : f32
    %479 = vector.broadcast %cst_201 : f32 to vector<8x128xf32>
    %480 = arith.mulf %478, %479 : vector<8x128xf32>
    %481 = arith.addf %480, %7 : vector<8x128xf32>
    %cst_202 = arith.constant dense<0xFF800000> : vector<8xf32>
    %482 = vector.multi_reduction <maximumf>, %481, %cst_202 [1] : vector<8x128xf32> to vector<8xf32>
    %483 = vector.shape_cast %482 : vector<8xf32> to vector<8x1xf32>
    %484 = vector.broadcast %483 : vector<8x1xf32> to vector<8x128xf32>
    %485 = arith.subf %481, %484 : vector<8x128xf32>
    %486 = math.exp %485 : vector<8x128xf32>
    %cst_203 = arith.constant dense<0.000000e+00> : vector<8xf32>
    %487 = vector.multi_reduction <add>, %486, %cst_203 [1] : vector<8x128xf32> to vector<8xf32>
    %488 = vector.shape_cast %487 : vector<8xf32> to vector<8x1xf32>
    %489 = vector.broadcast %488 : vector<8x1xf32> to vector<8x128xf32>
    %490 = arith.divf %486, %489 : vector<8x128xf32>
    %c0_204 = arith.constant 0 : index
    %c6_205 = arith.constant 6 : index
    %c0_206 = arith.constant 0 : index
    %c0_207 = arith.constant 0 : index
    %491 = vector.load %arg15[%c0_204, %c6_205, %c0_206, %c0_207] : memref<1x8x8x128xf32, #tpu.memory_space<vmem>>, vector<1x1x8x128xf32>
    %492 = vector.shape_cast %491 : vector<1x1x8x128xf32> to vector<8x128xf32>
    %493 = vector.shape_cast %490 : vector<8x128xf32> to vector<1x1x8x128xf32>
    tpu.vector_store %arg15[%c0_204, %c6_205, %c0_206, %c0_207], %493 {strides = array<i32>} : memref<1x8x8x128xf32, #tpu.memory_space<vmem>>, vector<1x1x8x128xf32>,
    %494 = arith.truncf %490 : vector<8x128xf32> to vector<8x128xbf16>
    %cst_208 = arith.constant dense<0.000000e+00> : vector<8x32xf32>
    %495 = tpu.matmul %494, %477, %cst_208 {dimension_numbers = #tpu.dot_dimension_numbers<[1], [0], [0], [1], [0, 0, 1, 1], [], []>} : vector<8x128xbf16>, vector<128x32xbf16>, vector<8x32xf32> -> vector<8x32xf32>
    %496 = vector.extract_strided_slice %425 {offsets = [0, 96], sizes = [8, 32], strides = [1, 1]} : vector<8x128xbf16> to vector<8x32xbf16>
    %497 = vector.extract_strided_slice %430 {offsets = [0, 96], sizes = [128, 32], strides = [1, 1]} : vector<128x128xbf16> to vector<128x32xbf16>
    %498 = vector.extract_strided_slice %432 {offsets = [0, 96], sizes = [128, 32], strides = [1, 1]} : vector<128x128xbf16> to vector<128x32xbf16>
    %cst_209 = arith.constant dense<0.000000e+00> : vector<8x128xf32>
    %499 = tpu.matmul %496, %497, %cst_209 {dimension_numbers = #tpu.dot_dimension_numbers<[1], [1], [0], [0], [0, 0, 1, 0], [], []>} : vector<8x32xbf16>, vector<128x32xbf16>, vector<8x128xf32> -> vector<8x128xf32>
    %cst_210 = arith.constant 0.176776692 : f32
    %500 = vector.broadcast %cst_210 : f32 to vector<8x128xf32>
    %501 = arith.mulf %499, %500 : vector<8x128xf32>
    %502 = arith.addf %501, %7 : vector<8x128xf32>
    %cst_211 = arith.constant dense<0xFF800000> : vector<8xf32>
    %503 = vector.multi_reduction <maximumf>, %502, %cst_211 [1] : vector<8x128xf32> to vector<8xf32>
    %504 = vector.shape_cast %503 : vector<8xf32> to vector<8x1xf32>
    %505 = vector.broadcast %504 : vector<8x1xf32> to vector<8x128xf32>
    %506 = arith.subf %502, %505 : vector<8x128xf32>
    %507 = math.exp %506 : vector<8x128xf32>
    %cst_212 = arith.constant dense<0.000000e+00> : vector<8xf32>
    %508 = vector.multi_reduction <add>, %507, %cst_212 [1] : vector<8x128xf32> to vector<8xf32>
    %509 = vector.shape_cast %508 : vector<8xf32> to vector<8x1xf32>
    %510 = vector.broadcast %509 : vector<8x1xf32> to vector<8x128xf32>
    %511 = arith.divf %507, %510 : vector<8x128xf32>
    %c0_213 = arith.constant 0 : index
    %c7_214 = arith.constant 7 : index
    %c0_215 = arith.constant 0 : index
    %c0_216 = arith.constant 0 : index
    %512 = vector.load %arg15[%c0_213, %c7_214, %c0_215, %c0_216] : memref<1x8x8x128xf32, #tpu.memory_space<vmem>>, vector<1x1x8x128xf32>
    %513 = vector.shape_cast %512 : vector<1x1x8x128xf32> to vector<8x128xf32>
    %514 = vector.shape_cast %511 : vector<8x128xf32> to vector<1x1x8x128xf32>
    tpu.vector_store %arg15[%c0_213, %c7_214, %c0_215, %c0_216], %514 {strides = array<i32>} : memref<1x8x8x128xf32, #tpu.memory_space<vmem>>, vector<1x1x8x128xf32>,
    %515 = arith.truncf %511 : vector<8x128xf32> to vector<8x128xbf16>
    %cst_217 = arith.constant dense<0.000000e+00> : vector<8x32xf32>
    %516 = tpu.matmul %515, %498, %cst_217 {dimension_numbers = #tpu.dot_dimension_numbers<[1], [0], [0], [1], [0, 0, 1, 1], [], []>} : vector<8x128xbf16>, vector<128x32xbf16>, vector<8x32xf32> -> vector<8x32xf32>
    %517 = tpu.concatenate %453, %474, %495, %516 in 1 : vector<8x32xf32>, vector<8x32xf32>, vector<8x32xf32>, vector<8x32xf32> -> vector<8x128xf32>
    %518 = arith.truncf %517 : vector<8x128xf32> to vector<8x128xbf16>
    %c1_218 = arith.constant 1 : index
    %c0_219 = arith.constant 0 : index
    %c0_220 = arith.constant 0 : index
    %519 = vector.load %arg9[%c1_218, %c0_219, %c0_220] : memref<2x128x128xbf16, #tpu.memory_space<vmem>>, vector<1x128x128xbf16>
    %520 = vector.shape_cast %519 : vector<1x128x128xbf16> to vector<128x128xbf16>
    %cst_221 = arith.constant dense<0.000000e+00> : vector<8x128xf32>
    %521 = tpu.matmul %518, %520, %cst_221 {dimension_numbers = #tpu.dot_dimension_numbers<[1], [0], [0], [1], [0, 0, 1, 1], [], []>} : vector<8x128xbf16>, vector<128x128xbf16>, vector<8x128xf32> -> vector<8x128xf32>
    %522 = arith.addf %521, %420 : vector<8x128xf32>
    %523 = vector.extract_strided_slice %296 {offsets = [2, 0], sizes = [1, 128], strides = [1, 1]} : vector<6x128xf32> to vector<1x128xf32>
    %524 = vector.extract_strided_slice %296 {offsets = [3, 0], sizes = [1, 128], strides = [1, 1]} : vector<6x128xf32> to vector<1x128xf32>
    %cst_222 = arith.constant dense<0.000000e+00> : vector<8xf32>
    %525 = vector.multi_reduction <add>, %522, %cst_222 [1] : vector<8x128xf32> to vector<8xf32>
    %526 = vector.shape_cast %525 : vector<8xf32> to vector<8x1xf32>
    %cst_223 = arith.constant 1.280000e+02 : f32
    %527 = vector.broadcast %cst_223 : f32 to vector<8x1xf32>
    %528 = arith.divf %526, %527 : vector<8x1xf32>
    %529 = vector.broadcast %528 : vector<8x1xf32> to vector<8x128xf32>
    %530 = arith.subf %522, %529 : vector<8x128xf32>
    %531 = arith.mulf %530, %530 : vector<8x128xf32>
    %cst_224 = arith.constant dense<0.000000e+00> : vector<8xf32>
    %532 = vector.multi_reduction <add>, %531, %cst_224 [1] : vector<8x128xf32> to vector<8xf32>
    %533 = vector.shape_cast %532 : vector<8xf32> to vector<8x1xf32>
    %cst_225 = arith.constant 1.280000e+02 : f32
    %534 = vector.broadcast %cst_225 : f32 to vector<8x1xf32>
    %535 = arith.divf %533, %534 : vector<8x1xf32>
    %536 = vector.broadcast %528 : vector<8x1xf32> to vector<8x128xf32>
    %537 = arith.subf %522, %536 : vector<8x128xf32>
    %cst_226 = arith.constant 9.99999974E-6 : f32
    %538 = vector.broadcast %cst_226 : f32 to vector<8x1xf32>
    %539 = arith.addf %535, %538 : vector<8x1xf32>
    %540 = math.rsqrt %539 : vector<8x1xf32>
    %541 = vector.broadcast %540 : vector<8x1xf32> to vector<8x128xf32>
    %542 = arith.mulf %537, %541 : vector<8x128xf32>
    %543 = vector.broadcast %523 : vector<1x128xf32> to vector<8x128xf32>
    %544 = arith.mulf %542, %543 : vector<8x128xf32>
    %545 = vector.broadcast %524 : vector<1x128xf32> to vector<8x128xf32>
    %546 = arith.addf %544, %545 : vector<8x128xf32>
    %547 = arith.truncf %546 : vector<8x128xf32> to vector<8x128xbf16>
    %c1_227 = arith.constant 1 : index
    %c0_228 = arith.constant 0 : index
    %c0_229 = arith.constant 0 : index
    %548 = vector.load %arg10[%c1_227, %c0_228, %c0_229] : memref<2x128x256xbf16, #tpu.memory_space<vmem>>, vector<1x128x256xbf16>
    %549 = vector.shape_cast %548 : vector<1x128x256xbf16> to vector<128x256xbf16>
    %cst_230 = arith.constant dense<0.000000e+00> : vector<8x256xf32>
    %550 = tpu.matmul %547, %549, %cst_230 {dimension_numbers = #tpu.dot_dimension_numbers<[1], [0], [0], [1], [0, 0, 1, 1], [], []>} : vector<8x128xbf16>, vector<128x256xbf16>, vector<8x256xf32> -> vector<8x256xf32>
    %cst_231 = arith.constant 0.000000e+00 : f32
    %551 = vector.broadcast %cst_231 : f32 to vector<8x256xf32>
    %552 = arith.maximumf %550, %551 : vector<8x256xf32>
    %553 = arith.truncf %552 : vector<8x256xf32> to vector<8x256xbf16>
    %c1_232 = arith.constant 1 : index
    %c0_233 = arith.constant 0 : index
    %c0_234 = arith.constant 0 : index
    %554 = vector.load %arg11[%c1_232, %c0_233, %c0_234] : memref<2x256x128xbf16, #tpu.memory_space<vmem>>, vector<1x256x128xbf16>
    %555 = vector.shape_cast %554 : vector<1x256x128xbf16> to vector<256x128xbf16>
    %cst_235 = arith.constant dense<0.000000e+00> : vector<8x128xf32>
    %556 = tpu.matmul %553, %555, %cst_235 {dimension_numbers = #tpu.dot_dimension_numbers<[1], [0], [0], [1], [0, 0, 1, 1], [], []>} : vector<8x256xbf16>, vector<256x128xbf16>, vector<8x128xf32> -> vector<8x128xf32>
    %557 = arith.addf %556, %546 : vector<8x128xf32>
    %558 = vector.extract_strided_slice %296 {offsets = [4, 0], sizes = [1, 128], strides = [1, 1]} : vector<6x128xf32> to vector<1x128xf32>
    %559 = vector.extract_strided_slice %296 {offsets = [5, 0], sizes = [1, 128], strides = [1, 1]} : vector<6x128xf32> to vector<1x128xf32>
    %cst_236 = arith.constant dense<0.000000e+00> : vector<8xf32>
    %560 = vector.multi_reduction <add>, %557, %cst_236 [1] : vector<8x128xf32> to vector<8xf32>
    %561 = vector.shape_cast %560 : vector<8xf32> to vector<8x1xf32>
    %cst_237 = arith.constant 1.280000e+02 : f32
    %562 = vector.broadcast %cst_237 : f32 to vector<8x1xf32>
    %563 = arith.divf %561, %562 : vector<8x1xf32>
    %564 = vector.broadcast %563 : vector<8x1xf32> to vector<8x128xf32>
    %565 = arith.subf %557, %564 : vector<8x128xf32>
    %566 = arith.mulf %565, %565 : vector<8x128xf32>
    %cst_238 = arith.constant dense<0.000000e+00> : vector<8xf32>
    %567 = vector.multi_reduction <add>, %566, %cst_238 [1] : vector<8x128xf32> to vector<8xf32>
    %568 = vector.shape_cast %567 : vector<8xf32> to vector<8x1xf32>
    %cst_239 = arith.constant 1.280000e+02 : f32
    %569 = vector.broadcast %cst_239 : f32 to vector<8x1xf32>
    %570 = arith.divf %568, %569 : vector<8x1xf32>
    %571 = vector.broadcast %563 : vector<8x1xf32> to vector<8x128xf32>
    %572 = arith.subf %557, %571 : vector<8x128xf32>
    %cst_240 = arith.constant 9.99999974E-6 : f32
    %573 = vector.broadcast %cst_240 : f32 to vector<8x1xf32>
    %574 = arith.addf %570, %573 : vector<8x1xf32>
    %575 = math.rsqrt %574 : vector<8x1xf32>
    %576 = vector.broadcast %575 : vector<8x1xf32> to vector<8x128xf32>
    %577 = arith.mulf %572, %576 : vector<8x128xf32>
    %578 = vector.broadcast %558 : vector<1x128xf32> to vector<8x128xf32>
    %579 = arith.mulf %577, %578 : vector<8x128xf32>
    %580 = vector.broadcast %559 : vector<1x128xf32> to vector<8x128xf32>
    %581 = arith.addf %579, %580 : vector<8x128xf32>
    %c0_241 = arith.constant 0 : index
    %c0_242 = arith.constant 0 : index
    %c0_243 = arith.constant 0 : index
    %582 = vector.load %arg13[%c0_241, %c0_242, %c0_243] : memref<1x8x128xf32, #tpu.memory_space<vmem>>, vector<1x8x128xf32>
    %583 = vector.shape_cast %582 : vector<1x8x128xf32> to vector<8x128xf32>
    %584 = vector.shape_cast %581 : vector<8x128xf32> to vector<1x8x128xf32>
    tpu.vector_store %arg13[%c0_241, %c0_242, %c0_243], %584 {strides = array<i32>} : memref<1x8x128xf32, #tpu.memory_space<vmem>>, vector<1x8x128xf32>,
    return
  }
  func.func @transform_0(%arg0: i32) -> (i32, i32, i32) {
    %c0_i32 = arith.constant 0 : i32
    %c0_i32_0 = arith.constant 0 : i32
    %c0_i32_1 = arith.constant 0 : i32
    return %arg0, %c0_i32, %c0_i32_0 : i32, i32, i32
  }
  func.func @transform_1(%arg0: i32) -> (i32, i32, i32) {
    %c0_i32 = arith.constant 0 : i32
    %c0_i32_0 = arith.constant 0 : i32
    %c0_i32_1 = arith.constant 0 : i32
    return %arg0, %c0_i32, %c0_i32_0 : i32, i32, i32
  }
  func.func @transform_2(%arg0: i32) -> (i32, i32, i32) {
    %c0_i32 = arith.constant 0 : i32
    %c0_i32_0 = arith.constant 0 : i32
    %c0_i32_1 = arith.constant 0 : i32
    return %arg0, %c0_i32, %c0_i32_0 : i32, i32, i32
  }
  func.func @transform_3(%arg0: i32) -> (i32, i32, i32) {
    %c0_i32 = arith.constant 0 : i32
    %c0_i32_0 = arith.constant 0 : i32
    %c0_i32_1 = arith.constant 0 : i32
    return %arg0, %c0_i32, %c0_i32_0 : i32, i32, i32
  }
  func.func @transform_4(%arg0: i32) -> (i32, i32, i32) {
    %c0_i32 = arith.constant 0 : i32
    %c0_i32_0 = arith.constant 0 : i32
    %c0_i32_1 = arith.constant 0 : i32
    %c0_i32_2 = arith.constant 0 : i32
    return %c0_i32, %c0_i32_0, %c0_i32_1 : i32, i32, i32
  }
  func.func @transform_5(%arg0: i32) -> (i32, i32, i32) {
    %c0_i32 = arith.constant 0 : i32
    %c0_i32_0 = arith.constant 0 : i32
    %c0_i32_1 = arith.constant 0 : i32
    %c0_i32_2 = arith.constant 0 : i32
    return %c0_i32, %c0_i32_0, %c0_i32_1 : i32, i32, i32
  }
  func.func @transform_6(%arg0: i32) -> (i32, i32, i32) {
    %c0_i32 = arith.constant 0 : i32
    %c0_i32_0 = arith.constant 0 : i32
    %c0_i32_1 = arith.constant 0 : i32
    %c0_i32_2 = arith.constant 0 : i32
    return %c0_i32, %c0_i32_0, %c0_i32_1 : i32, i32, i32
  }
  func.func @transform_7(%arg0: i32) -> (i32, i32, i32) {
    %c0_i32 = arith.constant 0 : i32
    %c0_i32_0 = arith.constant 0 : i32
    %c0_i32_1 = arith.constant 0 : i32
    %c0_i32_2 = arith.constant 0 : i32
    return %c0_i32, %c0_i32_0, %c0_i32_1 : i32, i32, i32
  }
  func.func @transform_8(%arg0: i32) -> (i32, i32, i32) {
    %c0_i32 = arith.constant 0 : i32
    %c0_i32_0 = arith.constant 0 : i32
    %c0_i32_1 = arith.constant 0 : i32
    %c0_i32_2 = arith.constant 0 : i32
    return %c0_i32, %c0_i32_0, %c0_i32_1 : i32, i32, i32
  }
  func.func @transform_9(%arg0: i32) -> (i32, i32, i32) {
    %c0_i32 = arith.constant 0 : i32
    %c0_i32_0 = arith.constant 0 : i32
    %c0_i32_1 = arith.constant 0 : i32
    %c0_i32_2 = arith.constant 0 : i32
    return %c0_i32, %c0_i32_0, %c0_i32_1 : i32, i32, i32
  }
  func.func @transform_10(%arg0: i32) -> (i32, i32, i32) {
    %c0_i32 = arith.constant 0 : i32
    %c0_i32_0 = arith.constant 0 : i32
    %c0_i32_1 = arith.constant 0 : i32
    %c0_i32_2 = arith.constant 0 : i32
    return %c0_i32, %c0_i32_0, %c0_i32_1 : i32, i32, i32
  }
  func.func @transform_11(%arg0: i32) -> (i32, i32, i32) {
    %c0_i32 = arith.constant 0 : i32
    %c0_i32_0 = arith.constant 0 : i32
    %c0_i32_1 = arith.constant 0 : i32
    %c0_i32_2 = arith.constant 0 : i32
    return %c0_i32, %c0_i32_0, %c0_i32_1 : i32, i32, i32
  }
  func.func @transform_12(%arg0: i32) -> (i32, i32, i32) {
    %c0_i32 = arith.constant 0 : i32
    %c0_i32_0 = arith.constant 0 : i32
    %c0_i32_1 = arith.constant 0 : i32
    return %arg0, %c0_i32, %c0_i32_0 : i32, i32, i32
  }
  func.func @transform_13(%arg0: i32) -> (i32, i32, i32, i32) {
    %c0_i32 = arith.constant 0 : i32
    %c0_i32_0 = arith.constant 0 : i32
    %c0_i32_1 = arith.constant 0 : i32
    %c0_i32_2 = arith.constant 0 : i32
    return %arg0, %c0_i32, %c0_i32_0, %c0_i32_1 : i32, i32, i32, i32
  }
  func.func @transform_14(%arg0: i32) -> (i32, i32, i32, i32) {
    %c0_i32 = arith.constant 0 : i32
    %c0_i32_0 = arith.constant 0 : i32
    %c0_i32_1 = arith.constant 0 : i32
    %c0_i32_2 = arith.constant 0 : i32
    return %arg0, %c0_i32, %c0_i32_0, %c0_i32_1 : i32, i32, i32, i32
  }
}

</mosaic_0001>

<bundles_post_ra>
// kernel: _lambda_.1
= control target key start
LH: loop header
LB: loop body
LE: loop exit
PB: predicated region body
PF: predicated region fallthrough
CT: control target
= control target key end

     0   :  { %s7028_s29 = smov 0   ;;  %s8629_s0 = inlined_call_operand.vmem [shape: f32[2,8,128], index: 0, kind: input, shape index: {}]   ;;  %s8630_s1 = inlined_call_operand.vmem [shape: bf16[2,128,128], index: 1, kind: input, shape index: {}]   ;;  %s8631_s2 = inlined_call_operand.vmem [shape: f32[2,8,8], index: 2, kind: input, shape index: {}]   ;;  %s8632_s3 = inlined_call_operand.vmem [shape: f32[2,8,128], index: 3, kind: input, shape index: {}]   ;;  %s8633_s4 = inlined_call_operand.vmem [shape: bf16[2,128,384], index: 4, kind: input, shape index: {}]   ;;  %s8634_s5 = inlined_call_operand.vmem [shape: bf16[2,128,128], index: 5, kind: input, shape index: {}]   ;;  %s8635_s6 = inlined_call_operand.vmem [shape: bf16[2,128,128], index: 6, kind: input, shape index: {}]   ;;  %s8636_s7 = inlined_call_operand.vmem [shape: bf16[2,128,256], index: 7, kind: input, shape index: {}]   ;;  %s8637_s8 = inlined_call_operand.vmem [shape: bf16[2,128,128], index: 8, kind: input, shape index: {}]   ;;  %s8638_s9 = inlined_call_operand.vmem [shape: bf16[2,128,256], index: 9, kind: input, shape index: {}]   ;;  %s8639_s10 = inlined_call_operand.vmem [shape: bf16[2,256,128], index: 10, kind: input, shape index: {}]   ;;  %s8640_s11 = inlined_call_operand.vmem [shape: f32[2,6,128], index: 11, kind: input, shape index: {}]   ;;  %s8641_s12 = inlined_call_operand.vmem [shape: f32[2,8,128], index: 12, kind: output, shape index: {0}]   ;;  %s8642_s13 = inlined_call_operand.vmem [shape: f32[2,8,8,8], index: 13, kind: output, shape index: {1}]   ;;  %s8643_s14 = inlined_call_operand.vmem [shape: f32[2,8,8,128], index: 14, kind: output, shape index: {2}]  }
   0x1   :  { %8650 = sst [smem:[#allocation2_spill]] %s8629_s0 }
   0x2   :  { %8651 = sst [smem:[#allocation3_spill]] %s8630_s1 }
   0x3   :  { %8652 = sst [smem:[#allocation4_spill]] %s8631_s2 }
   0x4   :  { %8653 = sst [smem:[#allocation5_spill]] %s8632_s3 }
   0x5 LB: > { %s5318_s30 = sadd.s32 4294967295, %s6945_s29   ;;  %p5322_p0 = scmp.ge.s32.totalorder %s6945_s29, 1  ;;  %s6945_s29 = sphi %s7028_s29, %s25_s29  }
   0x6   : > { %p444_p1 = scmp.lt.s32.totalorder %s6945_s29, 3 }
   0x8   : > { %p445_p2 = pnand %p5322_p0, %p444_p1 }
   0x9   : > { %v6603_v0 = vld [vmem:[%s8633_s4 + $0x4] ss:$12 sps:$4 sm:$0xff] (!%p445_p2)   ;;  %v6605_v1 = vld [vmem:[%s8633_s4] ss:$12 sps:$4 sm:$0xff] (!%p445_p2)   ;;  %v6947_v2 = vmov (!%p445_p2), 0   ;;  %v6948_v4 = vmov (!%p445_p2), 0.0  }
   0xa   : > { %448 = sbr.rel (%p445_p2) target bundleno = 11689 (0x2da9), region = 68  ;;  %756 = vmatprep.mubr.bf16.mxu0 (!%p445_p2), %v6947_v2  ;;  %724 = vmatprep.subr.bf16.mxu0 (!%p445_p2), %v6603_v0  ;;  %v6606_v3 = vld [vmem:[%s8633_s4 + $0x1c] ss:$12 sps:$4 sm:$0xff] (!%p445_p2)   ;;  %v6608_v5 = vld [vmem:[%s8633_s4 + $0x18] ss:$12 sps:$4 sm:$0xff] (!%p445_p2)   ;;  %p511_p3 = scmp.lt.s32.totalorder (!%p445_p2), %s5318_s30, 1 }
   0xb   : > { %6013 = vmatprep.subr.bf16.mxu1 (!%p445_p2), %v6948_v4  ;;  %725 = vmatpush1.bf16.msra.mxu0 (!%p445_p2), %v6605_v1  ;;  %v6609_v6 = vld [vmem:[%s8633_s4 + $0x34] ss:$12 sps:$4 sm:$0xff] (!%p445_p2)   ;;  %v6611_v7 = vld [vmem:[%s8633_s4 + $0x30] ss:$12 sps:$4 sm:$0xff] (!%p445_p2)   ;;  %v6612_v8 = vld [vmem:[%s8633_s4 + $0x4c] ss:$12 sps:$4 sm:$0xff] (!%p445_p2)  }
   0xc   : > { %726 = vmatprep.subr.bf16.mxu0 (!%p445_p2), %v6606_v3  ;;  %v6614_v9 = vld [vmem:[%s8633_s4 + $0x48] ss:$12 sps:$4 sm:$0xff] (!%p445_p2)   ;;  %v6615_v10 = vld [vmem:[%s8633_s4 + $0x64] ss:$12 sps:$4 sm:$0xff] (!%p445_p2)   ;;  %v6628_v12 = vld [vmem:[%s8633_s4 + $0x20] ss:$12 sps:$4 sm:$0xff] (!%p445_p2)  }
   0xd   : > { %v6627_v11 = vld [vmem:[%s8633_s4 + $0x8] ss:$12 sps:$4 sm:$0xff] (!%p445_p2)   ;;  %v6617_v13 = vld [vmem:[%s8633_s4 + $0x60] ss:$12 sps:$4 sm:$0xff] (!%p445_p2)   ;;  %v6620_v15 = vld [vmem:[%s8633_s4 + $0x78] ss:$12 sps:$4 sm:$0xff] (!%p445_p2)  }
   0xe   : > { %6014 = vmatpush3.bf16.msra.mxu1 (!%p445_p2), %v6627_v11  ;;  %v6618_v14 = vld [vmem:[%s8633_s4 + $0x7c] ss:$12 sps:$4 sm:$0xff] (!%p445_p2)   ;;  %v6629_v16 = vld [vmem:[%s8633_s4 + $0x38] ss:$12 sps:$4 sm:$0xff] (!%p445_p2)   ;;  %v6621_v17 = vld [vmem:[%s8633_s4 + $0x94] ss:$12 sps:$4 sm:$0xff] (!%p445_p2)  }
   0xf   : > { %727 = vmatpush1.bf16.msra.mxu0 (!%p445_p2), %v6608_v5  ;;  %6015 = vmatprep.subr.bf16.mxu1 (!%p445_p2), %v6948_v4  ;;  %v6630_v18 = vld [vmem:[%s8633_s4 + $0x50] ss:$12 sps:$4 sm:$0xff] (!%p445_p2)   ;;  %v6624_v20 = vld [vmem:[%s8633_s4 + $0xac] ss:$12 sps:$4 sm:$0xff] (!%p445_p2)   ;;  %s8654_s0 = sld [smem:[#allocation2_spill]] (!%p445_p2)  ;;  %s8655_s1 = sld [smem:[#allocation3_spill]] (!%p445_p2) }
  0x10   : > { %728 = vmatprep.subr.bf16.mxu0 (!%p445_p2), %v6609_v6  ;;  %v6623_v19 = vld [vmem:[%s8633_s4 + $0x90] ss:$12 sps:$4 sm:$0xff] (!%p445_p2)   ;;  %v6631_v21 = vld [vmem:[%s8633_s4 + $0x68] ss:$12 sps:$4 sm:$0xff] (!%p445_p2)   ;;  %v6632_v24 = vld [vmem:[%s8633_s4 + $0x80] ss:$12 sps:$4 sm:$0xff] (!%p445_p2)  }
  0x11   : > { %s8662_s30 = smov (!%p511_p3, %s5318_s30), 1  ;;  %v6626_v22 = vld [vmem:[%s8633_s4 + $0xa8] ss:$12 sps:$4 sm:$0xff]   ;;  %v6633_v26 = vld [vmem:[%s8633_s4 + $0x98] ss:$12 sps:$4 sm:$0xff]   ;;  %vm6949_vm0 = vmmov 0  }
  0x12   : > { %s7071_s21 = sshll.u32 %s8662_s30, 3  ;;  %6016 = vmatpush3.bf16.msra.mxu1 %v6628_v12  ;;  %s7117_s20 = sshll.u32 %s8662_s30, 6  ;;  %v6634_v27 = vld [vmem:[%s8633_s4 + $0xb0] ss:$12 sps:$4 sm:$0xff]   ;;  %6029 = vmatprep.mubr.msk.bf16.mxu1 %vm6949_vm0, %v6948_v4  ;;  %vm808_vm1 = vcmask 261120   ;;  %vm874_vm2 = vcmask 1043456  }
  0x13   : > { %729 = vmatpush1.bf16.msra.mxu0 %v6611_v7  ;;  %6017 = vmatprep.subr.bf16.mxu1 %v6948_v4  ;;  %s8644_s16 = smov 96   ;;  %s8648_s17 = smov 64   ;;  %vm857_vm3 = vcmask 64512   ;;  %vm1276_vm4 = vcmask 523264   ;;  %vm1278_vm5 = vcmask 785408  }
  0x14   : > { %730 = vmatprep.subr.bf16.mxu0 %v6612_v8  ;;  %s8646_s18 = smov 32   ;;  %s8656_s2 = sld [smem:[#allocation4_spill]] }
  0x15   : > { %s514_s15 = scalar_lea.vmem %s8654_s0, %s7071_s21  ;;  %s7126_s26 = scalar_lea.vmem %s8655_s1, %s7117_s20 }
  0x16   : > { %6018 = vmatpush3.bf16.msra.mxu1 %v6629_v16  ;;  %v7113_v23 = vld [vmem:[%s514_s15] sm:$0xff]  ;;  %s7181_s27 = scalar_lea.vmem %s8642_s13, %s7117_s20  ;;  %s8658_s3 = sld [smem:[#allocation5_spill]] }
  0x17   : > { %731 = vmatpush1.bf16.msra.mxu0 %v6614_v9  ;;  %6019 = vmatprep.subr.bf16.mxu1 %v6948_v4  ;;  %v563_v25 = vpack.c.bf16 %v7113_v23, %v7113_v23  ;;  %s8659_s22 = smov 64  }
  0x18   : > { %732 = vmatprep.subr.bf16.mxu0 %v6615_v10 }
  0x1a   : > { %6020 = vmatpush3.bf16.msra.mxu1 %v6630_v18  ;;  %s7166_s23 = scalar_lea.vmem %s8656_s2, %s7071_s21 }
  0x1b   : > { %733 = vmatpush1.bf16.msra.mxu0 %v6617_v13  ;;  %6021 = vmatprep.subr.bf16.mxu1 %v6948_v4  ;;  %v7169_v41 = vld [vmem:[%s7166_s23] sm:$0xff] }
  0x1c   : > { %734 = vmatprep.subr.bf16.mxu0 %v6618_v14  ;;  %s7526_s19 = scalar_lea.vmem %s8658_s3, %s7071_s21 }
  0x1e   : > { %6022 = vmatpush3.bf16.msra.mxu1 %v6631_v21 }
  0x1f   : > { %735 = vmatpush1.bf16.msra.mxu0 %v6620_v15  ;;  %6023 = vmatprep.subr.bf16.mxu1 %v6948_v4 }
  0x20   : > { %736 = vmatprep.subr.bf16.mxu0 %v6621_v17 }
  0x22   : > { %6024 = vmatpush3.bf16.msra.mxu1 %v6632_v24 }
  0x23   : > { %737 = vmatpush1.bf16.msra.mxu0 %v6623_v19  ;;  %6025 = vmatprep.subr.bf16.mxu1 %v6948_v4 }
  0x24   : > { %738 = vmatprep.subr.bf16.mxu0 %v6624_v20 }
  0x26   : > { %6026 = vmatpush3.bf16.msra.mxu1 %v6633_v26 }
  0x27   : > { %739 = vmatpush1.bf16.msra.mxu0 %v6626_v22  ;;  %6027 = vmatprep.subr.bf16.mxu1 %v6948_v4 }
  0x28   : > { %6057 = vmatprep.subr.bf16.mxu0 %v6948_v4 }
  0x2a   : > { %757 = vmatmul.mubr.bf16.vlgmr.msra.gmra.mrb[0].mxu0 %v563_v25  ;;  %6028 = vmatpush3.bf16.msra.mxu1 %v6634_v27 }
  0x2b   : > { %6033 = vmatprep.subr.bf16.mxu1 %v6948_v4  ;;  %6059 = vmatprep.mubr.msk.bf16.mxu0 %vm6949_vm0, %v6948_v4 }
  0x2d   : > { %6030 = vmatmul.mubr.bf16.vlgmr.msra.gmra.mrb[0].mxu1 %v563_v25 }
  0x2e   : > { %6035 = vmatprep.mubr.msk.bf16.mxu1 %vm6949_vm0, %v6948_v4 }
  0xfd   : > { %v758_v28 = vpop.f32.mrb[0].mxu0 }
  0xfe   : > { %v760_v29 = vpop.f32.mrb[1].mxu0  ;;  %v805_v34 = vpack.c.bf16 %v758_v28, %v758_v28 }
  0xff   : > { %v806_v30 = vpack.c.bf16 %v760_v29, %v760_v29  ;;  %v762_v31 = vpop.f32.mrb[2].mxu0 }
 0x100   : > { %v763_v32 = vpop.f32.mrb[3].mxu0  ;;  %v799_v35 = vpop.f32.mrb[0].mxu1 }
 0x101   : > { %922 = vrot.lane.b32.xlu1 %v806_v30, %s8644_s16  ;;  %v813_v33 = vsel %vm808_vm1, %v806_v30, 0  ;;  %v7157_v36 = vpack.c.bf16 %v799_v35, %v799_v35  ;;  %v6031_v37 = vpop.f32.mrb[1].mxu1 }
 0x102   : > { %6034 = vmatpush3.bf16.xpose.msra.mxu1 %v813_v33  ;;  %v802_v38 = vpop.f32.mrb[2].mxu1 }
 0x103   : > { %6039 = vmatprep.subr.bf16.mxu1 %v6948_v4  ;;  %v6032_v39 = vpop.f32.mrb[3].mxu1  ;;  %v876_v40 = vsel %vm874_vm2, %v7157_v36, 0 }
 0x105   : > { %919 = vrot.lane.b32.xlu1 %v805_v34, %s8644_s16 }
 0x109   : > { %1035 = vrot.lane.b32.xlu1 %v805_v34, %s8648_s17  ;;  %6036 = vmatmul.mubr.msk.bf16.vlgmr.msra.gmra.mrb[4].mxu1 %vm808_vm1, %v805_v34 }
 0x10a   : > { %6041 = vmatprep.mubr.msk.bf16.mxu1 %vm6949_vm0, %v6948_v4  ;;  %6040 = vmatpush3.bf16.msra.mxu1 %v876_v40 }
 0x10b   : > { %6045 = vmatprep.subr.bf16.mxu1 %v6948_v4 }
 0x10d   : > { %1151 = vrot.lane.b32.xlu1 %v806_v30, %s8646_s18 }
 0x111   : > { %1149 = vrot.lane.b32.xlu1 %v805_v34, %s8646_s18 }
 0x173   : > { %v923_v54 = vpop.permute.xlu1 %922 }
 0x174   : > { %v928_v1 = vsel %vm808_vm1, %v923_v54, 0 }
 0x177   : > { %v920_v55 = vpop.permute.xlu1 %919 }
 0x17b   : > { %v1036_v57 = vpop.permute.xlu1 %1035 }
 0x17f   : > { %v1152_v60 = vpop.permute.xlu1 %1151 }
 0x180   : > { %v1157_v63 = vsel %vm808_vm1, %v1152_v60, 0 }
 0x183   : > { %v1150_v3 = vpop.permute.xlu1 %1149 }
 0x1dc   : > { %v849_v42 = vpop.f32.mrb[4].mxu1 }
 0x1dd   : > { %v855_v43 = vmul.f32 0.17677669, %v849_v42  ;;  %v6037_v44 = vpop.f32.mrb[5].mxu1 }
 0x1de   : > { %v852_v45 = vpop.f32.mrb[6].mxu1 }
 0x1df   : > { %v6038_v46 = vpop.f32.mrb[7].mxu1  ;;  %v856_v47 = vadd.f32 %v855_v43, %v7169_v41 }
 0x1e1   : > { %v858_v48 = vsel %vm857_vm3, %v856_v47, -inf }
 0x1e2   : > { %859 = vmax.xlane.f32.xlu0 %v858_v48 }
 0x26f   : > { %v860_v49 = vpop.xlane.xlu0 %859 }
 0x270   : > { %v861_v50 = vsub.f32 %v856_v47, %v860_v49 }
 0x272   : > { %v862_v51 = vmul.f32 1.442695, %v861_v50 }
 0x274   : > { %6851 = vpow2.f32 %v862_v51 }
 0x27e   : > { %v6852_v52 = vpop.eup %6851 }
 0x27f   : > { %v864_v53 = vsel %vm857_vm3, %v6852_v52, 0.0 }
 0x280   : > { %865 = vadd.xlane.f32.xlu0 %v864_v53 }
 0x296   : > { %1037 = vrot.lane.b32.xlu0 %v806_v30, %s8648_s17 }
 0x30d   : > { %v866_v56 = vpop.xlane.xlu0 %865 }
 0x30e   : > { %6853 = vrcp.f32 %v866_v56 }
 0x311   : > { %v1038_v58 = vpop.permute.xlu0 %1037 }
 0x312   : > { %v1043_v59 = vsel %vm808_vm1, %v1038_v58, 0 }
 0x313   : > { %6058 = vmatpush3.bf16.xpose.msra.mxu0 %v1043_v59 }
 0x314   : > { %6069 = vmatprep.subr.bf16.mxu0 %v6948_v4 }
 0x318   : > { %v6854_v61 = vpop.eup %6853 }
 0x319   : > { %v868_v62 = vmul.f32 %v6854_v61, %v6852_v52 }
 0x31a   : > { %6060 = vmatmul.mubr.msk.bf16.vlgmr.msra.gmra.mrb[4].mxu0 %vm808_vm1, %v1036_v57 }
 0x31b   : > { %869 = vst.msk [vmem:[%s7181_s27] sm:$0xff] %vm857_vm3, %v868_v62  ;;  %6070 = vmatpush3.bf16.xpose.msra.mxu0 %v1157_v63  ;;  %v870_v0 = vpack.c.bf16 %v868_v62, %v868_v62  ;;  %6071 = vmatprep.mubr.msk.bf16.mxu0 %vm6949_vm0, %v6948_v4 }
 0x31c   : > { %6081 = vmatprep.subr.bf16.mxu0 %v6948_v4 }
 0x31d   : > { %6042 = vmatmul.mubr.msk.bf16.vlgmr.msra.gmra.mrb[8].mxu1 %vm857_vm3, %v870_v0  ;;  %v6635_v0 = vld [vmem:[%s8634_s5] sm:$0xff]  }
 0x31e   : > { %6046 = vmatpush3.bf16.xpose.msra.mxu1 %v928_v1  ;;  %6047 = vmatprep.mubr.msk.bf16.mxu1 %vm6949_vm0, %v6948_v4  ;;  %v6636_v1 = vld [vmem:[%s8634_s5 + $0x8] sm:$0xff]  }
 0x31f   : > { %6051 = vmatprep.subr.bf16.mxu1 %v6948_v4 }
 0x322   : > { %6072 = vmatmul.mubr.msk.bf16.vlgmr.msra.gmra.mrb[8].mxu0 %vm808_vm1, %v1150_v3  ;;  %v6637_v3 = vld [vmem:[%s8634_s5 + $0x10] sm:$0xff]  }
 0x323   : > { %6097 = vmatprep.mubr.msk.bf16.mxu0 %vm6949_vm0, %v6948_v4  ;;  %6082 = vmatpush3.bf16.msra.mxu0 %v6635_v0  ;;  %v6677_v0 = vld [vmem:[%s8635_s6 + $0x18] sm:$0xff]  }
 0x324   : > { %6083 = vmatprep.subr.bf16.mxu0 %v6948_v4 }
 0x325   : > { %6048 = vmatmul.mubr.msk.bf16.vlgmr.msra.gmra.mrb[12].mxu1 %vm808_vm1, %v920_v55 }
 0x326   : > { %6053 = vmatprep.mubr.msk.bf16.mxu1 %vm6949_vm0, %v6948_v4 }
 0x327   : > { %6084 = vmatpush3.bf16.msra.mxu0 %v6636_v1  ;;  %v6678_v1 = vld [vmem:[%s8635_s6 + $0x20] sm:$0xff]  }
 0x328   : > { %6085 = vmatprep.subr.bf16.mxu0 %v6948_v4 }
 0x32b   : > { %6086 = vmatpush3.bf16.msra.mxu0 %v6637_v3  ;;  %v6679_v3 = vld [vmem:[%s7126_s26 + $0x38] sm:$0xff]  }
 0x32c   : > { %6087 = vmatprep.subr.bf16.mxu0 %v6948_v4 }
 0x3ed   : > { %v1079_v5 = vpop.f32.mrb[4].mxu0 }
 0x3ee   : > { %v1085_v6 = vmul.f32 0.17677669, %v1079_v5  ;;  %v6061_v7 = vpop.f32.mrb[5].mxu0  ;;  %v6638_v5 = vld [vmem:[%s8634_s5 + $0x18] sm:$0xff]  }
 0x3ef   : > { %v1082_v8 = vpop.f32.mrb[6].mxu0  ;;  %6088 = vmatpush3.bf16.msra.mxu0 %v6638_v5  ;;  %v6640_v7 = vld [vmem:[%s8634_s5 + $0x28] sm:$0xff]  }
 0x3f0   : > { %v7201_v9 = vpop.f32.mrb[8].mxu1  ;;  %v6062_v10 = vpop.f32.mrb[7].mxu0  ;;  %v1086_v11 = vadd.f32 %v1085_v6, %v7169_v41  ;;  %v6639_v6 = vld [vmem:[%s8634_s5 + $0x20] sm:$0xff]   ;;  %6089 = vmatprep.subr.bf16.mxu0 %v6948_v4  ;;  %v6641_v8 = vld [vmem:[%s8634_s5 + $0x30] sm:$0xff]   ;;  %v6680_v5 = vld [vmem:[%s8635_s6 + $0x28] sm:$0xff]  }
 0x3f1   : > { %v6043_v12 = vpop.f32.mrb[9].mxu1 }
 0x3f2   : > { %v915_v13 = vpop.f32.mrb[10].mxu1  ;;  %v1087_v14 = vsel %vm857_vm3, %v1086_v11, -inf }
 0x3f3   : > { %v6044_v15 = vpop.f32.mrb[11].mxu1  ;;  %1088 = vmax.xlane.f32.xlu0 %v1087_v14  ;;  %6090 = vmatpush3.bf16.msra.mxu0 %v6639_v6  ;;  %v6642_v14 = vld [vmem:[%s8634_s5 + $0x38] sm:$0xff]   ;;  %v6681_v6 = vld [vmem:[%s8635_s6 + $0x30] sm:$0xff]  }
 0x3f4   : > { %6091 = vmatprep.subr.bf16.mxu0 %v6948_v4 }
 0x3f5   : > { %v1193_v16 = vpop.f32.mrb[8].mxu0 }
 0x3f6   : > { %v6073_v17 = vpop.f32.mrb[9].mxu0  ;;  %v1199_v21 = vmul.f32 0.17677669, %v1193_v16 }
 0x3f7   : > { %v1196_v18 = vpop.f32.mrb[10].mxu0  ;;  %6092 = vmatpush3.bf16.msra.mxu0 %v6640_v7  ;;  %v6682_v7 = vld [vmem:[%s8635_s6 + $0x38] sm:$0xff]  }
 0x3f8   : > { %v964_v19 = vpop.f32.mrb[12].mxu1  ;;  %v6074_v20 = vpop.f32.mrb[11].mxu0  ;;  %v1200_v29 = vadd.f32 %v1199_v21, %v7169_v41  ;;  %6093 = vmatprep.subr.bf16.mxu0 %v6948_v4 }
 0x3f9   : > { %v970_v22 = vmul.f32 0.17677669, %v964_v19  ;;  %v6049_v24 = vpop.f32.mrb[13].mxu1 }
 0x3fa   : > { %v967_v25 = vpop.f32.mrb[14].mxu1  ;;  %v1201_v30 = vsel %vm857_vm3, %v1200_v29, -inf }
 0x3fb   : > { %v6050_v26 = vpop.f32.mrb[15].mxu1  ;;  %v971_v27 = vadd.f32 %v970_v22, %v7169_v41  ;;  %6094 = vmatpush3.bf16.msra.mxu0 %v6641_v8 }
 0x3fc   : > { %6095 = vmatprep.subr.bf16.mxu0 %v6948_v4 }
 0x3fd   : > { %v972_v28 = vsel %vm857_vm3, %v971_v27, -inf }
 0x3fe   : > { %973 = vmax.xlane.f32.xlu1 %v972_v28 }
 0x3ff   : > { %6096 = vmatpush3.bf16.msra.mxu0 %v6642_v14 }
 0x402   : > { %1202 = vmax.xlane.f32.xlu1 %v1201_v30 }
 0x480   : > { %v1089_v31 = vpop.xlane.xlu0 %1088 }
 0x481   : > { %v1090_v32 = vsub.f32 %v1086_v11, %v1089_v31 }
 0x483   : > { %v1091_v33 = vmul.f32 1.442695, %v1090_v32 }
 0x485   : > { %6855 = vpow2.f32 %v1091_v33 }
 0x48b   : > { %v974_v34 = vpop.xlane.xlu1 %973 }
 0x48c   : > { %v975_v35 = vsub.f32 %v971_v27, %v974_v34 }
 0x48e   : > { %v976_v42 = vmul.f32 1.442695, %v975_v35 }
 0x48f   : > { %v6856_v37 = vpop.eup %6855  ;;  %v1203_v38 = vpop.xlane.xlu1 %1202 }
 0x490   : > { %v1204_v39 = vsub.f32 %v1200_v29, %v1203_v38  ;;  %v1093_v40 = vsel %vm857_vm3, %v6856_v37, 0.0  ;;  %v6648_v38 = vld [vmem:[%s8636_s7 + $0x14] ss:$8 sps:$4 sm:$0xff]  }
 0x491   : > { %1094 = vadd.xlane.f32.xlu0 %v1093_v40  ;;  %v6649_v40 = vld [vmem:[%s8636_s7 + $0x20] ss:$8 sps:$4 sm:$0xff]  }
 0x492   : > { %v1205_v43 = vmul.f32 1.442695, %v1204_v39  ;;  %v6651_v39 = vld [vmem:[%s8636_s7 + $0x24] ss:$8 sps:$4 sm:$0xff]  }
 0x494   : > { %6857 = vpow2.f32 %v1205_v43  ;;  %v6654_v43 = vld [vmem:[%s8636_s7 + $0x34] ss:$8 sps:$4 sm:$0xff]  }
 0x495   : > { %6859 = vpow2.f32 %v976_v42  ;;  %v6672_v42 = vld [vmem:[%s8635_s6] sm:$0xff]  }
 0x49e   : > { %v6858_v41 = vpop.eup %6857 }
 0x49f   : > { %v1207_v44 = vsel %vm857_vm3, %v6858_v41, 0.0  ;;  %v6860_v45 = vpop.eup %6859 }
 0x4a0   : > { %1208 = vadd.xlane.f32.xlu1 %v1207_v44  ;;  %v978_v46 = vsel %vm857_vm3, %v6860_v45, 0.0  ;;  %v6652_v44 = vld [vmem:[%s8636_s7 + $0x30] ss:$8 sps:$4 sm:$0xff]  }
 0x4a4   : > { %979 = vadd.xlane.f32.xlu1 %v978_v46  ;;  %v6655_v46 = vld [vmem:[%s8636_s7 + $0x40] ss:$8 sps:$4 sm:$0xff]  }
 0x4a7   : > { %987 = vrot.lane.b32.xlu0 %v7157_v36, %s8644_s16  ;;  %s8657_s16 = smov 96  }
 0x4b5   : > { %1101 = vrot.lane.b32.xlu1 %v7157_v36, %s8648_s17 }
 0x4b9   : > { %1215 = vrot.lane.b32.xlu1 %v7157_v36, %s8646_s18 }
 0x51e   : > { %v1095_v47 = vpop.xlane.xlu0 %1094 }
 0x51f   : > { %6861 = vrcp.f32 %v1095_v47  ;;  %v6660_v47 = vld [vmem:[%s8636_s7 + $0x54] ss:$8 sps:$4 sm:$0xff]  }
 0x522   : > { %v988_v48 = vpop.permute.xlu0 %987 }
 0x523   : > { %v993_v49 = vsel %vm874_vm2, %v988_v48, 0  ;;  %v6658_v48 = vld [vmem:[%s8636_s7 + $0x50] ss:$8 sps:$4 sm:$0xff]  }
 0x524   : > { %6052 = vmatpush3.bf16.msra.mxu1 %v993_v49  ;;  %v6663_v49 = vld [vmem:[%s8636_s7 + $0x64] ss:$8 sps:$4 sm:$0xff]  }
 0x525   : > { %6063 = vmatprep.subr.bf16.mxu1 %v6948_v4 }
 0x529   : > { %v6862_v50 = vpop.eup %6861 }
 0x52a   : > { %v1097_v51 = vmul.f32 %v6862_v50, %v6856_v37  ;;  %v6645_v37 = vld [vmem:[%s8636_s7 + $0x4] ss:$8 sps:$4 sm:$0xff]   ;;  %v6661_v50 = vld [vmem:[%s8636_s7 + $0x60] ss:$8 sps:$4 sm:$0xff]  }
 0x52b   : > { %1657 = vmatprep.subr.bf16.mxu0 %v6645_v37 }
 0x52c   : > { %5363 = vst.msk [vmem:[%s7181_s27 + $0x10] sm:$0xff] %vm857_vm3, %v1097_v51  ;;  %v1100_v61 = vpack.c.bf16 %v1097_v51, %v1097_v51  ;;  %v6666_v51 = vld [vmem:[%s8636_s7 + $0x74] ss:$8 sps:$4 sm:$0xff]  }
 0x52d   : > { %v1209_v52 = vpop.xlane.xlu1 %1208 }
 0x52e   : > { %6863 = vrcp.f32 %v1209_v52  ;;  %v6664_v52 = vld [vmem:[%s8636_s7 + $0x70] ss:$8 sps:$4 sm:$0xff]  }
 0x531   : > { %v980_v53 = vpop.xlane.xlu1 %979 }
 0x532   : > { %6865 = vrcp.f32 %v980_v53  ;;  %v6667_v53 = vld [vmem:[%s7126_s26] sm:$0xff]  }
 0x535   : > { %v1102_v57 = vpop.permute.xlu1 %1101 }
 0x536   : > { %v1107_v59 = vsel %vm874_vm2, %v1102_v57, 0  ;;  %v6673_v57 = vld [vmem:[%s7126_s26 + $0x28] sm:$0xff]  }
 0x538   : > { %v6864_v54 = vpop.eup %6863 }
 0x539   : > { %v1211_v36 = vmul.f32 %v6864_v54, %v6858_v41  ;;  %v1216_v60 = vpop.permute.xlu1 %1215  ;;  %v6674_v41 = vld [vmem:[%s8635_s6 + $0x8] sm:$0xff]  }
 0x53a   : > { %v1221_v62 = vsel %vm874_vm2, %v1216_v60, 0  ;;  %v6668_v54 = vld [vmem:[%s7126_s26 + $0x8] sm:$0xff]  }
 0x53b   : > { %5366 = vst.msk [vmem:[%s7181_s27 + $0x18] sm:$0xff] %vm857_vm3, %v1211_v36  ;;  %v1214_v63 = vpack.c.bf16 %v1211_v36, %v1211_v36  ;;  %v6669_v36 = vld [vmem:[%s7126_s26 + $0x10] sm:$0xff]  }
 0x53c   : > { %v6866_v55 = vpop.eup %6865 }
 0x53d   : > { %v982_v56 = vmul.f32 %v6866_v55, %v6860_v45  ;;  %v6657_v45 = vld [vmem:[%s8636_s7 + $0x44] ss:$8 sps:$4 sm:$0xff]   ;;  %v6670_v55 = vld [vmem:[%s7126_s26 + $0x18] sm:$0xff]  }
 0x53f   : > { %5360 = vst.msk [vmem:[%s7181_s27 + $0x8] sm:$0xff] %vm857_vm3, %v982_v56  ;;  %v985_v58 = vpack.c.bf16 %v982_v56, %v982_v56  ;;  %v6671_v56 = vld [vmem:[%s7126_s26 + $0x20] sm:$0xff]  }
 0x541   : > { %6054 = vmatmul.mubr.msk.bf16.vlgmr.msra.gmra.mrb[16].mxu1 %vm857_vm3, %v985_v58 }
 0x542   : > { %6064 = vmatpush3.bf16.msra.mxu1 %v1107_v59  ;;  %6065 = vmatprep.mubr.msk.bf16.mxu1 %vm6949_vm0, %v6948_v4 }
 0x543   : > { %6075 = vmatprep.subr.bf16.mxu1 %v6948_v4 }
 0x549   : > { %6066 = vmatmul.mubr.msk.bf16.vlgmr.msra.gmra.mrb[20].mxu1 %vm857_vm3, %v1100_v61 }
 0x54a   : > { %6076 = vmatpush3.bf16.msra.mxu1 %v1221_v62  ;;  %6077 = vmatprep.mubr.msk.bf16.mxu1 %vm6949_vm0, %v6948_v4  ;;  %v6675_v62 = vld [vmem:[%s8635_s6 + $0x10] sm:$0xff]  }
 0x54b   : > { %6101 = vmatprep.subr.bf16.mxu1 %v6948_v4 }
 0x551   : > { %6078 = vmatmul.mubr.msk.bf16.vlgmr.msra.gmra.mrb[24].mxu1 %vm857_vm3, %v1214_v63  ;;  %v6676_v63 = vld [vmem:[%s7126_s26 + $0x30] sm:$0xff]  }
 0x552   : > { %6117 = vmatprep.mubr.msk.bf16.mxu1 %vm6949_vm0, %v6948_v4  ;;  %6102 = vmatpush3.bf16.msra.mxu1 %v6672_v42 }
 0x553   : > { %6103 = vmatprep.subr.bf16.mxu1 %v6948_v4 }
 0x556   : > { %6104 = vmatpush3.bf16.msra.mxu1 %v6674_v41 }
 0x557   : > { %6105 = vmatprep.subr.bf16.mxu1 %v6948_v4 }
 0x55a   : > { %6106 = vmatpush3.bf16.msra.mxu1 %v6675_v62 }
 0x55b   : > { %6107 = vmatprep.subr.bf16.mxu1 %v6948_v4 }
 0x55e   : > { %6108 = vmatpush3.bf16.msra.mxu1 %v6677_v0 }
 0x55f   : > { %6109 = vmatprep.subr.bf16.mxu1 %v6948_v4 }
 0x562   : > { %6110 = vmatpush3.bf16.msra.mxu1 %v6678_v1 }
 0x563   : > { %6111 = vmatprep.subr.bf16.mxu1 %v6948_v4 }
 0x566   : > { %6112 = vmatpush3.bf16.msra.mxu1 %v6680_v5 }
 0x567   : > { %6113 = vmatprep.subr.bf16.mxu1 %v6948_v4 }
 0x56a   : > { %6114 = vmatpush3.bf16.msra.mxu1 %v6681_v6 }
 0x56b   : > { %6115 = vmatprep.subr.bf16.mxu1 %v6948_v4 }
 0x56e   : > { %6116 = vmatpush3.bf16.msra.mxu1 %v6682_v7 }
 0x56f   : > { %6121 = vmatprep.subr.bf16.mxu1 %v6948_v4 }
 0x614   : > { %v1029_v10 = vpop.f32.mrb[16].mxu1 }
 0x615   : > { %1264 = vrot.lane.b32.xlu0 %v1029_v10, %s8646_s18  ;;  %v6055_v11 = vpop.f32.mrb[17].mxu1  ;;  %s7577_s18 = scalar_lea.vmem %s8643_s14, %s7117_s20  ;;  %s8660_s20 = smov 32  }
 0x616   : > { %v1032_v12 = vpop.f32.mrb[18].mxu1 }
 0x617   : > { %v6056_v13 = vpop.f32.mrb[19].mxu1 }
 0x61c   : > { %v1143_v15 = vpop.f32.mrb[20].mxu1 }
 0x61d   : > { %1268 = vrot.lane.b32.xlu1 %v1143_v15, %s8648_s17  ;;  %v6067_v16 = vpop.f32.mrb[21].mxu1 }
 0x61e   : > { %v1146_v17 = vpop.f32.mrb[22].mxu1 }
 0x61f   : > { %v6068_v18 = vpop.f32.mrb[23].mxu1 }
 0x624   : > { %v1257_v19 = vpop.f32.mrb[24].mxu1 }
 0x625   : > { %1272 = vrot.lane.b32.xlu0 %v1257_v19, %s8657_s16  ;;  %v6079_v20 = vpop.f32.mrb[25].mxu1 }
 0x626   : > { %v1260_v21 = vpop.f32.mrb[26].mxu1 }
 0x627   : > { %v6080_v22 = vpop.f32.mrb[27].mxu1 }
 0x687   : > { %v1265_v24 = vpop.permute.xlu0 %1264 }
 0x688   : > { %v1275_v26 = vsel %vm808_vm1, %v7201_v9, %v1265_v24  ;;  %v6643_v9 = vld [vmem:[%s8636_s7] ss:$8 sps:$4 sm:$0xff]  }
 0x68f   : > { %v1269_v25 = vpop.permute.xlu1 %1268 }
 0x690   : > { %v1277_v27 = vsel %vm1276_vm4, %v1275_v26, %v1269_v25 }
 0x697   : > { %v1273_v28 = vpop.permute.xlu0 %1272 }
 0x698   : > { %v1279_v29 = vsel %vm1278_vm5, %v1277_v27, %v1273_v28 }
 0x699   : > { %v1280_v30 = vpack.c.bf16 %v1279_v29, %v1279_v29 }
 0x69b   : > { %6098 = vmatmul.mubr.bf16.vlgmr.msra.gmra.mrb[12].mxu0 %v1280_v30 }
 0x69c   : > { %1689 = vmatprep.mubr.bf16.mxu0 %v6947_v2  ;;  %1658 = vmatpush1.bf16.msra.mxu0 %v6643_v9 }
 0x69d   : > { %1659 = vmatprep.subr.bf16.mxu0 %v6648_v38 }
 0x76e   : > { %v1379_v31 = vpop.f32.mrb[12].mxu0 }
 0x76f   : > { %v7279_v32 = vadd.f32 %v1379_v31, %v7113_v23  ;;  %v6099_v33 = vpop.f32.mrb[13].mxu0  ;;  %v6646_v23 = vld [vmem:[%s8636_s7 + $0x10] ss:$8 sps:$4 sm:$0xff]  }
 0x770   : > { %v1382_v34 = vpop.f32.mrb[14].mxu0  ;;  %1660 = vmatpush1.bf16.msra.mxu0 %v6646_v23 }
 0x771   : > { %1385 = vadd.xlane.f32.xlu1 %v7279_v32  ;;  %v6100_v35 = vpop.f32.mrb[15].mxu0  ;;  %1661 = vmatprep.subr.bf16.mxu0 %v6651_v39 }
 0x774   : > { %1662 = vmatpush1.bf16.msra.mxu0 %v6649_v40 }
 0x775   : > { %1663 = vmatprep.subr.bf16.mxu0 %v6654_v43  ;;  %v7423_v43 = vld [vmem:[%s8640_s11] sm:$0x3f] }
 0x778   : > { %1664 = vmatpush1.bf16.msra.mxu0 %v6652_v44 }
 0x779   : > { %1665 = vmatprep.subr.bf16.mxu0 %v6657_v45 }
 0x77c   : > { %1666 = vmatpush1.bf16.msra.mxu0 %v6655_v46 }
 0x77d   : > { %1667 = vmatprep.subr.bf16.mxu0 %v6660_v47 }
 0x780   : > { %1668 = vmatpush1.bf16.msra.mxu0 %v6658_v48 }
 0x781   : > { %1669 = vmatprep.subr.bf16.mxu0 %v6663_v49 }
 0x784   : > { %1670 = vmatpush1.bf16.msra.mxu0 %v6661_v50 }
 0x785   : > { %1671 = vmatprep.subr.bf16.mxu0 %v6666_v51 }
 0x788   : > { %1672 = vmatpush1.bf16.msra.mxu0 %v6664_v52 }
 0x789   : > { %6141 = vmatprep.subr.bf16.mxu0 %v6948_v4 }
 0x78b   : > { %1690 = vmatmul.mubr.bf16.vlgmr.msra.gmra.mrb[16].mxu0 %v6667_v53 }
 0x78c   : > { %1699 = vmatprep.mubr.bf16.mxu0 %v6947_v2 }
 0x793   : > { %1700 = vmatmul.mubr.bf16.gmra.mrb[20].mxu0 %v6668_v54 }
 0x794   : > { %1709 = vmatprep.mubr.bf16.mxu0 %v6947_v2 }
 0x79b   : > { %1710 = vmatmul.mubr.bf16.gmra.mrb[24].mxu0 %v6669_v36 }
 0x79c   : > { %1719 = vmatprep.mubr.bf16.mxu0 %v6947_v2 }
 0x7a3   : > { %1720 = vmatmul.mubr.bf16.gmra.mrb[28].mxu0 %v6670_v55 }
 0x7a4   : > { %1729 = vmatprep.mubr.bf16.mxu0 %v6947_v2 }
 0x7ab   : > { %1730 = vmatmul.mubr.bf16.gmra.mrb[32].mxu0 %v6671_v56 }
 0x7ac   : > { %1739 = vmatprep.mubr.bf16.mxu0 %v6947_v2 }
 0x7b3   : > { %1740 = vmatmul.mubr.bf16.gmra.mrb[36].mxu0 %v6673_v57 }
 0x7b4   : > { %1749 = vmatprep.mubr.bf16.mxu0 %v6947_v2 }
 0x7bb   : > { %1750 = vmatmul.mubr.bf16.gmra.mrb[40].mxu0 %v6676_v63 }
 0x7bc   : > { %1759 = vmatprep.mubr.bf16.mxu0 %v6947_v2 }
 0x7c3   : > { %1760 = vmatmul.mubr.bf16.gmra.mrb[44].mxu0 %v6679_v3 }
 0x7c4   : > { %6157 = vmatprep.mubr.msk.bf16.mxu0 %vm6949_vm0, %v6948_v4 }
 0x7fe   : > { %v1386_v58 = vpop.xlane.xlu1 %1385 }
 0x7ff   : > { %v1388_v59 = vmul.f32 0.0078125, %v1386_v58 }
 0x801   : > { %v7352_v60 = vsub.f32 %v7279_v32, %v1388_v59  ;;  %v1397_v32 = vlaneseq }
 0x803   : > { %v1390_v61 = vmul.f32 %v7352_v60, %v7352_v60  ;;  %v7415_v38 = vshrl.u32 %v1397_v32, 7 }
 0x805   : > { %1391 = vadd.xlane.f32.xlu0 %v1390_v61  ;;  %v1399_v40 = vsub.s32 0, %v7415_v38  ;;  %v1404_v45 = vsub.s32 1, %v7415_v38 }
 0x807   : > { %v1400_v47 = vrot.slane %v7423_v43, %v1399_v40  ;;  %v1405_v50 = vrot.slane %v7423_v43, %v1404_v45 }
 0x85e   : > { %v1691_v8 = vpop.f32.mrb[16].mxu0 }
 0x85f   : > { %v1693_v10 = vpop.f32.mrb[17].mxu0 }
 0x860   : > { %v1695_v11 = vpop.f32.mrb[18].mxu0 }
 0x861   : > { %v7385_v12 = vpack.c.bf16 %v1695_v11, %v1691_v8  ;;  %v1697_v13 = vpop.f32.mrb[19].mxu0 }
 0x862   : > { %v7387_v14 = vpack.c.bf16 %v1697_v13, %v1693_v10 }
 0x863   : > { %1917 = vrot.lane.b32.xlu0 %v7385_v12, %s8657_s16  ;;  %v1790_v59 = vsel %vm808_vm1, %v7385_v12, 0 }
 0x864   : > { %6142 = vmatpush3.bf16.msra.mxu0 %v7387_v14 }
 0x865   : > { %6143 = vmatprep.subr.bf16.mxu0 %v6948_v4 }
 0x866   : > { %v1701_v15 = vpop.f32.mrb[20].mxu0 }
 0x867   : > { %v1703_v16 = vpop.f32.mrb[21].mxu0 }
 0x868   : > { %v1705_v17 = vpop.f32.mrb[22].mxu0 }
 0x869   : > { %v7393_v18 = vpack.c.bf16 %v1705_v17, %v1701_v15  ;;  %v1707_v19 = vpop.f32.mrb[23].mxu0 }
 0x86a   : > { %v7395_v20 = vpack.c.bf16 %v1707_v19, %v1703_v16 }
 0x86b   : > { %1919 = vrot.lane.b32.xlu1 %v7393_v18, %s8657_s16 }
 0x86c   : > { %6144 = vmatpush3.bf16.msra.mxu0 %v7395_v20 }
 0x86d   : > { %6145 = vmatprep.subr.bf16.mxu0 %v6948_v4 }
 0x86e   : > { %v1711_v21 = vpop.f32.mrb[24].mxu0 }
 0x86f   : > { %v1713_v22 = vpop.f32.mrb[25].mxu0 }
 0x870   : > { %v1715_v24 = vpop.f32.mrb[26].mxu0 }
 0x871   : > { %v7401_v25 = vpack.c.bf16 %v1715_v24, %v1711_v21  ;;  %v1717_v26 = vpop.f32.mrb[27].mxu0 }
 0x872   : > { %v7403_v27 = vpack.c.bf16 %v1717_v26, %v1713_v22 }
 0x873   : > { %1921 = vrot.lane.b32.xlu1 %v7401_v25, %s8657_s16  ;;  %v1796_v61 = vsel %vm808_vm1, %v7401_v25, 0 }
 0x874   : > { %6146 = vmatpush3.bf16.msra.mxu0 %v7403_v27 }
 0x875   : > { %6147 = vmatprep.subr.bf16.mxu0 %v6948_v4 }
 0x876   : > { %v1721_v29 = vpop.f32.mrb[28].mxu0 }
 0x877   : > { %v1723_v31 = vpop.f32.mrb[29].mxu0 }
 0x878   : > { %v1725_v33 = vpop.f32.mrb[30].mxu0 }
 0x879   : > { %v7409_v35 = vpack.c.bf16 %v1725_v33, %v1721_v29  ;;  %v1727_v9 = vpop.f32.mrb[31].mxu0 }
 0x87a   : > { %v7411_v37 = vpack.c.bf16 %v1727_v9, %v1723_v31 }
 0x87b   : > { %1923 = vrot.lane.b32.xlu0 %v7409_v35, %s8657_s16  ;;  %v1799_v62 = vsel %vm808_vm1, %v7409_v35, 0 }
 0x87c   : > { %6148 = vmatpush3.bf16.msra.mxu0 %v7411_v37 }
 0x87d   : > { %6149 = vmatprep.subr.bf16.mxu0 %v6948_v4 }
 0x87e   : > { %v1731_v23 = vpop.f32.mrb[32].mxu0 }
 0x87f   : > { %v1733_v39 = vpop.f32.mrb[33].mxu0 }
 0x880   : > { %v1735_v42 = vpop.f32.mrb[34].mxu0 }
 0x881   : > { %v7425_v41 = vpack.c.bf16 %v1735_v42, %v1731_v23  ;;  %v1737_v44 = vpop.f32.mrb[35].mxu0 }
 0x882   : > { %v7428_v46 = vpack.c.bf16 %v1737_v44, %v1733_v39 }
 0x883   : > { %1925 = vrot.lane.b32.xlu1 %v7425_v41, %s8657_s16  ;;  %v1802_v63 = vsel %vm808_vm1, %v7425_v41, 0 }
 0x884   : > { %6150 = vmatpush3.bf16.msra.mxu0 %v7428_v46 }
 0x885   : > { %6151 = vmatprep.subr.bf16.mxu0 %v6948_v4 }
 0x886   : > { %v1741_v51 = vpop.f32.mrb[36].mxu0 }
 0x887   : > { %v1743_v52 = vpop.f32.mrb[37].mxu0 }
 0x888   : > { %v1745_v54 = vpop.f32.mrb[38].mxu0 }
 0x889   : > { %v7441_v36 = vpack.c.bf16 %v1745_v54, %v1741_v51  ;;  %v1747_v55 = vpop.f32.mrb[39].mxu0  ;;  %v7529_v54 = vld [vmem:[%s7526_s19] sm:$0xff] }
 0x88a   : > { %v7445_v57 = vpack.c.bf16 %v1747_v55, %v1743_v52 }
 0x88b   : > { %1927 = vrot.lane.b32.xlu0 %v7441_v36, %s8657_s16  ;;  %v1805_v0 = vsel %vm808_vm1, %v7441_v36, 0 }
 0x88c   : > { %6152 = vmatpush3.bf16.msra.mxu0 %v7445_v57 }
 0x88d   : > { %6153 = vmatprep.subr.bf16.mxu0 %v6948_v4 }
 0x88e   : > { %v1751_v1 = vpop.f32.mrb[40].mxu0 }
 0x88f   : > { %v1753_v3 = vpop.f32.mrb[41].mxu0 }
 0x890   : > { %v1755_v5 = vpop.f32.mrb[42].mxu0 }
 0x891   : > { %v7473_v6 = vpack.c.bf16 %v1755_v5, %v1751_v1  ;;  %v1757_v7 = vpop.f32.mrb[43].mxu0 }
 0x892   : > { %v1392_v28 = vpop.xlane.xlu0 %1391  ;;  %v7475_v8 = vpack.c.bf16 %v1757_v7, %v1753_v3 }
 0x893   : > { %v1393_v30 = vmul.f32 0.0078125, %v1392_v28  ;;  %1929 = vrot.lane.b32.xlu1 %v7473_v6, %s8657_s16  ;;  %v1808_v10 = vsel %vm808_vm1, %v7473_v6, 0 }
 0x894   : > { %6154 = vmatpush3.bf16.msra.mxu0 %v7475_v8 }
 0x895   : > { %v1394_v34 = vadd.f32 1e-05, %v1393_v30  ;;  %6155 = vmatprep.subr.bf16.mxu0 %v6948_v4 }
 0x896   : > { %v1761_v11 = vpop.f32.mrb[44].mxu0 }
 0x897   : > { %6867 = vrsqrt.f32 %v1394_v34  ;;  %v1763_v13 = vpop.f32.mrb[45].mxu0 }
 0x898   : > { %v1765_v15 = vpop.f32.mrb[46].mxu0 }
 0x899   : > { %v7484_v16 = vpack.c.bf16 %v1765_v15, %v1761_v11  ;;  %v1767_v17 = vpop.f32.mrb[47].mxu0 }
 0x89a   : > { %v7486_v19 = vpack.c.bf16 %v1767_v17, %v1763_v13 }
 0x89b   : > { %1931 = vrot.lane.b32.xlu0 %v7484_v16, %s8657_s16  ;;  %v1811_v21 = vsel %vm808_vm1, %v7484_v16, 0 }
 0x89c   : > { %6156 = vmatpush3.bf16.msra.mxu0 %v7486_v19 }
 0x89d   : > { %6181 = vmatprep.subr.bf16.mxu0 %v6948_v4 }
 0x8a1   : > { %v6868_v48 = vpop.eup %6867 }
 0x8a2   : > { %v1396_v49 = vmul.f32 %v6868_v48, %v7352_v60  ;;  %v1793_v60 = vsel %vm808_vm1, %v7393_v18, 0 }
 0x8a4   : > { %v1401_v53 = vmul.f32 %v1400_v47, %v1396_v49 }
 0x8a6   : > { %v7443_v56 = vadd.f32 %v1405_v50, %v1401_v53 }
 0x8a8   : > { %v1407_v58 = vpack.c.bf16 %v7443_v56, %v7443_v56 }
 0x8aa   : > { %6118 = vmatmul.mubr.bf16.vlgmr.msra.gmra.mrb[28].mxu1 %v1407_v58 }
 0x8ab   : > { %6122 = vmatpush3.bf16.xpose.msra.mxu1 %v1790_v59  ;;  %6137 = vmatprep.mubr.msk.bf16.mxu1 %vm6949_vm0, %v6948_v4 }
 0x8ac   : > { %6123 = vmatprep.subr.bf16.mxu1 %v6948_v4 }
 0x8b3   : > { %6124 = vmatpush3.bf16.xpose.msra.mxu1 %v1793_v60 }
 0x8b4   : > { %6125 = vmatprep.subr.bf16.mxu1 %v6948_v4 }
 0x8bb   : > { %6126 = vmatpush3.bf16.xpose.msra.mxu1 %v1796_v61 }
 0x8bc   : > { %6127 = vmatprep.subr.bf16.mxu1 %v6948_v4 }
 0x8c3   : > { %6128 = vmatpush3.bf16.xpose.msra.mxu1 %v1799_v62 }
 0x8c4   : > { %6129 = vmatprep.subr.bf16.mxu1 %v6948_v4 }
 0x8cb   : > { %6130 = vmatpush3.bf16.xpose.msra.mxu1 %v1802_v63 }
 0x8cc   : > { %6131 = vmatprep.subr.bf16.mxu1 %v6948_v4 }
 0x8d3   : > { %6132 = vmatpush3.bf16.xpose.msra.mxu1 %v1805_v0 }
 0x8d4   : > { %6133 = vmatprep.subr.bf16.mxu1 %v6948_v4 }
 0x8d5   : > { %v1918_v22 = vpop.permute.xlu0 %1917 }
 0x8d6   : > { %v1937_v29 = vsel %vm808_vm1, %v1918_v22, 0 }
 0x8db   : > { %6134 = vmatpush3.bf16.xpose.msra.mxu1 %v1808_v10 }
 0x8dc   : > { %6135 = vmatprep.subr.bf16.mxu1 %v6948_v4 }
 0x8dd   : > { %v1920_v32 = vpop.permute.xlu1 %1919 }
 0x8de   : > { %v1940_v33 = vsel %vm808_vm1, %v1920_v32, 0 }
 0x8e3   : > { %6136 = vmatpush3.bf16.xpose.msra.mxu1 %v1811_v21 }
 0x8e4   : > { %6161 = vmatprep.subr.bf16.mxu1 %v6948_v4 }
 0x8e5   : > { %v1922_v34 = vpop.permute.xlu1 %1921 }
 0x8e6   : > { %v1943_v9 = vsel %vm808_vm1, %v1922_v34, 0 }
 0x8ed   : > { %v1924_v23 = vpop.permute.xlu0 %1923 }
 0x8ee   : > { %v1946_v39 = vsel %vm808_vm1, %v1924_v23, 0 }
 0x8f5   : > { %v1926_v42 = vpop.permute.xlu1 %1925 }
 0x8f6   : > { %v1949_v44 = vsel %vm808_vm1, %v1926_v42, 0 }
 0x8fd   : > { %v1928_v47 = vpop.permute.xlu0 %1927 }
 0x8fe   : > { %v1952_v48 = vsel %vm808_vm1, %v1928_v47, 0 }
 0x905   : > { %v1930_v49 = vpop.permute.xlu1 %1929 }
 0x906   : > { %v1955_v50 = vsel %vm808_vm1, %v1930_v49, 0 }
 0x90d   : > { %v1932_v51 = vpop.permute.xlu0 %1931 }
 0x90e   : > { %v1958_v52 = vsel %vm808_vm1, %v1932_v51, 0 }
 0x97d   : > { %v1506_v24 = vpop.f32.mrb[28].mxu1 }
 0x97e   : > { %v7495_v26 = vpack.c.bf16 %v1506_v24, %v1506_v24  ;;  %v6119_v28 = vpop.f32.mrb[29].mxu1 }
 0x97f   : > { %v1509_v30 = vpop.f32.mrb[30].mxu1 }
 0x980   : > { %v6120_v31 = vpop.f32.mrb[31].mxu1  ;;  %1907 = vrot.lane.b32.xlu1 %v7495_v26, %s8657_s16  ;;  %6138 = vmatmul.mubr.msk.bf16.vlgmr.msra.gmra.mrb[32].mxu1 %vm808_vm1, %v7495_v26 }
 0x981   : > { %6162 = vmatpush3.bf16.xpose.msra.mxu1 %v1937_v29  ;;  %6177 = vmatprep.mubr.msk.bf16.mxu1 %vm6949_vm0, %v6948_v4 }
 0x982   : > { %6163 = vmatprep.subr.bf16.mxu1 %v6948_v4 }
 0x989   : > { %6164 = vmatpush3.bf16.xpose.msra.mxu1 %v1940_v33 }
 0x98a   : > { %6165 = vmatprep.subr.bf16.mxu1 %v6948_v4 }
 0x991   : > { %6166 = vmatpush3.bf16.xpose.msra.mxu1 %v1943_v9 }
 0x992   : > { %6167 = vmatprep.subr.bf16.mxu1 %v6948_v4 }
 0x999   : > { %6168 = vmatpush3.bf16.xpose.msra.mxu1 %v1946_v39 }
 0x99a   : > { %6169 = vmatprep.subr.bf16.mxu1 %v6948_v4 }
 0x9a1   : > { %6170 = vmatpush3.bf16.xpose.msra.mxu1 %v1949_v44 }
 0x9a2   : > { %6171 = vmatprep.subr.bf16.mxu1 %v6948_v4 }
 0x9a9   : > { %6172 = vmatpush3.bf16.xpose.msra.mxu1 %v1952_v48 }
 0x9aa   : > { %6173 = vmatprep.subr.bf16.mxu1 %v6948_v4 }
 0x9b1   : > { %6174 = vmatpush3.bf16.xpose.msra.mxu1 %v1955_v50 }
 0x9b2   : > { %6175 = vmatprep.subr.bf16.mxu1 %v6948_v4 }
 0x9b9   : > { %6176 = vmatpush3.bf16.xpose.msra.mxu1 %v1958_v52 }
 0x9ba   : > { %6221 = vmatprep.subr.bf16.mxu1 %v6948_v4 }
 0x9f2   : > { %v1908_v53 = vpop.permute.xlu1 %1907 }
 0x9f3   : > { %6178 = vmatmul.mubr.msk.bf16.vlgmr.msra.gmra.mrb[36].mxu1 %vm808_vm1, %v1908_v53 }
 0x9f4   : > { %6237 = vmatprep.mubr.msk.bf16.mxu1 %vm6949_vm0, %v6948_v4 }
 0xa53   : > { %v1847_v55 = vpop.f32.mrb[32].mxu1 }
 0xa54   : > { %v1853_v58 = vmul.f32 0.17677669, %v1847_v55  ;;  %v6139_v59 = vpop.f32.mrb[33].mxu1 }
 0xa55   : > { %v1850_v60 = vpop.f32.mrb[34].mxu1 }
 0xa56   : > { %v6140_v61 = vpop.f32.mrb[35].mxu1  ;;  %v1854_v62 = vadd.f32 %v1853_v58, %v7529_v54 }
 0xa58   : > { %1855 = vmax.xlane.f32.xlu0 %v1854_v62 }
 0xac6   : > { %v1994_v63 = vpop.f32.mrb[36].mxu1 }
 0xac7   : > { %v2000_v0 = vmul.f32 0.17677669, %v1994_v63  ;;  %v6179_v1 = vpop.f32.mrb[37].mxu1 }
 0xac8   : > { %v1997_v3 = vpop.f32.mrb[38].mxu1 }
 0xac9   : > { %v6180_v5 = vpop.f32.mrb[39].mxu1  ;;  %v2001_v7 = vadd.f32 %v2000_v0, %v7529_v54 }
 0xacb   : > { %2002 = vmax.xlane.f32.xlu1 %v2001_v7 }
 0xadc   : > { %2024 = vrot.lane.b32.xlu1 %v7395_v20, %s8657_s16 }
 0xae5   : > { %v1856_v10 = vpop.xlane.xlu0 %1855 }
 0xae6   : > { %v1857_v11 = vsub.f32 %v1854_v62, %v1856_v10 }
 0xae8   : > { %v1858_v13 = vmul.f32 1.442695, %v1857_v11 }
 0xaea   : > { %6869 = vpow2.f32 %v1858_v13 }
 0xaf4   : > { %v6870_v15 = vpop.eup %6869 }
 0xaf5   : > { %1860 = vadd.xlane.f32.xlu0 %v6870_v15 }
 0xb0b   : > { %2022 = vrot.lane.b32.xlu0 %v7387_v14, %s8657_s16 }
 0xb0f   : > { %2026 = vrot.lane.b32.xlu0 %v7403_v27, %s8657_s16 }
 0xb13   : > { %2028 = vrot.lane.b32.xlu0 %v7411_v37, %s8657_s16 }
 0xb17   : > { %2030 = vrot.lane.b32.xlu0 %v7428_v46, %s8657_s16 }
 0xb1b   : > { %2032 = vrot.lane.b32.xlu0 %v7445_v57, %s8657_s16 }
 0xb1f   : > { %2034 = vrot.lane.b32.xlu0 %v7475_v8, %s8657_s16 }
 0xb23   : > { %2036 = vrot.lane.b32.xlu0 %v7486_v19, %s8657_s16 }
 0xb27   : > { %2088 = vrot.lane.b32.xlu0 %v7385_v12, %s8659_s22 }
 0xb2b   : > { %2090 = vrot.lane.b32.xlu0 %v7393_v18, %s8659_s22 }
 0xb2f   : > { %2092 = vrot.lane.b32.xlu0 %v7401_v25, %s8659_s22 }
 0xb33   : > { %2096 = vrot.lane.b32.xlu0 %v7425_v41, %s8659_s22 }
 0xb37   : > { %2098 = vrot.lane.b32.xlu0 %v7441_v36, %s8659_s22 }
 0xb3b   : > { %2100 = vrot.lane.b32.xlu0 %v7473_v6, %s8659_s22 }
 0xb3f   : > { %2102 = vrot.lane.b32.xlu0 %v7484_v16, %s8659_s22 }
 0xb58   : > { %v2003_v17 = vpop.xlane.xlu1 %2002 }
 0xb59   : > { %v2004_v21 = vsub.f32 %v2001_v7, %v2003_v17 }
 0xb5b   : > { %v2005_v22 = vmul.f32 1.442695, %v2004_v21 }
 0xb5c   : > { %v2025_v34 = vpop.permute.xlu1 %2024 }
 0xb5d   : > { %6871 = vpow2.f32 %v2005_v22 }
 0xb67   : > { %v6872_v24 = vpop.eup %6871 }
 0xb68   : > { %2007 = vadd.xlane.f32.xlu1 %v6872_v24 }
 0xb79   : > { %2094 = vrot.lane.b32.xlu1 %v7409_v35, %s8659_s22 }
 0xb7d   : > { %2086 = vrot.lane.b32.xlu1 %v7495_v26, %s8659_s22 }
 0xb81   : > { %2185 = vrot.lane.b32.xlu1 %v7387_v14, %s8659_s22 }
 0xb82   : > { %v1861_v28 = vpop.xlane.xlu0 %1860 }
 0xb83   : > { %6873 = vrcp.f32 %v1861_v28 }
 0xb85   : > { %2187 = vrot.lane.b32.xlu1 %v7395_v20, %s8659_s22 }
 0xb86   : > { %v2023_v29 = vpop.permute.xlu0 %2022 }
 0xb89   : > { %2191 = vrot.lane.b32.xlu1 %v7411_v37, %s8659_s22 }
 0xb8a   : > { %v2027_v32 = vpop.permute.xlu0 %2026 }
 0xb8d   : > { %v6874_v30 = vpop.eup %6873  ;;  %2199 = vrot.lane.b32.xlu1 %v7486_v19, %s8659_s22 }
 0xb8e   : > { %v1863_v31 = vmul.f32 %v6874_v30, %v6870_v15  ;;  %v2029_v9 = vpop.permute.xlu0 %2028 }
 0xb90   : > { %1864 = vst [vmem:[%s7577_s18] sm:$0xff] %v1863_v31  ;;  %v1865_v33 = vpack.c.bf16 %v1863_v31, %v1863_v31 }
 0xb92   : > { %6158 = vmatmul.mubr.bf16.vlgmr.msra.gmra.mrb[48].mxu0 %v1865_v33  ;;  %v2031_v23 = vpop.permute.xlu0 %2030 }
 0xb93   : > { %6182 = vmatpush3.bf16.msra.mxu0 %v2023_v29  ;;  %6197 = vmatprep.mubr.msk.bf16.mxu0 %vm6949_vm0, %v6948_v4 }
 0xb94   : > { %6183 = vmatprep.subr.bf16.mxu0 %v6948_v4 }
 0xb96   : > { %v2033_v39 = vpop.permute.xlu0 %2032 }
 0xb97   : > { %6184 = vmatpush3.bf16.msra.mxu0 %v2025_v34 }
 0xb98   : > { %6185 = vmatprep.subr.bf16.mxu0 %v6948_v4 }
 0xb9a   : > { %v2035_v42 = vpop.permute.xlu0 %2034 }
 0xb9b   : > { %6186 = vmatpush3.bf16.msra.mxu0 %v2027_v32 }
 0xb9c   : > { %6187 = vmatprep.subr.bf16.mxu0 %v6948_v4 }
 0xb9e   : > { %v2037_v44 = vpop.permute.xlu0 %2036 }
 0xb9f   : > { %6188 = vmatpush3.bf16.msra.mxu0 %v2029_v9 }
 0xba0   : > { %6189 = vmatprep.subr.bf16.mxu0 %v6948_v4 }
 0xba2   : > { %v2089_v53 = vpop.permute.xlu0 %2088 }
 0xba3   : > { %6190 = vmatpush3.bf16.msra.mxu0 %v2031_v23  ;;  %v2108_v58 = vsel %vm808_vm1, %v2089_v53, 0 }
 0xba4   : > { %6191 = vmatprep.subr.bf16.mxu0 %v6948_v4 }
 0xba6   : > { %v2091_v60 = vpop.permute.xlu0 %2090 }
 0xba7   : > { %6192 = vmatpush3.bf16.msra.mxu0 %v2033_v39  ;;  %v2111_v61 = vsel %vm808_vm1, %v2091_v60, 0 }
 0xba8   : > { %6193 = vmatprep.subr.bf16.mxu0 %v6948_v4 }
 0xbaa   : > { %v2093_v62 = vpop.permute.xlu0 %2092 }
 0xbab   : > { %6194 = vmatpush3.bf16.msra.mxu0 %v2035_v42  ;;  %v2114_v63 = vsel %vm808_vm1, %v2093_v62, 0 }
 0xbac   : > { %6195 = vmatprep.subr.bf16.mxu0 %v6948_v4 }
 0xbae   : > { %v2097_v1 = vpop.permute.xlu0 %2096 }
 0xbaf   : > { %6196 = vmatpush3.bf16.msra.mxu0 %v2037_v44  ;;  %v2120_v3 = vsel %vm808_vm1, %v2097_v1, 0 }
 0xbb0   : > { %6201 = vmatprep.subr.bf16.mxu0 %v6948_v4 }
 0xbb2   : > { %v2099_v5 = vpop.permute.xlu0 %2098 }
 0xbb3   : > { %v2123_v7 = vsel %vm808_vm1, %v2099_v5, 0 }
 0xbb6   : > { %v2101_v10 = vpop.permute.xlu0 %2100 }
 0xbb7   : > { %v2126_v11 = vsel %vm808_vm1, %v2101_v10, 0 }
 0xbba   : > { %v2103_v13 = vpop.permute.xlu0 %2102 }
 0xbbb   : > { %v2129_v15 = vsel %vm808_vm1, %v2103_v13, 0 }
 0xbf5   : > { %v2008_v47 = vpop.xlane.xlu1 %2007 }
 0xbf6   : > { %6875 = vrcp.f32 %v2008_v47 }
 0xbf9   : > { %v2095_v48 = vpop.permute.xlu1 %2094 }
 0xbfa   : > { %v2117_v0 = vsel %vm808_vm1, %v2095_v48, 0 }
 0xbfd   : > { %v2087_v49 = vpop.permute.xlu1 %2086 }
 0xc00   : > { %v6876_v50 = vpop.eup %6875 }
 0xc01   : > { %v2186_v51 = vpop.permute.xlu1 %2185  ;;  %v2010_v52 = vmul.f32 %v6876_v50, %v6872_v24 }
 0xc02   : > { %6222 = vmatpush3.bf16.msra.mxu1 %v2186_v51 }
 0xc03   : > { %6223 = vmatprep.subr.bf16.mxu1 %v6948_v4  ;;  %5410 = vst [vmem:[%s7577_s18 + $0x8] sm:$0xff] %v2010_v52  ;;  %v2013_v55 = vpack.c.bf16 %v2010_v52, %v2010_v52 }
 0xc05   : > { %v2188_v59 = vpop.permute.xlu1 %2187  ;;  %6198 = vmatmul.mubr.bf16.vlgmr.msra.gmra.mrb[52].mxu0 %v2013_v55 }
 0xc06   : > { %6202 = vmatpush3.bf16.xpose.msra.mxu0 %v2108_v58  ;;  %6224 = vmatpush3.bf16.msra.mxu1 %v2188_v59 }
 0xc07   : > { %6203 = vmatprep.subr.bf16.mxu0 %v6948_v4  ;;  %6217 = vmatprep.mubr.msk.bf16.mxu0 %vm6949_vm0, %v6948_v4 }
 0xc08   : > { %6225 = vmatprep.subr.bf16.mxu1 %v6948_v4 }
 0xc0e   : > { %6204 = vmatpush3.bf16.xpose.msra.mxu0 %v2111_v61 }
 0xc0f   : > { %6205 = vmatprep.subr.bf16.mxu0 %v6948_v4 }
 0xc16   : > { %6206 = vmatpush3.bf16.xpose.msra.mxu0 %v2114_v63 }
 0xc17   : > { %6207 = vmatprep.subr.bf16.mxu0 %v6948_v4 }
 0xc1e   : > { %6208 = vmatpush3.bf16.xpose.msra.mxu0 %v2117_v0 }
 0xc1f   : > { %6209 = vmatprep.subr.bf16.mxu0 %v6948_v4 }
 0xc26   : > { %6210 = vmatpush3.bf16.xpose.msra.mxu0 %v2120_v3 }
 0xc27   : > { %6211 = vmatprep.subr.bf16.mxu0 %v6948_v4 }
 0xc2e   : > { %6212 = vmatpush3.bf16.xpose.msra.mxu0 %v2123_v7 }
 0xc2f   : > { %6213 = vmatprep.subr.bf16.mxu0 %v6948_v4 }
 0xc36   : > { %6214 = vmatpush3.bf16.xpose.msra.mxu0 %v2126_v11 }
 0xc37   : > { %6215 = vmatprep.subr.bf16.mxu0 %v6948_v4 }
 0xc3e   : > { %6216 = vmatpush3.bf16.xpose.msra.mxu0 %v2129_v15 }
 0xc3f   : > { %6261 = vmatprep.subr.bf16.mxu0 %v6948_v4 }
 0xc45   : > { %6218 = vmatmul.mubr.msk.bf16.vlgmr.msra.gmra.mrb[56].mxu0 %vm808_vm1, %v2087_v49 }
 0xc46   : > { %6277 = vmatprep.mubr.msk.bf16.mxu0 %vm6949_vm0, %v6948_v4 }
 0xc65   : > { %v7616_v17 = vpop.f32.mrb[48].mxu0 }
 0xc66   : > { %v6159_v21 = vpop.f32.mrb[49].mxu0 }
 0xc67   : > { %v1903_v22 = vpop.f32.mrb[50].mxu0 }
 0xc68   : > { %v6160_v24 = vpop.f32.mrb[51].mxu0 }
 0xcd8   : > { %v7618_v28 = vpop.f32.mrb[52].mxu0 }
 0xcd9   : > { %v6199_v29 = vpop.f32.mrb[53].mxu0 }
 0xcda   : > { %v2083_v30 = vpop.f32.mrb[54].mxu0 }
 0xcdb   : > { %v6200_v31 = vpop.f32.mrb[55].mxu0 }
 0xd18   : > { %v2165_v32 = vpop.f32.mrb[56].mxu0 }
 0xd19   : > { %v2171_v33 = vmul.f32 0.17677669, %v2165_v32  ;;  %v6219_v34 = vpop.f32.mrb[57].mxu0 }
 0xd1a   : > { %v2168_v9 = vpop.f32.mrb[58].mxu0 }
 0xd1b   : > { %v6220_v23 = vpop.f32.mrb[59].mxu0  ;;  %v2172_v39 = vadd.f32 %v2171_v33, %v7529_v54 }
 0xd1d   : > { %2173 = vmax.xlane.f32.xlu0 %v2172_v39 }
 0xd33   : > { %2189 = vrot.lane.b32.xlu0 %v7403_v27, %s8659_s22 }
 0xd37   : > { %2193 = vrot.lane.b32.xlu0 %v7428_v46, %s8659_s22 }
 0xd3b   : > { %2195 = vrot.lane.b32.xlu0 %v7445_v57, %s8659_s22 }
 0xd3f   : > { %2197 = vrot.lane.b32.xlu0 %v7475_v8, %s8659_s22 }
 0xd43   : > { %2251 = vrot.lane.b32.xlu0 %v7385_v12, %s8660_s20 }
 0xd47   : > { %2255 = vrot.lane.b32.xlu0 %v7401_v25, %s8660_s20 }
 0xd4b   : > { %2259 = vrot.lane.b32.xlu0 %v7425_v41, %s8660_s20  ;;  %v2192_v41 = vpop.permute.xlu1 %2191 }
 0xd4f   : > { %2263 = vrot.lane.b32.xlu0 %v7473_v6, %s8660_s20  ;;  %v2200_v47 = vpop.permute.xlu1 %2199 }
 0xd53   : > { %2249 = vrot.lane.b32.xlu0 %v7495_v26, %s8660_s20 }
 0xd57   : > { %2348 = vrot.lane.b32.xlu0 %v7387_v14, %s8660_s20 }
 0xd5b   : > { %2350 = vrot.lane.b32.xlu0 %v7395_v20, %s8660_s20 }
 0xd5f   : > { %2358 = vrot.lane.b32.xlu0 %v7445_v57, %s8660_s20 }
 0xdaa   : > { %v2174_v12 = vpop.xlane.xlu0 %2173 }
 0xdab   : > { %v2175_v25 = vsub.f32 %v2172_v39, %v2174_v12 }
 0xdad   : > { %v2176_v42 = vmul.f32 1.442695, %v2175_v25 }
 0xdae   : > { %v2190_v44 = vpop.permute.xlu0 %2189 }
 0xdaf   : > { %6877 = vpow2.f32 %v2176_v42  ;;  %6226 = vmatpush3.bf16.msra.mxu1 %v2190_v44  ;;  %v6684_v42 = vld [vmem:[%s8637_s8 + $0x8] sm:$0xff]   ;;  %v6685_v44 = vld [vmem:[%s8637_s8 + $0x10] sm:$0xff]  }
 0xdb0   : > { %6227 = vmatprep.subr.bf16.mxu1 %v6948_v4 }
 0xdb2   : > { %v2194_v6 = vpop.permute.xlu0 %2193 }
 0xdb3   : > { %6228 = vmatpush3.bf16.msra.mxu1 %v2192_v41  ;;  %v6686_v41 = vld [vmem:[%s8637_s8 + $0x18] sm:$0xff]  }
 0xdb4   : > { %6229 = vmatprep.subr.bf16.mxu1 %v6948_v4 }
 0xdb6   : > { %v2196_v14 = vpop.permute.xlu0 %2195 }
 0xdb7   : > { %6230 = vmatpush3.bf16.msra.mxu1 %v2194_v6  ;;  %v6687_v6 = vld [vmem:[%s8637_s8 + $0x20] sm:$0xff]  }
 0xdb8   : > { %6231 = vmatprep.subr.bf16.mxu1 %v6948_v4 }
 0xdb9   : > { %v6878_v20 = vpop.eup %6877 }
 0xdba   : > { %2178 = vadd.xlane.f32.xlu1 %v6878_v20  ;;  %v2198_v57 = vpop.permute.xlu0 %2197 }
 0xdbb   : > { %6232 = vmatpush3.bf16.msra.mxu1 %v2196_v14  ;;  %v6688_v14 = vld [vmem:[%s8637_s8 + $0x28] sm:$0xff]  }
 0xdbc   : > { %6233 = vmatprep.subr.bf16.mxu1 %v6948_v4 }
 0xdbe   : > { %v2252_v26 = vpop.permute.xlu0 %2251 }
 0xdbf   : > { %6234 = vmatpush3.bf16.msra.mxu1 %v2198_v57  ;;  %v2271_v59 = vsel %vm808_vm1, %v2252_v26, 0  ;;  %v6690_v57 = vld [vmem:[%s8637_s8 + $0x38] sm:$0xff]  }
 0xdc0   : > { %6235 = vmatprep.subr.bf16.mxu1 %v6948_v4 }
 0xdc2   : > { %v2256_v48 = vpop.permute.xlu0 %2255 }
 0xdc3   : > { %6236 = vmatpush3.bf16.msra.mxu1 %v2200_v47  ;;  %v2277_v60 = vsel %vm808_vm1, %v2256_v48, 0 }
 0xdc4   : > { %6241 = vmatprep.subr.bf16.mxu1 %v6948_v4 }
 0xdc6   : > { %v2260_v49 = vpop.permute.xlu0 %2259 }
 0xdc7   : > { %v2283_v63 = vsel %vm808_vm1, %v2260_v49, 0 }
 0xdca   : > { %v2264_v50 = vpop.permute.xlu0 %2263 }
 0xdcb   : > { %2253 = vrot.lane.b32.xlu1 %v7393_v18, %s8660_s20  ;;  %v2289_v3 = vsel %vm808_vm1, %v2264_v50, 0 }
 0xdce   : > { %v2250_v51 = vpop.permute.xlu0 %2249 }
 0xdcf   : > { %2257 = vrot.lane.b32.xlu1 %v7409_v35, %s8660_s20 }
 0xdd2   : > { %v2349_v52 = vpop.permute.xlu0 %2348 }
 0xdd3   : > { %2261 = vrot.lane.b32.xlu1 %v7441_v36, %s8660_s20  ;;  %6262 = vmatpush3.bf16.msra.mxu0 %v2349_v52 }
 0xdd4   : > { %6263 = vmatprep.subr.bf16.mxu0 %v6948_v4 }
 0xdd6   : > { %v2351_v53 = vpop.permute.xlu0 %2350 }
 0xdd7   : > { %2265 = vrot.lane.b32.xlu1 %v7484_v16, %s8660_s20  ;;  %6264 = vmatpush3.bf16.msra.mxu0 %v2351_v53 }
 0xdd8   : > { %6265 = vmatprep.subr.bf16.mxu0 %v6948_v4 }
 0xe47   : > { %v2179_v55 = vpop.xlane.xlu1 %2178 }
 0xe48   : > { %6879 = vrcp.f32 %v2179_v55 }
 0xe4b   : > { %v2254_v36 = vpop.permute.xlu1 %2253 }
 0xe4c   : > { %v2274_v16 = vsel %vm808_vm1, %v2254_v36, 0 }
 0xe4f   : > { %v2258_v61 = vpop.permute.xlu1 %2257 }
 0xe50   : > { %v2280_v62 = vsel %vm808_vm1, %v2258_v61, 0  ;;  %v6691_v61 = vld [vmem:[%s8638_s9] ss:$8 sps:$4 sm:$0xff]  }
 0xe52   : > { %v6880_v18 = vpop.eup %6879 }
 0xe53   : > { %v2181_v58 = vmul.f32 %v6880_v18, %v6878_v20  ;;  %v2262_v0 = vpop.permute.xlu1 %2261  ;;  %v6689_v20 = vld [vmem:[%s8637_s8 + $0x30] sm:$0xff]  }
 0xe54   : > { %v2286_v1 = vsel %vm808_vm1, %v2262_v0, 0  ;;  %v6697_v0 = vld [vmem:[%s8638_s9 + $0x20] ss:$8 sps:$4 sm:$0xff]  }
 0xe55   : > { %5412 = vst [vmem:[%s7577_s18 + $0x10] sm:$0xff] %v2181_v58  ;;  %v2184_v35 = vpack.c.bf16 %v2181_v58, %v2181_v58 }
 0xe57   : > { %6238 = vmatmul.mubr.bf16.vlgmr.msra.gmra.mrb[40].mxu1 %v2184_v35  ;;  %v2266_v5 = vpop.permute.xlu1 %2265 }
 0xe58   : > { %6242 = vmatpush3.bf16.xpose.msra.mxu1 %v2271_v59  ;;  %6257 = vmatprep.mubr.msk.bf16.mxu1 %vm6949_vm0, %v6948_v4  ;;  %v2292_v7 = vsel %vm808_vm1, %v2266_v5, 0 }
 0xe59   : > { %6243 = vmatprep.subr.bf16.mxu1 %v6948_v4 }
 0xe60   : > { %6244 = vmatpush3.bf16.xpose.msra.mxu1 %v2274_v16 }
 0xe61   : > { %6245 = vmatprep.subr.bf16.mxu1 %v6948_v4 }
 0xe68   : > { %6246 = vmatpush3.bf16.xpose.msra.mxu1 %v2277_v60 }
 0xe69   : > { %6247 = vmatprep.subr.bf16.mxu1 %v6948_v4 }
 0xe70   : > { %6248 = vmatpush3.bf16.xpose.msra.mxu1 %v2280_v62  ;;  %v6696_v62 = vld [vmem:[%s8638_s9 + $0x14] ss:$8 sps:$4 sm:$0xff]  }
 0xe71   : > { %6249 = vmatprep.subr.bf16.mxu1 %v6948_v4 }
 0xe78   : > { %6250 = vmatpush3.bf16.xpose.msra.mxu1 %v2283_v63  ;;  %v6699_v63 = vld [vmem:[%s8638_s9 + $0x24] ss:$8 sps:$4 sm:$0xff]  }
 0xe79   : > { %6251 = vmatprep.subr.bf16.mxu1 %v6948_v4 }
 0xe80   : > { %6252 = vmatpush3.bf16.xpose.msra.mxu1 %v2286_v1 }
 0xe81   : > { %6253 = vmatprep.subr.bf16.mxu1 %v6948_v4 }
 0xe88   : > { %6254 = vmatpush3.bf16.xpose.msra.mxu1 %v2289_v3 }
 0xe89   : > { %6255 = vmatprep.subr.bf16.mxu1 %v6948_v4 }
 0xe90   : > { %6256 = vmatpush3.bf16.xpose.msra.mxu1 %v2292_v7 }
 0xe97   : > { %6258 = vmatmul.mubr.msk.bf16.vlgmr.msra.gmra.mrb[44].mxu1 %vm808_vm1, %v2250_v51 }
 0xe98   : > { %2682 = vmatprep.mubr.bf16.mxu1 %v6947_v2 }
 0xf2a   : > { %v2243_v10 = vpop.f32.mrb[40].mxu1 }
 0xf2b   : > { %v6239_v11 = vpop.f32.mrb[41].mxu1 }
 0xf2c   : > { %v2246_v13 = vpop.f32.mrb[42].mxu1  ;;  %v6700_v11 = vld [vmem:[%s8638_s9 + $0x30] ss:$8 sps:$4 sm:$0xff]  }
 0xf2d   : > { %v6240_v15 = vpop.f32.mrb[43].mxu1  ;;  %v6705_v13 = vld [vmem:[%s8638_s9 + $0x44] ss:$8 sps:$4 sm:$0xff]  }
 0xf2e   : > { %v6703_v15 = vld [vmem:[%s8638_s9 + $0x40] ss:$8 sps:$4 sm:$0xff]  }
 0xf6a   : > { %v2328_v21 = vpop.f32.mrb[44].mxu1 }
 0xf6b   : > { %v2334_v22 = vmul.f32 0.17677669, %v2328_v21  ;;  %v6259_v24 = vpop.f32.mrb[45].mxu1  ;;  %v6708_v21 = vld [vmem:[%s8638_s9 + $0x54] ss:$8 sps:$4 sm:$0xff]  }
 0xf6c   : > { %v2331_v29 = vpop.f32.mrb[46].mxu1  ;;  %v6711_v24 = vld [vmem:[%s8638_s9 + $0x64] ss:$8 sps:$4 sm:$0xff]  }
 0xf6d   : > { %v6260_v30 = vpop.f32.mrb[47].mxu1  ;;  %v2335_v31 = vadd.f32 %v2334_v22, %v7529_v54  ;;  %v6706_v22 = vld [vmem:[%s8638_s9 + $0x50] ss:$8 sps:$4 sm:$0xff]   ;;  %v6709_v29 = vld [vmem:[%s8638_s9 + $0x60] ss:$8 sps:$4 sm:$0xff]  }
 0xf6e   : > { %v6714_v30 = vld [vmem:[%s8638_s9 + $0x74] ss:$8 sps:$4 sm:$0xff]  }
 0xf6f   : > { %2336 = vmax.xlane.f32.xlu1 %v2335_v31 }
 0xf80   : > { %2352 = vrot.lane.b32.xlu1 %v7403_v27, %s8660_s20 }
 0xf84   : > { %2354 = vrot.lane.b32.xlu1 %v7411_v37, %s8660_s20 }
 0xf88   : > { %2356 = vrot.lane.b32.xlu1 %v7428_v46, %s8660_s20 }
 0xf8c   : > { %2360 = vrot.lane.b32.xlu1 %v7475_v8, %s8660_s20  ;;  %v2359_v8 = vpop.permute.xlu0 %2358 }
 0xf90   : > { %2413 = vrot.lane.b32.xlu1 %v7618_v28, %s8660_s20 }
 0xffc   : > { %v2337_v32 = vpop.xlane.xlu1 %2336 }
 0xffd   : > { %v2338_v33 = vsub.f32 %v2335_v31, %v2337_v32  ;;  %v6712_v31 = vld [vmem:[%s8638_s9 + $0x70] ss:$8 sps:$4 sm:$0xff]   ;;  %v6715_v32 = vld [vmem:[%s8639_s10 + $0x40] sm:$0xff]  }
 0xfff   : > { %v2339_v34 = vmul.f32 1.442695, %v2338_v33  ;;  %v6716_v33 = vld [vmem:[%s8639_s10] sm:$0xff]  }
0x1000   : > { %v2353_v54 = vpop.permute.xlu1 %2352 }
0x1001   : > { %6881 = vpow2.f32 %v2339_v34  ;;  %6266 = vmatpush3.bf16.msra.mxu0 %v2353_v54  ;;  %v6717_v34 = vld [vmem:[%s8639_s10 + $0x48] sm:$0xff]  }
0x1002   : > { %6267 = vmatprep.subr.bf16.mxu0 %v6948_v4  ;;  %v6718_v54 = vld [vmem:[%s8639_s10 + $0x8] sm:$0xff]  }
0x1004   : > { %v2355_v27 = vpop.permute.xlu1 %2354 }
0x1005   : > { %6268 = vmatpush3.bf16.msra.mxu0 %v2355_v27  ;;  %v6719_v27 = vld [vmem:[%s8639_s10 + $0x50] sm:$0xff]  }
0x1006   : > { %6269 = vmatprep.subr.bf16.mxu0 %v6948_v4 }
0x1008   : > { %v2357_v37 = vpop.permute.xlu1 %2356 }
0x1009   : > { %6270 = vmatpush3.bf16.msra.mxu0 %v2357_v37  ;;  %v6720_v37 = vld [vmem:[%s8639_s10 + $0x10] sm:$0xff]  }
0x100a   : > { %6271 = vmatprep.subr.bf16.mxu0 %v6948_v4 }
0x100b   : > { %v6882_v46 = vpop.eup %6881 }
0x100c   : > { %2341 = vadd.xlane.f32.xlu0 %v6882_v46  ;;  %v2361_v28 = vpop.permute.xlu1 %2360 }
0x100d   : > { %6272 = vmatpush3.bf16.msra.mxu0 %v2359_v8  ;;  %v6722_v8 = vld [vmem:[%s8639_s10 + $0x18] sm:$0xff]  }
0x100e   : > { %6273 = vmatprep.subr.bf16.mxu0 %v6948_v4 }
0x1010   : > { %v2414_v50 = vpop.permute.xlu1 %2413 }
0x1011   : > { %6274 = vmatpush3.bf16.msra.mxu0 %v2361_v28  ;;  %v2424_v52 = vsel %vm808_vm1, %v7616_v17, %v2414_v50  ;;  %v6693_v17 = vld [vmem:[%s8638_s9 + $0x4] ss:$8 sps:$4 sm:$0xff]   ;;  %v6729_v50 = vld [vmem:[%s8639_s10 + $0x78] sm:$0xff]  }
0x1012   : > { %6275 = vmatprep.subr.bf16.mxu0 %v6948_v4  ;;  %2650 = vmatprep.subr.bf16.mxu1 %v6693_v17  ;;  %v6723_v28 = vld [vmem:[%s8639_s10 + $0x60] sm:$0xff]  }
0x1013   : > { %2651 = vmatpush1.bf16.msra.mxu1 %v6691_v61 }
0x1014   : > { %2652 = vmatprep.subr.bf16.mxu1 %v6696_v62 }
0x1022   : > { %2362 = vrot.lane.b32.xlu0 %v7486_v19, %s8660_s20  ;;  %v6683_v19 = vld [vmem:[%s8637_s8] sm:$0xff]  }
0x1026   : > { %2417 = vrot.lane.b32.xlu0 %v2243_v10, %s8659_s22  ;;  %v6702_v10 = vld [vmem:[%s8638_s9 + $0x34] ss:$8 sps:$4 sm:$0xff]  }
0x1099   : > { %v2342_v9 = vpop.xlane.xlu0 %2341 }
0x109a   : > { %6883 = vrcp.f32 %v2342_v9  ;;  %v6724_v9 = vld [vmem:[%s8639_s10 + $0x20] sm:$0xff]  }
0x109d   : > { %v2363_v23 = vpop.permute.xlu0 %2362 }
0x109e   : > { %6276 = vmatpush3.bf16.msra.mxu0 %v2363_v23  ;;  %v6725_v23 = vld [vmem:[%s8639_s10 + $0x68] sm:$0xff]  }
0x109f   : > { %6281 = vmatprep.subr.bf16.mxu0 %v6948_v4 }
0x10a1   : > { %v2418_v51 = vpop.permute.xlu0 %2417 }
0x10a2   : > { %v2425_v53 = vsel %vm1276_vm4, %v2424_v52, %v2418_v51  ;;  %v6730_v51 = vld [vmem:[%s8639_s10 + $0x38] sm:$0xff]  }
0x10a4   : > { %v6884_v39 = vpop.eup %6883 }
0x10a5   : > { %v2344_v12 = vmul.f32 %v6884_v39, %v6882_v46  ;;  %v6721_v46 = vld [vmem:[%s8639_s10 + $0x58] sm:$0xff]   ;;  %v6726_v39 = vld [vmem:[%s8639_s10 + $0x28] sm:$0xff]  }
0x10a7   : > { %5414 = vst [vmem:[%s7577_s18 + $0x18] sm:$0xff] %v2344_v12  ;;  %v2347_v25 = vpack.c.bf16 %v2344_v12, %v2344_v12  ;;  %v6727_v12 = vld [vmem:[%s8639_s10 + $0x70] sm:$0xff]  }
0x10a9   : > { %6278 = vmatmul.mubr.bf16.vlgmr.msra.gmra.mrb[60].mxu0 %v2347_v25 }
0x10aa   : > { %6297 = vmatprep.mubr.msk.bf16.mxu0 %vm6949_vm0, %v6948_v4  ;;  %6282 = vmatpush3.bf16.msra.mxu0 %v6683_v19 }
0x10ab   : > { %6283 = vmatprep.subr.bf16.mxu0 %v6948_v4 }
0x10ae   : > { %6284 = vmatpush3.bf16.msra.mxu0 %v6684_v42 }
0x10af   : > { %6285 = vmatprep.subr.bf16.mxu0 %v6948_v4 }
0x10b2   : > { %6286 = vmatpush3.bf16.msra.mxu0 %v6685_v44  ;;  %v2545_v44 = vsub.s32 2, %v7415_v38 }
0x10b3   : > { %6287 = vmatprep.subr.bf16.mxu0 %v6948_v4 }
0x10b6   : > { %6288 = vmatpush3.bf16.msra.mxu0 %v6686_v41  ;;  %v2550_v41 = vsub.s32 3, %v7415_v38 }
0x10b7   : > { %6289 = vmatprep.subr.bf16.mxu0 %v6948_v4 }
0x10ba   : > { %6290 = vmatpush3.bf16.msra.mxu0 %v6687_v6  ;;  %v2546_v6 = vrot.slane %v7423_v43, %v2545_v44 }
0x10bb   : > { %6291 = vmatprep.subr.bf16.mxu0 %v6948_v4 }
0x10be   : > { %6292 = vmatpush3.bf16.msra.mxu0 %v6688_v14 }
0x10bf   : > { %6293 = vmatprep.subr.bf16.mxu0 %v6948_v4 }
0x10c2   : > { %6294 = vmatpush3.bf16.msra.mxu0 %v6689_v20 }
0x10c3   : > { %6295 = vmatprep.subr.bf16.mxu0 %v6948_v4 }
0x10c6   : > { %6296 = vmatpush3.bf16.msra.mxu0 %v6690_v57  ;;  %v2551_v57 = vrot.slane %v7423_v43, %v2550_v41 }
0x10c7   : > { %5845 = vmatprep.subr.bf16.mxu0 %v6715_v32  ;;  %v6749_v32 = vld [vmem:[%s8633_s4 + $0x124] ss:$12 sps:$4 sm:$0xff]  }
0x117c   : > { %v2406_v26 = vpop.f32.mrb[60].mxu0 }
0x117d   : > { %2421 = vrot.lane.b32.xlu1 %v2406_v26, %s8657_s16  ;;  %v6279_v47 = vpop.f32.mrb[61].mxu0 }
0x117e   : > { %v2409_v48 = vpop.f32.mrb[62].mxu0 }
0x117f   : > { %v6280_v49 = vpop.f32.mrb[63].mxu0 }
0x1180   : > { %v6728_v49 = vld [vmem:[%s8639_s10 + $0x30] sm:$0xff]  }
0x11ef   : > { %v2422_v55 = vpop.permute.xlu1 %2421 }
0x11f0   : > { %v2426_v18 = vsel %vm1278_vm5, %v2425_v53, %v2422_v55 }
0x11f1   : > { %v2427_v58 = vpack.c.bf16 %v2426_v18, %v2426_v18 }
0x11f3   : > { %6298 = vmatmul.mubr.bf16.vlgmr.msra.gmra.mrb[64].mxu0 %v2427_v58 }
0x11f4   : > { %5846 = vmatpush3.bf16.msra.mxu0 %v6716_v33  ;;  %v6750_v33 = vld [vmem:[%s8633_s4 + $0x128] ss:$12 sps:$4 sm:$0xff]  }
0x11f5   : > { %5847 = vmatprep.subr.bf16.mxu0 %v6717_v34  ;;  %v6753_v34 = vld [vmem:[%s8633_s4 + $0x13c] ss:$12 sps:$4 sm:$0xff]  }
0x11f8   : > { %5848 = vmatpush3.bf16.msra.mxu0 %v6718_v54  ;;  %v6751_v54 = vld [vmem:[%s8633_s4 + $0x138] ss:$12 sps:$4 sm:$0xff]  }
0x11f9   : > { %5849 = vmatprep.subr.bf16.mxu0 %v6719_v27  ;;  %v6754_v27 = vld [vmem:[%s8633_s4 + $0x140] ss:$12 sps:$4 sm:$0xff]  }
0x11fc   : > { %5850 = vmatpush3.bf16.msra.mxu0 %v6720_v37  ;;  %v6757_v37 = vld [vmem:[%s8633_s4 + $0x154] ss:$12 sps:$4 sm:$0xff]  }
0x11fd   : > { %5851 = vmatprep.subr.bf16.mxu0 %v6721_v46  ;;  %v6755_v46 = vld [vmem:[%s8633_s4 + $0x150] ss:$12 sps:$4 sm:$0xff]  }
0x1200   : > { %5852 = vmatpush3.bf16.msra.mxu0 %v6722_v8  ;;  %v6758_v8 = vld [vmem:[%s8633_s4 + $0x158] ss:$12 sps:$4 sm:$0xff]  }
0x1201   : > { %5853 = vmatprep.subr.bf16.mxu0 %v6723_v28  ;;  %v6761_v28 = vld [vmem:[%s8633_s4 + $0x16c] ss:$12 sps:$4 sm:$0xff]  }
0x1204   : > { %5854 = vmatpush3.bf16.msra.mxu0 %v6724_v9  ;;  %v6759_v9 = vld [vmem:[%s8633_s4 + $0x168] ss:$12 sps:$4 sm:$0xff]  }
0x1205   : > { %5855 = vmatprep.subr.bf16.mxu0 %v6725_v23  ;;  %v6762_v23 = vld [vmem:[%s8633_s4 + $0x170] ss:$12 sps:$4 sm:$0xff]  }
0x1208   : > { %5856 = vmatpush3.bf16.msra.mxu0 %v6726_v39 }
0x1209   : > { %5857 = vmatprep.subr.bf16.mxu0 %v6727_v12 }
0x120c   : > { %5858 = vmatpush3.bf16.msra.mxu0 %v6728_v49 }
0x120d   : > { %5859 = vmatprep.subr.bf16.mxu0 %v6729_v50 }
0x1210   : > { %5860 = vmatpush3.bf16.msra.mxu0 %v6730_v51 }
0x1211   : > { %6301 = vmatprep.subr.bf16.mxu0 %v6948_v4 }
0x12c6   : > { %v2526_v35 = vpop.f32.mrb[64].mxu0 }
0x12c7   : > { %v2527_v59 = vadd.f32 %v2526_v35, %v7443_v56  ;;  %v6299_v36 = vpop.f32.mrb[65].mxu0  ;;  %v6694_v56 = vld [vmem:[%s8638_s9 + $0x10] ss:$8 sps:$4 sm:$0xff]  }
0x12c8   : > { %v2529_v16 = vpop.f32.mrb[66].mxu0  ;;  %2653 = vmatpush1.bf16.msra.mxu1 %v6694_v56  ;;  %v6731_v56 = vld [vmem:[%s8633_s4 + $0xc0] ss:$12 sps:$4 sm:$0xff]  }
0x12c9   : > { %2532 = vadd.xlane.f32.xlu0 %v2527_v59  ;;  %v6300_v60 = vpop.f32.mrb[67].mxu0  ;;  %2654 = vmatprep.subr.bf16.mxu1 %v6699_v63  ;;  %v6733_v63 = vld [vmem:[%s8633_s4 + $0xc4] ss:$12 sps:$4 sm:$0xff]  }
0x12cc   : > { %2655 = vmatpush1.bf16.msra.mxu1 %v6697_v0  ;;  %v6734_v0 = vld [vmem:[%s8633_s4 + $0xc8] ss:$12 sps:$4 sm:$0xff]  }
0x12cd   : > { %2656 = vmatprep.subr.bf16.mxu1 %v6702_v10  ;;  %v6739_v10 = vld [vmem:[%s8633_s4 + $0xf0] ss:$12 sps:$4 sm:$0xff]  }
0x12d0   : > { %2657 = vmatpush1.bf16.msra.mxu1 %v6700_v11 }
0x12d1   : > { %2658 = vmatprep.subr.bf16.mxu1 %v6705_v13 }
0x12d4   : > { %2659 = vmatpush1.bf16.msra.mxu1 %v6703_v15 }
0x12d5   : > { %2660 = vmatprep.subr.bf16.mxu1 %v6708_v21 }
0x12d8   : > { %2661 = vmatpush1.bf16.msra.mxu1 %v6706_v22  ;;  %v6742_v22 = vld [vmem:[%s8633_s4 + $0xf8] ss:$12 sps:$4 sm:$0xff]  }
0x12d9   : > { %2662 = vmatprep.subr.bf16.mxu1 %v6711_v24  ;;  %v6745_v24 = vld [vmem:[%s8633_s4 + $0x10c] ss:$12 sps:$4 sm:$0xff]  }
0x12dc   : > { %2663 = vmatpush1.bf16.msra.mxu1 %v6709_v29  ;;  %v6743_v29 = vld [vmem:[%s8633_s4 + $0x108] ss:$12 sps:$4 sm:$0xff]  }
0x12dd   : > { %2664 = vmatprep.subr.bf16.mxu1 %v6714_v30  ;;  %v6746_v30 = vld [vmem:[%s8633_s4 + $0x110] ss:$12 sps:$4 sm:$0xff]  }
0x12e0   : > { %2665 = vmatpush1.bf16.msra.mxu1 %v6712_v31  ;;  %v6747_v31 = vld [vmem:[%s8633_s4 + $0x120] ss:$12 sps:$4 sm:$0xff]  }
0x12e1   : > { %3048 = vmatprep.subr.bf16.mxu1 %v6733_v63 }
0x1356   : > { %v2533_v1 = vpop.xlane.xlu0 %2532 }
0x1357   : > { %v2534_v3 = vmul.f32 0.0078125, %v2533_v1  ;;  %v6737_v1 = vld [vmem:[%s8633_s4 + $0xdc] ss:$12 sps:$4 sm:$0xff]  }
0x1359   : > { %v2535_v5 = vsub.f32 %v2527_v59, %v2534_v3  ;;  %v6738_v3 = vld [vmem:[%s8633_s4 + $0xe0] ss:$12 sps:$4 sm:$0xff]  }
0x135b   : > { %v2536_v7 = vmul.f32 %v2535_v5, %v2535_v5 }
0x135d   : > { %2537 = vadd.xlane.f32.xlu1 %v2536_v7  ;;  %v6741_v7 = vld [vmem:[%s8633_s4 + $0xf4] ss:$12 sps:$4 sm:$0xff]  }
0x13ea   : > { %v2538_v25 = vpop.xlane.xlu1 %2537 }
0x13eb   : > { %v2539_v19 = vmul.f32 0.0078125, %v2538_v25 }
0x13ed   : > { %v2540_v42 = vadd.f32 1e-05, %v2539_v19  ;;  %v2876_v19 = vsub.s32 4, %v7415_v38 }
0x13ef   : > { %6885 = vrsqrt.f32 %v2540_v42  ;;  %v2881_v42 = vsub.s32 5, %v7415_v38 }
0x13f9   : > { %v6886_v14 = vpop.eup %6885 }
0x13fa   : > { %v2542_v20 = vmul.f32 %v6886_v14, %v2535_v5  ;;  %v6735_v5 = vld [vmem:[%s8633_s4 + $0xd8] ss:$12 sps:$4 sm:$0xff]  }
0x13fc   : > { %v2547_v26 = vmul.f32 %v2546_v6, %v2542_v20  ;;  %v6927_v6 = vld [vmem:[%s8640_s11] sm:$0x3f] }
0x13fd   : > { %v2877_v14 = vrot.slane %v6927_v6, %v2876_v19 }
0x13fe   : > { %v2552_v47 = vadd.f32 %v2551_v57, %v2547_v26  ;;  %v2882_v26 = vrot.slane %v6927_v6, %v2881_v42 }
0x1400   : > { %v2553_v48 = vpack.c.bf16 %v2552_v47, %v2552_v47 }
0x1402   : > { %2683 = vmatmul.mubr.bf16.vlgmr.msra.gmra.mrb[48].mxu1 %v2553_v48 }
0x1403   : > { %3080 = vmatprep.mubr.bf16.mxu1 %v6947_v2  ;;  %3049 = vmatpush1.bf16.msra.mxu1 %v6731_v56 }
0x1404   : > { %3050 = vmatprep.subr.bf16.mxu1 %v6737_v1 }
0x1407   : > { %3051 = vmatpush1.bf16.msra.mxu1 %v6735_v5 }
0x1408   : > { %3052 = vmatprep.subr.bf16.mxu1 %v6741_v7 }
0x140b   : > { %3053 = vmatpush1.bf16.msra.mxu1 %v6739_v10 }
0x140c   : > { %3054 = vmatprep.subr.bf16.mxu1 %v6745_v24 }
0x140f   : > { %3055 = vmatpush1.bf16.msra.mxu1 %v6743_v29 }
0x1410   : > { %3056 = vmatprep.subr.bf16.mxu1 %v6749_v32 }
0x1413   : > { %3057 = vmatpush1.bf16.msra.mxu1 %v6747_v31 }
0x1414   : > { %3058 = vmatprep.subr.bf16.mxu1 %v6753_v34 }
0x1417   : > { %3059 = vmatpush1.bf16.msra.mxu1 %v6751_v54 }
0x1418   : > { %3060 = vmatprep.subr.bf16.mxu1 %v6757_v37 }
0x141b   : > { %3061 = vmatpush1.bf16.msra.mxu1 %v6755_v46 }
0x141c   : > { %3062 = vmatprep.subr.bf16.mxu1 %v6761_v28 }
0x141f   : > { %3063 = vmatpush1.bf16.msra.mxu1 %v6759_v9 }
0x1420   : > { %6321 = vmatprep.subr.bf16.mxu1 %v6948_v4 }
0x14d5   : > { %v2684_v43 = vpop.f32.mrb[48].mxu1 }
0x14d6   : > { %v2691_v52 = vmax.f32 %v2684_v43, 0.0  ;;  %v2686_v53 = vpop.f32.mrb[49].mxu1 }
0x14d7   : > { %v2692_v55 = vmax.f32 %v2686_v53, 0.0  ;;  %v2688_v18 = vpop.f32.mrb[50].mxu1 }
0x14d8   : > { %v2689_v58 = vpop.f32.mrb[51].mxu1  ;;  %v2693_v59 = vpack.c.bf16 %v2691_v52, %v2691_v52 }
0x14d9   : > { %v2694_v35 = vpack.c.bf16 %v2692_v55, %v2692_v55 }
0x14db   : > { %2855 = vmatprep.mubr.bf16.mxu0 %v2694_v35 }
0x14dc   : > { %2856 = vmatmul.mubr.bf16.vlgmr.msra.gmra.mrb[68].mxu0 %v2693_v59 }
0x14dd   : > { %6317 = vmatprep.mubr.msk.bf16.mxu0 %vm6949_vm0, %v6948_v4  ;;  %6302 = vmatpush3.bf16.msra.mxu0 %v6734_v0  ;;  %v7958_v0 = vld [vmem:[%s7166_s23] sm:$0xff]  ;;  %s531_s23 = scalar_lea.vmem %s8641_s12, %s7071_s21 }
0x14de   : > { %6303 = vmatprep.subr.bf16.mxu0 %v6948_v4 }
0x14e1   : > { %6304 = vmatpush3.bf16.msra.mxu0 %v6738_v3 }
0x14e2   : > { %6305 = vmatprep.subr.bf16.mxu0 %v6948_v4 }
0x14e5   : > { %6306 = vmatpush3.bf16.msra.mxu0 %v6742_v22 }
0x14e6   : > { %6307 = vmatprep.subr.bf16.mxu0 %v6948_v4 }
0x14e9   : > { %6308 = vmatpush3.bf16.msra.mxu0 %v6746_v30 }
0x14ea   : > { %6309 = vmatprep.subr.bf16.mxu0 %v6948_v4 }
0x14ed   : > { %6310 = vmatpush3.bf16.msra.mxu0 %v6750_v33 }
0x14ee   : > { %6311 = vmatprep.subr.bf16.mxu0 %v6948_v4 }
0x14f1   : > { %6312 = vmatpush3.bf16.msra.mxu0 %v6754_v27 }
0x14f2   : > { %6313 = vmatprep.subr.bf16.mxu0 %v6948_v4 }
0x14f5   : > { %6314 = vmatpush3.bf16.msra.mxu0 %v6758_v8 }
0x14f6   : > { %6315 = vmatprep.subr.bf16.mxu0 %v6948_v4 }
0x14f9   : > { %6316 = vmatpush3.bf16.msra.mxu0 %v6762_v23 }
0x14fa   : > { %6345 = vmatprep.subr.bf16.mxu0 %v6948_v4 }
0x15af   : > { %v5861_v36 = vpop.f32.mrb[68].mxu0 }
0x15b0   : > { %v5862_v16 = vpop.f32.mrb[69].mxu0 }
0x15b1   : > { %v5863_v60 = vadd.f32 %v5862_v16, %v5861_v36  ;;  %v5864_v61 = vpop.f32.mrb[70].mxu0 }
0x15b2   : > { %v5865_v17 = vpop.f32.mrb[71].mxu0 }
0x15b3   : > { %v2858_v62 = vadd.f32 %v5863_v60, %v2552_v47 }
0x15b5   : > { %2863 = vadd.xlane.f32.xlu0 %v2858_v62 }
0x1642   : > { %v2864_v11 = vpop.xlane.xlu0 %2863 }
0x1643   : > { %v2865_v13 = vmul.f32 0.0078125, %v2864_v11 }
0x1645   : > { %v2866_v15 = vsub.f32 %v2858_v62, %v2865_v13 }
0x1647   : > { %v2867_v21 = vmul.f32 %v2866_v15, %v2866_v15 }
0x1649   : > { %2868 = vadd.xlane.f32.xlu0 %v2867_v21 }
0x16d6   : > { %v2869_v39 = vpop.xlane.xlu0 %2868 }
0x16d7   : > { %v2870_v12 = vmul.f32 0.0078125, %v2869_v39 }
0x16d9   : > { %v2871_v25 = vadd.f32 1e-05, %v2870_v12 }
0x16db   : > { %6887 = vrsqrt.f32 %v2871_v25 }
0x16e5   : > { %v6888_v20 = vpop.eup %6887 }
0x16e6   : > { %v2873_v57 = vmul.f32 %v6888_v20, %v2866_v15 }
0x16e8   : > { %v2878_v47 = vmul.f32 %v2877_v14, %v2873_v57 }
0x16ea   : > { %v7939_v48 = vadd.f32 %v2882_v26, %v2878_v47 }
0x16ec   : > { %v2886_v49 = vpack.c.bf16 %v7939_v48, %v7939_v48 }
0x16ee   : > { %3081 = vmatmul.mubr.bf16.vlgmr.msra.gmra.mrb[52].mxu1 %v2886_v49  ;;  %6318 = vmatmul.mubr.bf16.vlgmr.msra.gmra.mrb[72].mxu0 %v2886_v49 }
0x16ef   : > { %6323 = vmatprep.mubr.msk.bf16.mxu1 %vm6949_vm0, %v6948_v4  ;;  %6347 = vmatprep.mubr.msk.bf16.mxu0 %vm6949_vm0, %v6948_v4 }
0x17c1   : > { %v3082_v50 = vpop.f32.mrb[52].mxu1  ;;  %v3123_v51 = vpop.f32.mrb[72].mxu0 }
0x17c2   : > { %v3084_v43 = vpop.f32.mrb[53].mxu1  ;;  %v6319_v52 = vpop.f32.mrb[73].mxu0  ;;  %v7949_v36 = vpack.c.bf16 %v3123_v51, %v3123_v51  ;;  %v3129_v16 = vpack.c.bf16 %v3082_v50, %v3082_v50 }
0x17c3   : > { %v3130_v53 = vpack.c.bf16 %v3084_v43, %v3084_v43  ;;  %v3086_v55 = vpop.f32.mrb[54].mxu1  ;;  %v3126_v18 = vpop.f32.mrb[74].mxu0 }
0x17c4   : > { %v3087_v58 = vpop.f32.mrb[55].mxu1  ;;  %v6320_v35 = vpop.f32.mrb[75].mxu0  ;;  %v3198_v60 = vsel %vm874_vm2, %v7949_v36, 0 }
0x17c5   : > { %v3136_v59 = vsel %vm808_vm1, %v3130_v53, 0 }
0x17c6   : > { %6322 = vmatpush3.bf16.xpose.msra.mxu1 %v3136_v59 }
0x17c7   : > { %6327 = vmatprep.subr.bf16.mxu1 %v6948_v4 }
0x17cd   : > { %6324 = vmatmul.mubr.msk.bf16.vlgmr.msra.gmra.mrb[56].mxu1 %vm808_vm1, %v3129_v16 }
0x17ce   : > { %6328 = vmatpush3.bf16.msra.mxu1 %v3198_v60  ;;  %6329 = vmatprep.mubr.msk.bf16.mxu1 %vm6949_vm0, %v6948_v4 }
0x17cf   : > { %6333 = vmatprep.subr.bf16.mxu1 %v6948_v4 }
0x18a0   : > { %v3172_v61 = vpop.f32.mrb[56].mxu1 }
0x18a1   : > { %v3178_v17 = vmul.f32 0.17677669, %v3172_v61  ;;  %v6325_v62 = vpop.f32.mrb[57].mxu1 }
0x18a2   : > { %v3175_v56 = vpop.f32.mrb[58].mxu1 }
0x18a3   : > { %v6326_v63 = vpop.f32.mrb[59].mxu1  ;;  %v3179_v1 = vadd.f32 %v7958_v0, %v3178_v17 }
0x18a5   : > { %v3180_v3 = vsel %vm857_vm3, %v3179_v1, -inf }
0x18a6   : > { %3181 = vmax.xlane.f32.xlu0 %v3180_v3 }
0x18bc   : > { %3244 = vrot.lane.b32.xlu0 %v3130_v53, %s8657_s16 }
0x18c0   : > { %3473 = vrot.lane.b32.xlu0 %v3130_v53, %s8660_s20 }
0x1933   : > { %v3182_v5 = vpop.xlane.xlu0 %3181 }
0x1934   : > { %v3183_v7 = vsub.f32 %v3179_v1, %v3182_v5 }
0x1936   : > { %v3184_v10 = vmul.f32 1.442695, %v3183_v7 }
0x1937   : > { %v3245_v22 = vpop.permute.xlu0 %3244 }
0x1938   : > { %6889 = vpow2.f32 %v3184_v10  ;;  %v3250_v34 = vsel %vm808_vm1, %v3245_v22, 0 }
0x193b   : > { %v3474_v32 = vpop.permute.xlu0 %3473 }
0x193c   : > { %v3479_v27 = vsel %vm808_vm1, %v3474_v32, 0 }
0x1942   : > { %v6890_v11 = vpop.eup %6889 }
0x1943   : > { %v3186_v13 = vsel %vm857_vm3, %v6890_v11, 0.0 }
0x1944   : > { %3187 = vadd.xlane.f32.xlu1 %v3186_v13 }
0x1955   : > { %3241 = vrot.lane.b32.xlu1 %v3129_v16, %s8657_s16 }
0x1959   : > { %3359 = vrot.lane.b32.xlu1 %v3130_v53, %s8659_s22 }
0x195d   : > { %3357 = vrot.lane.b32.xlu1 %v3129_v16, %s8659_s22 }
0x1961   : > { %3471 = vrot.lane.b32.xlu1 %v3129_v16, %s8660_s20 }
0x19d1   : > { %v3188_v15 = vpop.xlane.xlu1 %3187 }
0x19d2   : > { %6891 = vrcp.f32 %v3188_v15 }
0x19d5   : > { %v3242_v21 = vpop.permute.xlu1 %3241 }
0x19d9   : > { %v3360_v24 = vpop.permute.xlu1 %3359 }
0x19da   : > { %v3365_v29 = vsel %vm808_vm1, %v3360_v24, 0 }
0x19db   : > { %6346 = vmatpush3.bf16.xpose.msra.mxu0 %v3365_v29 }
0x19dc   : > { %v6892_v30 = vpop.eup %6891  ;;  %6357 = vmatprep.subr.bf16.mxu0 %v6948_v4 }
0x19dd   : > { %v3190_v31 = vmul.f32 %v6892_v30, %v6890_v11  ;;  %v3358_v54 = vpop.permute.xlu1 %3357 }
0x19df   : > { %5513 = vst.msk [vmem:[%s7181_s27 + $0x20] sm:$0xff] %vm857_vm3, %v3190_v31  ;;  %v3193_v33 = vpack.c.bf16 %v3190_v31, %v3190_v31 }
0x19e1   : > { %6330 = vmatmul.mubr.msk.bf16.vlgmr.msra.gmra.mrb[60].mxu1 %vm857_vm3, %v3193_v33  ;;  %v3472_v37 = vpop.permute.xlu1 %3471 }
0x19e2   : > { %6334 = vmatpush3.bf16.xpose.msra.mxu1 %v3250_v34  ;;  %6348 = vmatmul.mubr.msk.bf16.vlgmr.msra.gmra.mrb[76].mxu0 %vm808_vm1, %v3358_v54 }
0x19e3   : > { %6358 = vmatpush3.bf16.xpose.msra.mxu0 %v3479_v27  ;;  %6335 = vmatprep.mubr.msk.bf16.mxu1 %vm6949_vm0, %v6948_v4 }
0x19e4   : > { %6359 = vmatprep.mubr.msk.bf16.mxu0 %vm6949_vm0, %v6948_v4  ;;  %6339 = vmatprep.subr.bf16.mxu1 %v6948_v4 }
0x19e5   : > { %6369 = vmatprep.subr.bf16.mxu0 %v6948_v4 }
0x19e9   : > { %6336 = vmatmul.mubr.msk.bf16.vlgmr.msra.gmra.mrb[64].mxu1 %vm808_vm1, %v3242_v21 }
0x19ea   : > { %6360 = vmatmul.mubr.msk.bf16.vlgmr.msra.gmra.mrb[80].mxu0 %vm808_vm1, %v3472_v37  ;;  %6341 = vmatprep.mubr.msk.bf16.mxu1 %vm6949_vm0, %v6948_v4 }
0x19eb   : > { %6385 = vmatprep.mubr.msk.bf16.mxu0 %vm6949_vm0, %v6948_v4 }
0x1ab4   : > { %v7989_v46 = vpop.f32.mrb[60].mxu1 }
0x1ab5   : > { %v6331_v8 = vpop.f32.mrb[61].mxu1  ;;  %v3401_v28 = vpop.f32.mrb[76].mxu0 }
0x1ab6   : > { %v3407_v9 = vmul.f32 0.17677669, %v3401_v28  ;;  %v3237_v23 = vpop.f32.mrb[62].mxu1  ;;  %v6349_v39 = vpop.f32.mrb[77].mxu0 }
0x1ab7   : > { %v6332_v12 = vpop.f32.mrb[63].mxu1  ;;  %v3404_v25 = vpop.f32.mrb[78].mxu0  ;;  %v6763_v39 = vld [vmem:[%s8634_s5 + $0x40] sm:$0xff]  }
0x1ab8   : > { %v6350_v6 = vpop.f32.mrb[79].mxu0  ;;  %v3408_v14 = vadd.f32 %v7958_v0, %v3407_v9  ;;  %6370 = vmatpush3.bf16.msra.mxu0 %v6763_v39  ;;  %v6764_v12 = vld [vmem:[%s8634_s5 + $0x48] sm:$0xff]   ;;  %v6765_v25 = vld [vmem:[%s8634_s5 + $0x50] sm:$0xff]  }
0x1ab9   : > { %6371 = vmatprep.subr.bf16.mxu0 %v6948_v4  ;;  %v6766_v6 = vld [vmem:[%s8634_s5 + $0x58] sm:$0xff]   ;;  %v6934_v39 = vld [vmem:[%s7126_s26 + $0x28] sm:$0xff]  }
0x1aba   : > { %v3409_v20 = vsel %vm857_vm3, %v3408_v14, -inf }
0x1abb   : > { %3410 = vmax.xlane.f32.xlu1 %v3409_v20  ;;  %v6768_v20 = vld [vmem:[%s8634_s5 + $0x68] sm:$0xff]  }
0x1abc   : > { %v3286_v57 = vpop.f32.mrb[64].mxu1  ;;  %6372 = vmatpush3.bf16.msra.mxu0 %v6764_v12  ;;  %v6935_v12 = vld [vmem:[%s7126_s26 + $0x30] sm:$0xff]  }
0x1abd   : > { %v3292_v26 = vmul.f32 0.17677669, %v3286_v57  ;;  %v6337_v47 = vpop.f32.mrb[65].mxu1  ;;  %v3515_v49 = vpop.f32.mrb[80].mxu0  ;;  %6373 = vmatprep.subr.bf16.mxu0 %v6948_v4  ;;  %v6769_v57 = vld [vmem:[%s8634_s5 + $0x70] sm:$0xff]  }
0x1abe   : > { %v3521_v50 = vmul.f32 0.17677669, %v3515_v49  ;;  %v3289_v51 = vpop.f32.mrb[66].mxu1  ;;  %v6361_v43 = vpop.f32.mrb[81].mxu0 }
0x1abf   : > { %v3293_v52 = vadd.f32 %v7958_v0, %v3292_v26  ;;  %v6338_v53 = vpop.f32.mrb[67].mxu1  ;;  %v3518_v55 = vpop.f32.mrb[82].mxu0  ;;  %v6770_v51 = vld [vmem:[%s8634_s5 + $0x78] sm:$0xff]  }
0x1ac0   : > { %v6362_v18 = vpop.f32.mrb[83].mxu0  ;;  %v3522_v58 = vadd.f32 %v7958_v0, %v3521_v50  ;;  %6374 = vmatpush3.bf16.msra.mxu0 %v6765_v25  ;;  %v6936_v25 = vld [vmem:[%s7126_s26 + $0x38] sm:$0xff]  }
0x1ac1   : > { %v3294_v35 = vsel %vm857_vm3, %v3293_v52, -inf  ;;  %6375 = vmatprep.subr.bf16.mxu0 %v6948_v4 }
0x1ac2   : > { %3295 = vmax.xlane.f32.xlu0 %v3294_v35  ;;  %v3523_v59 = vsel %vm857_vm3, %v3522_v58, -inf }
0x1ac4   : > { %6376 = vmatpush3.bf16.msra.mxu0 %v6766_v6 }
0x1ac5   : > { %6377 = vmatprep.subr.bf16.mxu0 %v6948_v4 }
0x1ac6   : > { %3524 = vmax.xlane.f32.xlu0 %v3523_v59 }
0x1b48   : > { %v3411_v16 = vpop.xlane.xlu1 %3410 }
0x1b49   : > { %v3412_v60 = vsub.f32 %v3408_v14, %v3411_v16  ;;  %v6767_v14 = vld [vmem:[%s8634_s5 + $0x60] sm:$0xff]  }
0x1b4a   : > { %6378 = vmatpush3.bf16.msra.mxu0 %v6767_v14 }
0x1b4b   : > { %v3413_v61 = vmul.f32 1.442695, %v3412_v60  ;;  %6379 = vmatprep.subr.bf16.mxu0 %v6948_v4 }
0x1b4d   : > { %6893 = vpow2.f32 %v3413_v61 }
0x1b4e   : > { %6380 = vmatpush3.bf16.msra.mxu0 %v6768_v20 }
0x1b4f   : > { %v3296_v17 = vpop.xlane.xlu0 %3295  ;;  %6381 = vmatprep.subr.bf16.mxu0 %v6948_v4 }
0x1b50   : > { %v3297_v62 = vsub.f32 %v3293_v52, %v3296_v17 }
0x1b52   : > { %v3298_v56 = vmul.f32 1.442695, %v3297_v62  ;;  %6382 = vmatpush3.bf16.msra.mxu0 %v6769_v57 }
0x1b53   : > { %v3525_v63 = vpop.xlane.xlu0 %3524  ;;  %6383 = vmatprep.subr.bf16.mxu0 %v6948_v4 }
0x1b54   : > { %6895 = vpow2.f32 %v3298_v56  ;;  %v3526_v1 = vsub.f32 %v3522_v58, %v3525_v63 }
0x1b56   : > { %v3527_v3 = vmul.f32 1.442695, %v3526_v1  ;;  %6384 = vmatpush3.bf16.msra.mxu0 %v6770_v51  ;;  %v6801_v51 = vld [vmem:[%s8635_s6 + $0x70] sm:$0xff]  }
0x1b57   : > { %v6894_v5 = vpop.eup %6893 }
0x1b58   : > { %6897 = vpow2.f32 %v3527_v3  ;;  %v3415_v0 = vsel %vm857_vm3, %v6894_v5, 0.0 }
0x1b59   : > { %3416 = vadd.xlane.f32.xlu0 %v3415_v0 }
0x1b5e   : > { %v6896_v7 = vpop.eup %6895 }
0x1b5f   : > { %v3300_v10 = vsel %vm857_vm3, %v6896_v7, 0.0 }
0x1b60   : > { %3301 = vadd.xlane.f32.xlu0 %v3300_v10  ;;  %v6773_v10 = vld [vmem:[%s8636_s7 + $0x84] ss:$8 sps:$4 sm:$0xff]  }
0x1b61   : > { %3931 = vmatprep.subr.bf16.mxu0 %v6773_v10 }
0x1b62   : > { %v6898_v11 = vpop.eup %6897 }
0x1b63   : > { %v3529_v13 = vsel %vm857_vm3, %v6898_v11, 0.0 }
0x1b64   : > { %3530 = vadd.xlane.f32.xlu1 %v3529_v13  ;;  %v6779_v13 = vld [vmem:[%s8636_s7 + $0xa4] ss:$8 sps:$4 sm:$0xff]  }
0x1b75   : > { %3423 = vrot.lane.b32.xlu1 %v7949_v36, %s8659_s22 }
0x1b76   : > { %3309 = vrot.lane.b32.xlu0 %v7949_v36, %s8657_s16 }
0x1b79   : > { %3537 = vrot.lane.b32.xlu1 %v7949_v36, %s8660_s20 }
0x1be6   : > { %v3417_v15 = vpop.xlane.xlu0 %3416 }
0x1be7   : > { %6899 = vrcp.f32 %v3417_v15  ;;  %v6795_v15 = vld [vmem:[%s8635_s6 + $0x40] sm:$0xff]  }
0x1bed   : > { %v3302_v21 = vpop.xlane.xlu0 %3301 }
0x1bee   : > { %6901 = vrcp.f32 %v3302_v21  ;;  %v6777_v21 = vld [vmem:[%s8636_s7 + $0xa0] ss:$8 sps:$4 sm:$0xff]  }
0x1bf1   : > { %v6900_v22 = vpop.eup %6899  ;;  %v3531_v24 = vpop.xlane.xlu1 %3530 }
0x1bf2   : > { %v3310_v29 = vpop.permute.xlu0 %3309  ;;  %v3419_v30 = vmul.f32 %v6900_v22, %v6894_v5  ;;  %6903 = vrcp.f32 %v3531_v24  ;;  %v6796_v22 = vld [vmem:[%s8635_s6 + $0x48] sm:$0xff]   ;;  %v6782_v24 = vld [vmem:[%s8636_s7 + $0xb4] ss:$8 sps:$4 sm:$0xff]  }
0x1bf3   : > { %v3315_v31 = vsel %vm874_vm2, %v3310_v29, 0  ;;  %v6780_v29 = vld [vmem:[%s8636_s7 + $0xb0] ss:$8 sps:$4 sm:$0xff]  }
0x1bf4   : > { %6340 = vmatpush3.bf16.msra.mxu1 %v3315_v31  ;;  %5519 = vst.msk [vmem:[%s7181_s27 + $0x30] sm:$0xff] %vm857_vm3, %v3419_v30  ;;  %v3422_v28 = vpack.c.bf16 %v3419_v30, %v3419_v30  ;;  %v6785_v30 = vld [vmem:[%s8636_s7 + $0xc4] ss:$8 sps:$4 sm:$0xff]   ;;  %v6783_v31 = vld [vmem:[%s8636_s7 + $0xc0] ss:$8 sps:$4 sm:$0xff]  }
0x1bf5   : > { %6351 = vmatprep.subr.bf16.mxu1 %v6948_v4  ;;  %v3424_v33 = vpop.permute.xlu1 %3423 }
0x1bf6   : > { %v3429_v37 = vsel %vm874_vm2, %v3424_v33, 0  ;;  %v6791_v33 = vld [vmem:[%s8636_s7 + $0xe4] ss:$8 sps:$4 sm:$0xff]  }
0x1bf8   : > { %v6902_v32 = vpop.eup %6901 }
0x1bf9   : > { %v3304_v36 = vmul.f32 %v6902_v32, %v6896_v7  ;;  %v3538_v8 = vpop.permute.xlu1 %3537  ;;  %v6788_v32 = vld [vmem:[%s8636_s7 + $0xd4] ss:$8 sps:$4 sm:$0xff]  }
0x1bfa   : > { %v3543_v9 = vsel %vm874_vm2, %v3538_v8, 0  ;;  %v6930_v8 = vld [vmem:[%s7126_s26 + $0x8] sm:$0xff]  }
0x1bfb   : > { %5516 = vst.msk [vmem:[%s7181_s27 + $0x28] sm:$0xff] %vm857_vm3, %v3304_v36  ;;  %v3307_v34 = vpack.c.bf16 %v3304_v36, %v3304_v36  ;;  %v6786_v36 = vld [vmem:[%s8636_s7 + $0xd0] ss:$8 sps:$4 sm:$0xff]  }
0x1bfc   : > { %v6904_v54 = vpop.eup %6903 }
0x1bfd   : > { %v3533_v27 = vmul.f32 %v6904_v54, %v6898_v11  ;;  %6342 = vmatmul.mubr.msk.bf16.vlgmr.msra.gmra.mrb[68].mxu1 %vm857_vm3, %v3307_v34  ;;  %v6776_v11 = vld [vmem:[%s8636_s7 + $0x94] ss:$8 sps:$4 sm:$0xff]   ;;  %v6789_v34 = vld [vmem:[%s8636_s7 + $0xe0] ss:$8 sps:$4 sm:$0xff]  }
0x1bfe   : > { %6352 = vmatpush3.bf16.msra.mxu1 %v3429_v37  ;;  %6353 = vmatprep.mubr.msk.bf16.mxu1 %vm6949_vm0, %v6948_v4  ;;  %v6794_v54 = vld [vmem:[%s8636_s7 + $0xf4] ss:$8 sps:$4 sm:$0xff]   ;;  %v6929_v37 = vld [vmem:[%s7126_s26] sm:$0xff]  }
0x1bff   : > { %5522 = vst.msk [vmem:[%s7181_s27 + $0x38] sm:$0xff] %vm857_vm3, %v3533_v27  ;;  %6363 = vmatprep.subr.bf16.mxu1 %v6948_v4  ;;  %v3536_v23 = vpack.c.bf16 %v3533_v27, %v3533_v27  ;;  %v6792_v27 = vld [vmem:[%s8636_s7 + $0xf0] ss:$8 sps:$4 sm:$0xff]  }
0x1c05   : > { %6354 = vmatmul.mubr.msk.bf16.vlgmr.msra.gmra.mrb[72].mxu1 %vm857_vm3, %v3422_v28  ;;  %v6931_v28 = vld [vmem:[%s7126_s26 + $0x10] sm:$0xff]  }
0x1c06   : > { %6364 = vmatpush3.bf16.msra.mxu1 %v3543_v9  ;;  %6365 = vmatprep.mubr.msk.bf16.mxu1 %vm6949_vm0, %v6948_v4  ;;  %v6932_v9 = vld [vmem:[%s7126_s26 + $0x18] sm:$0xff]  }
0x1c07   : > { %6389 = vmatprep.subr.bf16.mxu1 %v6948_v4 }
0x1c0d   : > { %6366 = vmatmul.mubr.msk.bf16.vlgmr.msra.gmra.mrb[76].mxu1 %vm857_vm3, %v3536_v23  ;;  %v6933_v23 = vld [vmem:[%s7126_s26 + $0x20] sm:$0xff]  }
0x1c0e   : > { %6405 = vmatprep.mubr.msk.bf16.mxu1 %vm6949_vm0, %v6948_v4  ;;  %6390 = vmatpush3.bf16.msra.mxu1 %v6795_v15 }
0x1c0f   : > { %6391 = vmatprep.subr.bf16.mxu1 %v6948_v4 }
0x1c12   : > { %6392 = vmatpush3.bf16.msra.mxu1 %v6796_v22 }
0x1c13   : > { %6393 = vmatprep.subr.bf16.mxu1 %v6948_v4 }
0x1cd0   : > { %v3351_v26 = vpop.f32.mrb[68].mxu1 }
0x1cd1   : > { %3586 = vrot.lane.b32.xlu1 %v3351_v26, %s8660_s20  ;;  %v6343_v47 = vpop.f32.mrb[69].mxu1  ;;  %v6797_v26 = vld [vmem:[%s8635_s6 + $0x50] sm:$0xff]  }
0x1cd2   : > { %v3354_v49 = vpop.f32.mrb[70].mxu1  ;;  %6394 = vmatpush3.bf16.msra.mxu1 %v6797_v26  ;;  %v6798_v47 = vld [vmem:[%s8635_s6 + $0x58] sm:$0xff]  }
0x1cd3   : > { %v6344_v50 = vpop.f32.mrb[71].mxu1  ;;  %6395 = vmatprep.subr.bf16.mxu1 %v6948_v4  ;;  %v6799_v49 = vld [vmem:[%s8635_s6 + $0x60] sm:$0xff]  }
0x1cd4   : > { %v6800_v50 = vld [vmem:[%s8635_s6 + $0x68] sm:$0xff]  }
0x1cd6   : > { %6396 = vmatpush3.bf16.msra.mxu1 %v6798_v47 }
0x1cd7   : > { %6397 = vmatprep.subr.bf16.mxu1 %v6948_v4 }
0x1cd8   : > { %v3465_v43 = vpop.f32.mrb[72].mxu1 }
0x1cd9   : > { %3590 = vrot.lane.b32.xlu0 %v3465_v43, %s8659_s22  ;;  %v6355_v52 = vpop.f32.mrb[73].mxu1  ;;  %v6802_v43 = vld [vmem:[%s8635_s6 + $0x78] sm:$0xff]  }
0x1cda   : > { %v3468_v53 = vpop.f32.mrb[74].mxu1  ;;  %6398 = vmatpush3.bf16.msra.mxu1 %v6799_v49 }
0x1cdb   : > { %v6356_v55 = vpop.f32.mrb[75].mxu1  ;;  %6399 = vmatprep.subr.bf16.mxu1 %v6948_v4 }
0x1cde   : > { %6400 = vmatpush3.bf16.msra.mxu1 %v6800_v50 }
0x1cdf   : > { %6401 = vmatprep.subr.bf16.mxu1 %v6948_v4 }
0x1ce0   : > { %v3579_v18 = vpop.f32.mrb[76].mxu1 }
0x1ce1   : > { %3594 = vrot.lane.b32.xlu1 %v3579_v18, %s8657_s16  ;;  %v6367_v58 = vpop.f32.mrb[77].mxu1 }
0x1ce2   : > { %v3582_v35 = vpop.f32.mrb[78].mxu1  ;;  %6402 = vmatpush3.bf16.msra.mxu1 %v6801_v51 }
0x1ce3   : > { %v6368_v59 = vpop.f32.mrb[79].mxu1  ;;  %6403 = vmatprep.subr.bf16.mxu1 %v6948_v4 }
0x1ce6   : > { %6404 = vmatpush3.bf16.msra.mxu1 %v6802_v43 }
0x1ce7   : > { %6409 = vmatprep.subr.bf16.mxu1 %v6948_v4 }
0x1d43   : > { %v3587_v16 = vpop.permute.xlu1 %3586 }
0x1d44   : > { %v3597_v61 = vsel %vm808_vm1, %v7989_v46, %v3587_v16  ;;  %v6771_v46 = vld [vmem:[%s8636_s7 + $0x80] ss:$8 sps:$4 sm:$0xff]  }
0x1d4b   : > { %v3591_v60 = vpop.permute.xlu0 %3590 }
0x1d4c   : > { %v3598_v17 = vsel %vm1276_vm4, %v3597_v61, %v3591_v60 }
0x1d53   : > { %v3595_v62 = vpop.permute.xlu1 %3594 }
0x1d54   : > { %v3599_v56 = vsel %vm1278_vm5, %v3598_v17, %v3595_v62 }
0x1d55   : > { %v3600_v63 = vpack.c.bf16 %v3599_v56, %v3599_v56 }
0x1d57   : > { %6386 = vmatmul.mubr.bf16.vlgmr.msra.gmra.mrb[84].mxu0 %v3600_v63 }
0x1d58   : > { %3963 = vmatprep.mubr.bf16.mxu0 %v6947_v2  ;;  %3932 = vmatpush1.bf16.msra.mxu0 %v6771_v46 }
0x1d59   : > { %3933 = vmatprep.subr.bf16.mxu0 %v6776_v11 }
0x1e2a   : > { %v3700_v1 = vpop.f32.mrb[84].mxu0 }
0x1e2b   : > { %v8067_v3 = vadd.f32 %v3700_v1, %v7939_v48  ;;  %v6387_v5 = vpop.f32.mrb[85].mxu0  ;;  %v6774_v48 = vld [vmem:[%s8636_s7 + $0x90] ss:$8 sps:$4 sm:$0xff]  }
0x1e2c   : > { %v3703_v0 = vpop.f32.mrb[86].mxu0  ;;  %3934 = vmatpush1.bf16.msra.mxu0 %v6774_v48 }
0x1e2d   : > { %3706 = vadd.xlane.f32.xlu0 %v8067_v3  ;;  %v6388_v7 = vpop.f32.mrb[87].mxu0  ;;  %3935 = vmatprep.subr.bf16.mxu0 %v6779_v13 }
0x1e30   : > { %3936 = vmatpush1.bf16.msra.mxu0 %v6777_v21 }
0x1e31   : > { %3937 = vmatprep.subr.bf16.mxu0 %v6782_v24 }
0x1e34   : > { %3938 = vmatpush1.bf16.msra.mxu0 %v6780_v29 }
0x1e35   : > { %3939 = vmatprep.subr.bf16.mxu0 %v6785_v30 }
0x1e38   : > { %3940 = vmatpush1.bf16.msra.mxu0 %v6783_v31  ;;  %v8208_v31 = vld [vmem:[%s8640_s11 + $0x8] sm:$0x3f] }
0x1e39   : > { %3941 = vmatprep.subr.bf16.mxu0 %v6788_v32 }
0x1e3c   : > { %3942 = vmatpush1.bf16.msra.mxu0 %v6786_v36 }
0x1e3d   : > { %3943 = vmatprep.subr.bf16.mxu0 %v6791_v33 }
0x1e40   : > { %3944 = vmatpush1.bf16.msra.mxu0 %v6789_v34  ;;  %v3720_v34 = vrot.slane %v8208_v31, %v1399_v40 }
0x1e41   : > { %3945 = vmatprep.subr.bf16.mxu0 %v6794_v54 }
0x1e44   : > { %3946 = vmatpush1.bf16.msra.mxu0 %v6792_v27 }
0x1e45   : > { %6429 = vmatprep.subr.bf16.mxu0 %v6948_v4 }
0x1e47   : > { %3964 = vmatmul.mubr.bf16.vlgmr.msra.gmra.mrb[88].mxu0 %v6929_v37  ;;  %v3725_v37 = vrot.slane %v8208_v31, %v1404_v45 }
0x1e48   : > { %3973 = vmatprep.mubr.bf16.mxu0 %v6947_v2 }
0x1e4f   : > { %3974 = vmatmul.mubr.bf16.gmra.mrb[92].mxu0 %v6930_v8 }
0x1e50   : > { %3983 = vmatprep.mubr.bf16.mxu0 %v6947_v2 }
0x1e57   : > { %3984 = vmatmul.mubr.bf16.gmra.mrb[96].mxu0 %v6931_v28 }
0x1e58   : > { %3993 = vmatprep.mubr.bf16.mxu0 %v6947_v2 }
0x1e5f   : > { %3994 = vmatmul.mubr.bf16.gmra.mrb[100].mxu0 %v6932_v9 }
0x1e60   : > { %4003 = vmatprep.mubr.bf16.mxu0 %v6947_v2 }
0x1e67   : > { %4004 = vmatmul.mubr.bf16.gmra.mrb[104].mxu0 %v6933_v23 }
0x1e68   : > { %4013 = vmatprep.mubr.bf16.mxu0 %v6947_v2 }
0x1e6f   : > { %4014 = vmatmul.mubr.bf16.gmra.mrb[108].mxu0 %v6934_v39 }
0x1e70   : > { %4023 = vmatprep.mubr.bf16.mxu0 %v6947_v2 }
0x1e77   : > { %4024 = vmatmul.mubr.bf16.gmra.mrb[112].mxu0 %v6935_v12 }
0x1e78   : > { %4033 = vmatprep.mubr.bf16.mxu0 %v6947_v2 }
0x1e7f   : > { %4034 = vmatmul.mubr.bf16.gmra.mrb[116].mxu0 %v6936_v25 }
0x1e80   : > { %6445 = vmatprep.mubr.msk.bf16.mxu0 %vm6949_vm0, %v6948_v4 }
0x1eba   : > { %v3707_v6 = vpop.xlane.xlu0 %3706 }
0x1ebb   : > { %v3708_v14 = vmul.f32 0.0078125, %v3707_v6 }
0x1ebd   : > { %v8145_v20 = vsub.f32 %v8067_v3, %v3708_v14 }
0x1ebf   : > { %v3710_v57 = vmul.f32 %v8145_v20, %v8145_v20 }
0x1ec1   : > { %3711 = vadd.xlane.f32.xlu1 %v3710_v57 }
0x1f1a   : > { %v3965_v52 = vpop.f32.mrb[88].mxu0 }
0x1f1b   : > { %v3967_v53 = vpop.f32.mrb[89].mxu0 }
0x1f1c   : > { %v3969_v55 = vpop.f32.mrb[90].mxu0 }
0x1f1d   : > { %v8173_v18 = vpack.c.bf16 %v3969_v55, %v3965_v52  ;;  %v3971_v58 = vpop.f32.mrb[91].mxu0 }
0x1f1e   : > { %v8175_v35 = vpack.c.bf16 %v3971_v58, %v3967_v53 }
0x1f1f   : > { %4192 = vrot.lane.b32.xlu0 %v8173_v18, %s8657_s16  ;;  %v4064_v45 = vsel %vm808_vm1, %v8173_v18, 0 }
0x1f20   : > { %6430 = vmatpush3.bf16.msra.mxu0 %v8175_v35 }
0x1f21   : > { %6431 = vmatprep.subr.bf16.mxu0 %v6948_v4 }
0x1f22   : > { %v3975_v59 = vpop.f32.mrb[92].mxu0 }
0x1f23   : > { %v3977_v16 = vpop.f32.mrb[93].mxu0 }
0x1f24   : > { %v3979_v60 = vpop.f32.mrb[94].mxu0 }
0x1f25   : > { %v8181_v61 = vpack.c.bf16 %v3979_v60, %v3975_v59  ;;  %v3981_v17 = vpop.f32.mrb[95].mxu0 }
0x1f26   : > { %v8183_v62 = vpack.c.bf16 %v3981_v17, %v3977_v16 }
0x1f27   : > { %4194 = vrot.lane.b32.xlu1 %v8181_v61, %s8657_s16  ;;  %v4067_v50 = vsel %vm808_vm1, %v8181_v61, 0 }
0x1f28   : > { %6432 = vmatpush3.bf16.msra.mxu0 %v8183_v62 }
0x1f29   : > { %6433 = vmatprep.subr.bf16.mxu0 %v6948_v4 }
0x1f2a   : > { %v3985_v56 = vpop.f32.mrb[96].mxu0 }
0x1f2b   : > { %v3987_v63 = vpop.f32.mrb[97].mxu0 }
0x1f2c   : > { %v3989_v1 = vpop.f32.mrb[98].mxu0 }
0x1f2d   : > { %v8189_v3 = vpack.c.bf16 %v3989_v1, %v3985_v56  ;;  %v3991_v5 = vpop.f32.mrb[99].mxu0 }
0x1f2e   : > { %v8191_v0 = vpack.c.bf16 %v3991_v5, %v3987_v63 }
0x1f2f   : > { %4196 = vrot.lane.b32.xlu0 %v8189_v3, %s8657_s16  ;;  %v4070_v59 = vsel %vm808_vm1, %v8189_v3, 0 }
0x1f30   : > { %6434 = vmatpush3.bf16.msra.mxu0 %v8191_v0 }
0x1f31   : > { %6435 = vmatprep.subr.bf16.mxu0 %v6948_v4 }
0x1f32   : > { %v3995_v46 = vpop.f32.mrb[100].mxu0 }
0x1f33   : > { %v3997_v11 = vpop.f32.mrb[101].mxu0 }
0x1f34   : > { %v3999_v48 = vpop.f32.mrb[102].mxu0 }
0x1f35   : > { %v8197_v15 = vpack.c.bf16 %v3999_v48, %v3995_v46  ;;  %v4001_v21 = vpop.f32.mrb[103].mxu0 }
0x1f36   : > { %v8199_v22 = vpack.c.bf16 %v4001_v21, %v3997_v11 }
0x1f37   : > { %4198 = vrot.lane.b32.xlu1 %v8197_v15, %s8657_s16  ;;  %v4073_v16 = vsel %vm808_vm1, %v8197_v15, 0 }
0x1f38   : > { %6436 = vmatpush3.bf16.msra.mxu0 %v8199_v22 }
0x1f39   : > { %6437 = vmatprep.subr.bf16.mxu0 %v6948_v4 }
0x1f3a   : > { %v4005_v24 = vpop.f32.mrb[104].mxu0 }
0x1f3b   : > { %v4007_v29 = vpop.f32.mrb[105].mxu0 }
0x1f3c   : > { %v4009_v30 = vpop.f32.mrb[106].mxu0 }
0x1f3d   : > { %v8210_v32 = vpack.c.bf16 %v4009_v30, %v4005_v24  ;;  %v4011_v36 = vpop.f32.mrb[107].mxu0 }
0x1f3e   : > { %v8212_v33 = vpack.c.bf16 %v4011_v36, %v4007_v29 }
0x1f3f   : > { %4200 = vrot.lane.b32.xlu0 %v8210_v32, %s8657_s16  ;;  %v4076_v60 = vsel %vm808_vm1, %v8210_v32, 0 }
0x1f40   : > { %6438 = vmatpush3.bf16.msra.mxu0 %v8212_v33 }
0x1f41   : > { %6439 = vmatprep.subr.bf16.mxu0 %v6948_v4 }
0x1f42   : > { %v4015_v8 = vpop.f32.mrb[108].mxu0 }
0x1f43   : > { %v4017_v28 = vpop.f32.mrb[109].mxu0 }
0x1f44   : > { %v4019_v23 = vpop.f32.mrb[110].mxu0 }
0x1f45   : > { %v8225_v39 = vpack.c.bf16 %v4019_v23, %v4015_v8  ;;  %v4021_v12 = vpop.f32.mrb[111].mxu0 }
0x1f46   : > { %v8229_v40 = vpack.c.bf16 %v4021_v12, %v4017_v28 }
0x1f47   : > { %4202 = vrot.lane.b32.xlu1 %v8225_v39, %s8657_s16  ;;  %v4079_v17 = vsel %vm808_vm1, %v8225_v39, 0 }
0x1f48   : > { %6440 = vmatpush3.bf16.msra.mxu0 %v8229_v40 }
0x1f49   : > { %6441 = vmatprep.subr.bf16.mxu0 %v6948_v4 }
0x1f4a   : > { %v4025_v14 = vpop.f32.mrb[112].mxu0 }
0x1f4e   : > { %v3712_v7 = vpop.xlane.xlu1 %3711 }
0x1f4f   : > { %v3713_v10 = vmul.f32 0.0078125, %v3712_v7 }
0x1f51   : > { %v3714_v13 = vadd.f32 1e-05, %v3713_v10 }
0x1f53   : > { %6905 = vrsqrt.f32 %v3714_v13 }
0x1f5d   : > { %v6906_v54 = vpop.eup %6905 }
0x1f5e   : > { %v3716_v27 = vmul.f32 %v6906_v54, %v8145_v20  ;;  %v4027_v20 = vpop.f32.mrb[113].mxu0 }
0x1f5f   : > { %v4029_v57 = vpop.f32.mrb[114].mxu0 }
0x1f60   : > { %v3721_v9 = vmul.f32 %v3720_v34, %v3716_v27  ;;  %v8242_v26 = vpack.c.bf16 %v4029_v57, %v4025_v14  ;;  %v4031_v47 = vpop.f32.mrb[115].mxu0  ;;  %v8307_v57 = vld [vmem:[%s7526_s19] sm:$0xff] }
0x1f61   : > { %v8244_v49 = vpack.c.bf16 %v4031_v47, %v4027_v20  ;;  %v4035_v51 = vpop.f32.mrb[116].mxu0 }
0x1f62   : > { %v8227_v25 = vadd.f32 %v3725_v37, %v3721_v9  ;;  %4204 = vrot.lane.b32.xlu0 %v8242_v26, %s8657_s16  ;;  %v4037_v43 = vpop.f32.mrb[117].mxu0  ;;  %v4082_v56 = vsel %vm808_vm1, %v8242_v26, 0 }
0x1f63   : > { %6442 = vmatpush3.bf16.msra.mxu0 %v8244_v49  ;;  %v4039_v52 = vpop.f32.mrb[118].mxu0 }
0x1f64   : > { %v3727_v6 = vpack.c.bf16 %v8227_v25, %v8227_v25  ;;  %6443 = vmatprep.subr.bf16.mxu0 %v6948_v4  ;;  %v8253_v53 = vpack.c.bf16 %v4039_v52, %v4035_v51  ;;  %v4041_v55 = vpop.f32.mrb[119].mxu0 }
0x1f65   : > { %v8255_v58 = vpack.c.bf16 %v4041_v55, %v4037_v43 }
0x1f66   : > { %6406 = vmatmul.mubr.bf16.vlgmr.msra.gmra.mrb[80].mxu1 %v3727_v6  ;;  %4206 = vrot.lane.b32.xlu1 %v8253_v53, %s8657_s16  ;;  %v4085_v63 = vsel %vm808_vm1, %v8253_v53, 0 }
0x1f67   : > { %6410 = vmatpush3.bf16.xpose.msra.mxu1 %v4064_v45  ;;  %6425 = vmatprep.mubr.msk.bf16.mxu1 %vm6949_vm0, %v6948_v4 }
0x1f68   : > { %6411 = vmatprep.subr.bf16.mxu1 %v6948_v4  ;;  %6444 = vmatpush3.bf16.msra.mxu0 %v8255_v58 }
0x1f69   : > { %6469 = vmatprep.subr.bf16.mxu0 %v6948_v4 }
0x1f6f   : > { %6412 = vmatpush3.bf16.xpose.msra.mxu1 %v4067_v50 }
0x1f70   : > { %6413 = vmatprep.subr.bf16.mxu1 %v6948_v4 }
0x1f77   : > { %6414 = vmatpush3.bf16.xpose.msra.mxu1 %v4070_v59 }
0x1f78   : > { %6415 = vmatprep.subr.bf16.mxu1 %v6948_v4 }
0x1f7f   : > { %6416 = vmatpush3.bf16.xpose.msra.mxu1 %v4073_v16 }
0x1f80   : > { %6417 = vmatprep.subr.bf16.mxu1 %v6948_v4 }
0x1f87   : > { %6418 = vmatpush3.bf16.xpose.msra.mxu1 %v4076_v60 }
0x1f88   : > { %6419 = vmatprep.subr.bf16.mxu1 %v6948_v4 }
0x1f8f   : > { %6420 = vmatpush3.bf16.xpose.msra.mxu1 %v4079_v17 }
0x1f90   : > { %6421 = vmatprep.subr.bf16.mxu1 %v6948_v4 }
0x1f91   : > { %v4193_v1 = vpop.permute.xlu0 %4192 }
0x1f92   : > { %v4212_v10 = vsel %vm808_vm1, %v4193_v1, 0 }
0x1f97   : > { %6422 = vmatpush3.bf16.xpose.msra.mxu1 %v4082_v56 }
0x1f98   : > { %6423 = vmatprep.subr.bf16.mxu1 %v6948_v4 }
0x1f99   : > { %v4195_v13 = vpop.permute.xlu1 %4194 }
0x1f9a   : > { %v4215_v21 = vsel %vm808_vm1, %v4195_v13, 0 }
0x1f9f   : > { %6424 = vmatpush3.bf16.xpose.msra.mxu1 %v4085_v63 }
0x1fa0   : > { %6449 = vmatprep.subr.bf16.mxu1 %v6948_v4 }
0x1fa1   : > { %v4197_v24 = vpop.permute.xlu0 %4196 }
0x1fa2   : > { %v4218_v29 = vsel %vm808_vm1, %v4197_v24, 0 }
0x1fa9   : > { %v4199_v30 = vpop.permute.xlu1 %4198 }
0x1faa   : > { %v4221_v36 = vsel %vm808_vm1, %v4199_v30, 0 }
0x1fb1   : > { %v4201_v34 = vpop.permute.xlu0 %4200 }
0x1fb2   : > { %v4224_v54 = vsel %vm808_vm1, %v4201_v34, 0 }
0x1fb9   : > { %v4203_v27 = vpop.permute.xlu1 %4202 }
0x1fba   : > { %v4227_v37 = vsel %vm808_vm1, %v4203_v27, 0 }
0x1fd4   : > { %v4205_v8 = vpop.permute.xlu0 %4204 }
0x1fd5   : > { %v4230_v28 = vsel %vm808_vm1, %v4205_v8, 0 }
0x1fd8   : > { %v4207_v9 = vpop.permute.xlu1 %4206 }
0x1fd9   : > { %v4233_v23 = vsel %vm808_vm1, %v4207_v9, 0 }
0x2039   : > { %v3827_v5 = vpop.f32.mrb[80].mxu1 }
0x203a   : > { %v8279_v7 = vpack.c.bf16 %v3827_v5, %v3827_v5  ;;  %v6407_v46 = vpop.f32.mrb[81].mxu1 }
0x203b   : > { %v3830_v11 = vpop.f32.mrb[82].mxu1 }
0x203c   : > { %4182 = vrot.lane.b32.xlu0 %v8279_v7, %s8657_s16  ;;  %v6408_v48 = vpop.f32.mrb[83].mxu1  ;;  %6426 = vmatmul.mubr.msk.bf16.vlgmr.msra.gmra.mrb[84].mxu1 %vm808_vm1, %v8279_v7 }
0x203d   : > { %6450 = vmatpush3.bf16.xpose.msra.mxu1 %v4212_v10  ;;  %6465 = vmatprep.mubr.msk.bf16.mxu1 %vm6949_vm0, %v6948_v4 }
0x203e   : > { %6451 = vmatprep.subr.bf16.mxu1 %v6948_v4 }
0x2045   : > { %6452 = vmatpush3.bf16.xpose.msra.mxu1 %v4215_v21 }
0x2046   : > { %6453 = vmatprep.subr.bf16.mxu1 %v6948_v4 }
0x204d   : > { %6454 = vmatpush3.bf16.xpose.msra.mxu1 %v4218_v29 }
0x204e   : > { %6455 = vmatprep.subr.bf16.mxu1 %v6948_v4 }
0x2055   : > { %6456 = vmatpush3.bf16.xpose.msra.mxu1 %v4221_v36 }
0x2056   : > { %6457 = vmatprep.subr.bf16.mxu1 %v6948_v4 }
0x205d   : > { %6458 = vmatpush3.bf16.xpose.msra.mxu1 %v4224_v54 }
0x205e   : > { %6459 = vmatprep.subr.bf16.mxu1 %v6948_v4 }
0x2065   : > { %6460 = vmatpush3.bf16.xpose.msra.mxu1 %v4227_v37 }
0x2066   : > { %6461 = vmatprep.subr.bf16.mxu1 %v6948_v4 }
0x206d   : > { %6462 = vmatpush3.bf16.xpose.msra.mxu1 %v4230_v28 }
0x206e   : > { %6463 = vmatprep.subr.bf16.mxu1 %v6948_v4 }
0x2075   : > { %6464 = vmatpush3.bf16.xpose.msra.mxu1 %v4233_v23 }
0x2076   : > { %6509 = vmatprep.subr.bf16.mxu1 %v6948_v4 }
0x20ae   : > { %v4183_v12 = vpop.permute.xlu0 %4182 }
0x20af   : > { %6466 = vmatmul.mubr.msk.bf16.vlgmr.msra.gmra.mrb[88].mxu1 %vm808_vm1, %v4183_v12 }
0x20b0   : > { %6525 = vmatprep.mubr.msk.bf16.mxu1 %vm6949_vm0, %v6948_v4 }
0x210f   : > { %v4121_v6 = vpop.f32.mrb[84].mxu1 }
0x2110   : > { %v4127_v45 = vmul.f32 0.17677669, %v4121_v6  ;;  %v6427_v14 = vpop.f32.mrb[85].mxu1 }
0x2111   : > { %v4124_v20 = vpop.f32.mrb[86].mxu1 }
0x2112   : > { %v4128_v47 = vadd.f32 %v8307_v57, %v4127_v45  ;;  %v6428_v50 = vpop.f32.mrb[87].mxu1 }
0x2114   : > { %4129 = vmax.xlane.f32.xlu1 %v4128_v47 }
0x2125   : > { %4299 = vrot.lane.b32.xlu1 %v8183_v62, %s8657_s16 }
0x2182   : > { %v4269_v51 = vpop.f32.mrb[88].mxu1 }
0x2183   : > { %v4275_v43 = vmul.f32 0.17677669, %v4269_v51  ;;  %v6467_v52 = vpop.f32.mrb[89].mxu1 }
0x2184   : > { %v4272_v55 = vpop.f32.mrb[90].mxu1 }
0x2185   : > { %v4276_v59 = vadd.f32 %v8307_v57, %v4275_v43  ;;  %v6468_v16 = vpop.f32.mrb[91].mxu1 }
0x2187   : > { %4277 = vmax.xlane.f32.xlu0 %v4276_v59 }
0x21a1   : > { %v4130_v60 = vpop.xlane.xlu1 %4129 }
0x21a2   : > { %v4131_v17 = vsub.f32 %v4128_v47, %v4130_v60 }
0x21a4   : > { %v4132_v56 = vmul.f32 1.442695, %v4131_v17 }
0x21a5   : > { %v4300_v30 = vpop.permute.xlu1 %4299 }
0x21a6   : > { %6907 = vpow2.f32 %v4132_v56 }
0x21b0   : > { %v6908_v63 = vpop.eup %6907 }
0x21b1   : > { %4134 = vadd.xlane.f32.xlu0 %v6908_v63 }
0x21c7   : > { %4297 = vrot.lane.b32.xlu0 %v8175_v35, %s8657_s16 }
0x21cb   : > { %4301 = vrot.lane.b32.xlu0 %v8191_v0, %s8657_s16 }
0x21cf   : > { %4303 = vrot.lane.b32.xlu0 %v8199_v22, %s8657_s16 }
0x21d3   : > { %4305 = vrot.lane.b32.xlu0 %v8212_v33, %s8657_s16 }
0x21d7   : > { %4307 = vrot.lane.b32.xlu0 %v8229_v40, %s8657_s16 }
0x21db   : > { %4309 = vrot.lane.b32.xlu0 %v8244_v49, %s8657_s16 }
0x21df   : > { %4311 = vrot.lane.b32.xlu0 %v8255_v58, %s8657_s16 }
0x21e3   : > { %4363 = vrot.lane.b32.xlu0 %v8173_v18, %s8659_s22 }
0x21e7   : > { %4365 = vrot.lane.b32.xlu0 %v8181_v61, %s8659_s22 }
0x21eb   : > { %4369 = vrot.lane.b32.xlu0 %v8197_v15, %s8659_s22 }
0x21ef   : > { %4371 = vrot.lane.b32.xlu0 %v8210_v32, %s8659_s22 }
0x21f3   : > { %4373 = vrot.lane.b32.xlu0 %v8225_v39, %s8659_s22 }
0x21f7   : > { %4375 = vrot.lane.b32.xlu0 %v8242_v26, %s8659_s22 }
0x21fb   : > { %4377 = vrot.lane.b32.xlu0 %v8253_v53, %s8659_s22 }
0x2214   : > { %v4278_v1 = vpop.xlane.xlu0 %4277 }
0x2215   : > { %v4279_v5 = vsub.f32 %v4276_v59, %v4278_v1 }
0x2217   : > { %v4280_v46 = vmul.f32 1.442695, %v4279_v5 }
0x2219   : > { %6909 = vpow2.f32 %v4280_v46 }
0x2223   : > { %v6910_v10 = vpop.eup %6909 }
0x2224   : > { %4282 = vadd.xlane.f32.xlu1 %v6910_v10 }
0x2235   : > { %4367 = vrot.lane.b32.xlu1 %v8189_v3, %s8659_s22 }
0x2239   : > { %4361 = vrot.lane.b32.xlu1 %v8279_v7, %s8659_s22 }
0x223d   : > { %4460 = vrot.lane.b32.xlu1 %v8175_v35, %s8659_s22 }
0x223e   : > { %v4135_v11 = vpop.xlane.xlu0 %4134 }
0x223f   : > { %6911 = vrcp.f32 %v4135_v11 }
0x2241   : > { %4462 = vrot.lane.b32.xlu1 %v8183_v62, %s8659_s22 }
0x2242   : > { %v4298_v48 = vpop.permute.xlu0 %4297 }
0x2245   : > { %4466 = vrot.lane.b32.xlu1 %v8199_v22, %s8659_s22 }
0x2246   : > { %v4302_v24 = vpop.permute.xlu0 %4301 }
0x2249   : > { %v6912_v13 = vpop.eup %6911  ;;  %4474 = vrot.lane.b32.xlu1 %v8255_v58, %s8659_s22 }
0x224a   : > { %v4137_v21 = vmul.f32 %v6912_v13, %v6908_v63  ;;  %v4304_v36 = vpop.permute.xlu0 %4303 }
0x224c   : > { %5605 = vst [vmem:[%s7577_s18 + $0x20] sm:$0xff] %v4137_v21  ;;  %v4140_v29 = vpack.c.bf16 %v4137_v21, %v4137_v21 }
0x224e   : > { %6446 = vmatmul.mubr.bf16.vlgmr.msra.gmra.mrb[120].mxu0 %v4140_v29  ;;  %v4306_v34 = vpop.permute.xlu0 %4305 }
0x224f   : > { %6470 = vmatpush3.bf16.msra.mxu0 %v4298_v48  ;;  %6485 = vmatprep.mubr.msk.bf16.mxu0 %vm6949_vm0, %v6948_v4 }
0x2250   : > { %6471 = vmatprep.subr.bf16.mxu0 %v6948_v4 }
0x2252   : > { %v4308_v54 = vpop.permute.xlu0 %4307 }
0x2253   : > { %6472 = vmatpush3.bf16.msra.mxu0 %v4300_v30 }
0x2254   : > { %6473 = vmatprep.subr.bf16.mxu0 %v6948_v4 }
0x2256   : > { %v4310_v27 = vpop.permute.xlu0 %4309 }
0x2257   : > { %6474 = vmatpush3.bf16.msra.mxu0 %v4302_v24 }
0x2258   : > { %6475 = vmatprep.subr.bf16.mxu0 %v6948_v4 }
0x225a   : > { %v4312_v37 = vpop.permute.xlu0 %4311 }
0x225b   : > { %6476 = vmatpush3.bf16.msra.mxu0 %v4304_v36 }
0x225c   : > { %6477 = vmatprep.subr.bf16.mxu0 %v6948_v4 }
0x225e   : > { %v4364_v45 = vpop.permute.xlu0 %4363 }
0x225f   : > { %6478 = vmatpush3.bf16.msra.mxu0 %v4306_v34  ;;  %v4383_v20 = vsel %vm808_vm1, %v4364_v45, 0 }
0x2260   : > { %6479 = vmatprep.subr.bf16.mxu0 %v6948_v4 }
0x2262   : > { %v4366_v50 = vpop.permute.xlu0 %4365 }
0x2263   : > { %6480 = vmatpush3.bf16.msra.mxu0 %v4308_v54  ;;  %v4386_v51 = vsel %vm808_vm1, %v4366_v50, 0 }
0x2264   : > { %6481 = vmatprep.subr.bf16.mxu0 %v6948_v4 }
0x2266   : > { %v4370_v52 = vpop.permute.xlu0 %4369 }
0x2267   : > { %6482 = vmatpush3.bf16.msra.mxu0 %v4310_v27  ;;  %v4392_v55 = vsel %vm808_vm1, %v4370_v52, 0 }
0x2268   : > { %6483 = vmatprep.subr.bf16.mxu0 %v6948_v4 }
0x226a   : > { %v4372_v59 = vpop.permute.xlu0 %4371 }
0x226b   : > { %6484 = vmatpush3.bf16.msra.mxu0 %v4312_v37  ;;  %v4395_v16 = vsel %vm808_vm1, %v4372_v59, 0 }
0x226c   : > { %6489 = vmatprep.subr.bf16.mxu0 %v6948_v4 }
0x226e   : > { %v4374_v60 = vpop.permute.xlu0 %4373 }
0x226f   : > { %v4398_v17 = vsel %vm808_vm1, %v4374_v60, 0 }
0x2272   : > { %v4376_v56 = vpop.permute.xlu0 %4375 }
0x2273   : > { %v4401_v63 = vsel %vm808_vm1, %v4376_v56, 0 }
0x2276   : > { %v4378_v1 = vpop.permute.xlu0 %4377 }
0x2277   : > { %v4404_v5 = vsel %vm808_vm1, %v4378_v1, 0 }
0x22b1   : > { %v4283_v8 = vpop.xlane.xlu1 %4282 }
0x22b2   : > { %6913 = vrcp.f32 %v4283_v8 }
0x22b5   : > { %v4368_v28 = vpop.permute.xlu1 %4367 }
0x22b6   : > { %v4389_v43 = vsel %vm808_vm1, %v4368_v28, 0 }
0x22b9   : > { %v4362_v9 = vpop.permute.xlu1 %4361 }
0x22bc   : > { %v6914_v23 = vpop.eup %6913 }
0x22bd   : > { %v4461_v12 = vpop.permute.xlu1 %4460  ;;  %v4285_v6 = vmul.f32 %v6914_v23, %v6910_v10 }
0x22be   : > { %6510 = vmatpush3.bf16.msra.mxu1 %v4461_v12 }
0x22bf   : > { %6511 = vmatprep.subr.bf16.mxu1 %v6948_v4  ;;  %5607 = vst [vmem:[%s7577_s18 + $0x28] sm:$0xff] %v4285_v6  ;;  %v4288_v14 = vpack.c.bf16 %v4285_v6, %v4285_v6 }
0x22c1   : > { %v4463_v47 = vpop.permute.xlu1 %4462  ;;  %6486 = vmatmul.mubr.bf16.vlgmr.msra.gmra.mrb[124].mxu0 %v4288_v14 }
0x22c2   : > { %6490 = vmatpush3.bf16.xpose.msra.mxu0 %v4383_v20  ;;  %6512 = vmatpush3.bf16.msra.mxu1 %v4463_v47 }
0x22c3   : > { %6491 = vmatprep.subr.bf16.mxu0 %v6948_v4  ;;  %6505 = vmatprep.mubr.msk.bf16.mxu0 %vm6949_vm0, %v6948_v4 }
0x22c4   : > { %6513 = vmatprep.subr.bf16.mxu1 %v6948_v4 }
0x22ca   : > { %6492 = vmatpush3.bf16.xpose.msra.mxu0 %v4386_v51 }
0x22cb   : > { %6493 = vmatprep.subr.bf16.mxu0 %v6948_v4 }
0x22d2   : > { %6494 = vmatpush3.bf16.xpose.msra.mxu0 %v4389_v43 }
0x22d3   : > { %6495 = vmatprep.subr.bf16.mxu0 %v6948_v4 }
0x22da   : > { %6496 = vmatpush3.bf16.xpose.msra.mxu0 %v4392_v55 }
0x22db   : > { %6497 = vmatprep.subr.bf16.mxu0 %v6948_v4 }
0x22e2   : > { %6498 = vmatpush3.bf16.xpose.msra.mxu0 %v4395_v16 }
0x22e3   : > { %6499 = vmatprep.subr.bf16.mxu0 %v6948_v4 }
0x22ea   : > { %6500 = vmatpush3.bf16.xpose.msra.mxu0 %v4398_v17 }
0x22eb   : > { %6501 = vmatprep.subr.bf16.mxu0 %v6948_v4 }
0x22f2   : > { %6502 = vmatpush3.bf16.xpose.msra.mxu0 %v4401_v63 }
0x22f3   : > { %6503 = vmatprep.subr.bf16.mxu0 %v6948_v4 }
0x22fa   : > { %6504 = vmatpush3.bf16.xpose.msra.mxu0 %v4404_v5 }
0x22fb   : > { %6549 = vmatprep.subr.bf16.mxu0 %v6948_v4 }
0x2301   : > { %6506 = vmatmul.mubr.msk.bf16.vlgmr.msra.gmra.mrb[128].mxu0 %vm808_vm1, %v4362_v9 }
0x2302   : > { %6565 = vmatprep.mubr.msk.bf16.mxu0 %vm6949_vm0, %v6948_v4 }
0x2321   : > { %v8388_v46 = vpop.f32.mrb[120].mxu0 }
0x2322   : > { %v6447_v10 = vpop.f32.mrb[121].mxu0 }
0x2323   : > { %v4178_v11 = vpop.f32.mrb[122].mxu0 }
0x2324   : > { %v6448_v48 = vpop.f32.mrb[123].mxu0 }
0x2394   : > { %v8390_v13 = vpop.f32.mrb[124].mxu0 }
0x2395   : > { %v6487_v21 = vpop.f32.mrb[125].mxu0 }
0x2396   : > { %v4358_v24 = vpop.f32.mrb[126].mxu0 }
0x2397   : > { %v6488_v29 = vpop.f32.mrb[127].mxu0 }
0x23d4   : > { %v4440_v30 = vpop.f32.mrb[128].mxu0 }
0x23d5   : > { %v4446_v36 = vmul.f32 0.17677669, %v4440_v30  ;;  %v6507_v34 = vpop.f32.mrb[129].mxu0 }
0x23d6   : > { %v4443_v54 = vpop.f32.mrb[130].mxu0 }
0x23d7   : > { %v4447_v27 = vadd.f32 %v8307_v57, %v4446_v36  ;;  %v6508_v37 = vpop.f32.mrb[131].mxu0 }
0x23d9   : > { %4448 = vmax.xlane.f32.xlu0 %v4447_v27 }
0x23ef   : > { %4464 = vrot.lane.b32.xlu0 %v8191_v0, %s8659_s22 }
0x23f3   : > { %4468 = vrot.lane.b32.xlu0 %v8212_v33, %s8659_s22 }
0x23f7   : > { %4470 = vrot.lane.b32.xlu0 %v8229_v40, %s8659_s22 }
0x23fb   : > { %4472 = vrot.lane.b32.xlu0 %v8244_v49, %s8659_s22 }
0x23ff   : > { %4526 = vrot.lane.b32.xlu0 %v8173_v18, %s8660_s20 }
0x2403   : > { %4530 = vrot.lane.b32.xlu0 %v8189_v3, %s8660_s20 }
0x2407   : > { %4534 = vrot.lane.b32.xlu0 %v8210_v32, %s8660_s20  ;;  %v4467_v32 = vpop.permute.xlu1 %4466 }
0x240b   : > { %4538 = vrot.lane.b32.xlu0 %v8242_v26, %s8660_s20  ;;  %v4475_v9 = vpop.permute.xlu1 %4474 }
0x240f   : > { %4524 = vrot.lane.b32.xlu0 %v8279_v7, %s8660_s20 }
0x2413   : > { %4623 = vrot.lane.b32.xlu0 %v8175_v35, %s8660_s20 }
0x2417   : > { %4627 = vrot.lane.b32.xlu0 %v8191_v0, %s8660_s20 }
0x241b   : > { %4633 = vrot.lane.b32.xlu0 %v8229_v40, %s8660_s20 }
0x2466   : > { %v4449_v18 = vpop.xlane.xlu0 %4448 }
0x2467   : > { %v4450_v3 = vsub.f32 %v4447_v27, %v4449_v18 }
0x2469   : > { %v4451_v8 = vmul.f32 1.442695, %v4450_v3 }
0x246a   : > { %v4465_v28 = vpop.permute.xlu0 %4464 }
0x246b   : > { %6915 = vpow2.f32 %v4451_v8  ;;  %6514 = vmatpush3.bf16.msra.mxu1 %v4465_v28  ;;  %v6804_v28 = vld [vmem:[%s8637_s8 + $0x48] sm:$0xff]  }
0x246c   : > { %6515 = vmatprep.subr.bf16.mxu1 %v6948_v4 }
0x246e   : > { %v4469_v26 = vpop.permute.xlu0 %4468 }
0x246f   : > { %6516 = vmatpush3.bf16.msra.mxu1 %v4467_v32  ;;  %v6805_v32 = vld [vmem:[%s8637_s8 + $0x50] sm:$0xff]  }
0x2470   : > { %6517 = vmatprep.subr.bf16.mxu1 %v6948_v4 }
0x2472   : > { %v4471_v35 = vpop.permute.xlu0 %4470 }
0x2473   : > { %6518 = vmatpush3.bf16.msra.mxu1 %v4469_v26  ;;  %v6806_v26 = vld [vmem:[%s8637_s8 + $0x58] sm:$0xff]  }
0x2474   : > { %6519 = vmatprep.subr.bf16.mxu1 %v6948_v4 }
0x2475   : > { %v6916_v0 = vpop.eup %6915 }
0x2476   : > { %4453 = vadd.xlane.f32.xlu1 %v6916_v0  ;;  %v4473_v40 = vpop.permute.xlu0 %4472 }
0x2477   : > { %6520 = vmatpush3.bf16.msra.mxu1 %v4471_v35  ;;  %v6807_v35 = vld [vmem:[%s8637_s8 + $0x60] sm:$0xff]  }
0x2478   : > { %6521 = vmatprep.subr.bf16.mxu1 %v6948_v4 }
0x247a   : > { %v4527_v7 = vpop.permute.xlu0 %4526 }
0x247b   : > { %6522 = vmatpush3.bf16.msra.mxu1 %v4473_v40  ;;  %v4546_v51 = vsel %vm808_vm1, %v4527_v7, 0  ;;  %v6809_v40 = vld [vmem:[%s8637_s8 + $0x70] sm:$0xff]   ;;  %v6810_v7 = vld [vmem:[%s8637_s8 + $0x78] sm:$0xff]  }
0x247c   : > { %6523 = vmatprep.subr.bf16.mxu1 %v6948_v4 }
0x247e   : > { %v4531_v23 = vpop.permute.xlu0 %4530 }
0x247f   : > { %6524 = vmatpush3.bf16.msra.mxu1 %v4475_v9 }
0x2480   : > { %6529 = vmatprep.subr.bf16.mxu1 %v6948_v4 }
0x2482   : > { %v4535_v12 = vpop.permute.xlu0 %4534 }
0x2483   : > { %v4558_v55 = vsel %vm808_vm1, %v4535_v12, 0 }
0x2486   : > { %v4539_v6 = vpop.permute.xlu0 %4538 }
0x2487   : > { %4528 = vrot.lane.b32.xlu1 %v8181_v61, %s8660_s20  ;;  %v4564_v60 = vsel %vm808_vm1, %v4539_v6, 0 }
0x248a   : > { %v4525_v45 = vpop.permute.xlu0 %4524 }
0x248b   : > { %4532 = vrot.lane.b32.xlu1 %v8197_v15, %s8660_s20 }
0x248e   : > { %v4624_v14 = vpop.permute.xlu0 %4623 }
0x248f   : > { %4536 = vrot.lane.b32.xlu1 %v8225_v39, %s8660_s20  ;;  %6550 = vmatpush3.bf16.msra.mxu0 %v4624_v14 }
0x2490   : > { %6551 = vmatprep.subr.bf16.mxu0 %v6948_v4 }
0x2493   : > { %4540 = vrot.lane.b32.xlu1 %v8253_v53, %s8660_s20  ;;  %v4552_v53 = vsel %vm808_vm1, %v4531_v23, 0 }
0x2503   : > { %v4454_v20 = vpop.xlane.xlu1 %4453 }
0x2504   : > { %6917 = vrcp.f32 %v4454_v20 }
0x2507   : > { %v4529_v15 = vpop.permute.xlu1 %4528 }
0x2508   : > { %v4549_v39 = vsel %vm808_vm1, %v4529_v15, 0 }
0x250b   : > { %v4533_v43 = vpop.permute.xlu1 %4532 }
0x250c   : > { %v4555_v52 = vsel %vm808_vm1, %v4533_v43, 0 }
0x250e   : > { %v6918_v47 = vpop.eup %6917 }
0x250f   : > { %v4456_v50 = vmul.f32 %v6918_v47, %v6916_v0  ;;  %v4537_v59 = vpop.permute.xlu1 %4536  ;;  %v6808_v0 = vld [vmem:[%s8637_s8 + $0x68] sm:$0xff]  }
0x2510   : > { %v4561_v16 = vsel %vm808_vm1, %v4537_v59, 0  ;;  %v6819_v59 = vld [vmem:[%s8638_s9 + $0xa4] ss:$8 sps:$4 sm:$0xff]  }
0x2511   : > { %5609 = vst [vmem:[%s7577_s18 + $0x30] sm:$0xff] %v4456_v50  ;;  %v4459_v61 = vpack.c.bf16 %v4456_v50, %v4456_v50 }
0x2513   : > { %6526 = vmatmul.mubr.bf16.vlgmr.msra.gmra.mrb[92].mxu1 %v4459_v61  ;;  %v4541_v17 = vpop.permute.xlu1 %4540 }
0x2514   : > { %6530 = vmatpush3.bf16.xpose.msra.mxu1 %v4546_v51  ;;  %6545 = vmatprep.mubr.msk.bf16.mxu1 %vm6949_vm0, %v6948_v4  ;;  %v4567_v56 = vsel %vm808_vm1, %v4541_v17, 0 }
0x2515   : > { %6531 = vmatprep.subr.bf16.mxu1 %v6948_v4 }
0x251c   : > { %6532 = vmatpush3.bf16.xpose.msra.mxu1 %v4549_v39 }
0x251d   : > { %6533 = vmatprep.subr.bf16.mxu1 %v6948_v4 }
0x2524   : > { %6534 = vmatpush3.bf16.xpose.msra.mxu1 %v4552_v53 }
0x2525   : > { %6535 = vmatprep.subr.bf16.mxu1 %v6948_v4 }
0x252c   : > { %6536 = vmatpush3.bf16.xpose.msra.mxu1 %v4555_v52  ;;  %v6811_v52 = vld [vmem:[%s8638_s9 + $0x80] ss:$8 sps:$4 sm:$0xff]  }
0x252d   : > { %6537 = vmatprep.subr.bf16.mxu1 %v6948_v4 }
0x2534   : > { %6538 = vmatpush3.bf16.xpose.msra.mxu1 %v4558_v55  ;;  %v6816_v55 = vld [vmem:[%s8638_s9 + $0x94] ss:$8 sps:$4 sm:$0xff]  }
0x2535   : > { %6539 = vmatprep.subr.bf16.mxu1 %v6948_v4 }
0x253c   : > { %6540 = vmatpush3.bf16.xpose.msra.mxu1 %v4561_v16  ;;  %v6817_v16 = vld [vmem:[%s8638_s9 + $0xa0] ss:$8 sps:$4 sm:$0xff]  }
0x253d   : > { %6541 = vmatprep.subr.bf16.mxu1 %v6948_v4 }
0x2544   : > { %6542 = vmatpush3.bf16.xpose.msra.mxu1 %v4564_v60 }
0x2545   : > { %6543 = vmatprep.subr.bf16.mxu1 %v6948_v4 }
0x254c   : > { %6544 = vmatpush3.bf16.xpose.msra.mxu1 %v4567_v56 }
0x2553   : > { %6546 = vmatmul.mubr.msk.bf16.vlgmr.msra.gmra.mrb[96].mxu1 %vm808_vm1, %v4525_v45 }
0x2554   : > { %4959 = vmatprep.mubr.bf16.mxu1 %v6947_v2 }
0x25e6   : > { %v4518_v63 = vpop.f32.mrb[92].mxu1 }
0x25e7   : > { %v6527_v1 = vpop.f32.mrb[93].mxu1 }
0x25e8   : > { %v4521_v5 = vpop.f32.mrb[94].mxu1  ;;  %v6822_v1 = vld [vmem:[%s8638_s9 + $0xb4] ss:$8 sps:$4 sm:$0xff]  }
0x25e9   : > { %v6528_v10 = vpop.f32.mrb[95].mxu1  ;;  %v6820_v5 = vld [vmem:[%s8638_s9 + $0xb0] ss:$8 sps:$4 sm:$0xff]  }
0x25ea   : > { %v6825_v10 = vld [vmem:[%s8638_s9 + $0xc4] ss:$8 sps:$4 sm:$0xff]  }
0x2626   : > { %v4603_v11 = vpop.f32.mrb[96].mxu1 }
0x2627   : > { %v4609_v48 = vmul.f32 0.17677669, %v4603_v11  ;;  %v6547_v21 = vpop.f32.mrb[97].mxu1  ;;  %v6823_v11 = vld [vmem:[%s8638_s9 + $0xc0] ss:$8 sps:$4 sm:$0xff]  }
0x2628   : > { %v4606_v24 = vpop.f32.mrb[98].mxu1  ;;  %v6826_v21 = vld [vmem:[%s8638_s9 + $0xd0] ss:$8 sps:$4 sm:$0xff]  }
0x2629   : > { %v4610_v29 = vadd.f32 %v8307_v57, %v4609_v48  ;;  %v6548_v30 = vpop.f32.mrb[99].mxu1  ;;  %v6828_v48 = vld [vmem:[%s8638_s9 + $0xd4] ss:$8 sps:$4 sm:$0xff]   ;;  %v6831_v24 = vld [vmem:[%s8638_s9 + $0xe4] ss:$8 sps:$4 sm:$0xff]  }
0x262a   : > { %v6834_v30 = vld [vmem:[%s8638_s9 + $0xf4] ss:$8 sps:$4 sm:$0xff]  }
0x262b   : > { %4611 = vmax.xlane.f32.xlu1 %v4610_v29 }
0x263c   : > { %4625 = vrot.lane.b32.xlu1 %v8183_v62, %s8660_s20  ;;  %v4628_v62 = vpop.permute.xlu0 %4627 }
0x2640   : > { %4629 = vrot.lane.b32.xlu1 %v8199_v22, %s8660_s20 }
0x2644   : > { %4631 = vrot.lane.b32.xlu1 %v8212_v33, %s8660_s20 }
0x2648   : > { %4635 = vrot.lane.b32.xlu1 %v8244_v49, %s8660_s20 }
0x264c   : > { %4688 = vrot.lane.b32.xlu1 %v8390_v13, %s8660_s20  ;;  %v4634_v13 = vpop.permute.xlu0 %4633 }
0x26b8   : > { %v4612_v2 = vpop.xlane.xlu1 %4611 }
0x26b9   : > { %v4613_v36 = vsub.f32 %v4610_v29, %v4612_v2  ;;  %v6829_v29 = vld [vmem:[%s8638_s9 + $0xe0] ss:$8 sps:$4 sm:$0xff]   ;;  %v6832_v2 = vld [vmem:[%s8638_s9 + $0xf0] ss:$8 sps:$4 sm:$0xff]  }
0x26bb   : > { %v4614_v57 = vmul.f32 1.442695, %v4613_v36  ;;  %v6835_v36 = vld [vmem:[%s8639_s10 + $0xc0] sm:$0xff]  }
0x26bc   : > { %v4626_v34 = vpop.permute.xlu1 %4625 }
0x26bd   : > { %6919 = vpow2.f32 %v4614_v57  ;;  %6552 = vmatpush3.bf16.msra.mxu0 %v4626_v34  ;;  %v6836_v57 = vld [vmem:[%s8639_s10 + $0x80] sm:$0xff]   ;;  %v6837_v34 = vld [vmem:[%s8639_s10 + $0xc8] sm:$0xff]  }
0x26be   : > { %6553 = vmatprep.subr.bf16.mxu0 %v6948_v4 }
0x26c0   : > { %v4630_v22 = vpop.permute.xlu1 %4629 }
0x26c1   : > { %6554 = vmatpush3.bf16.msra.mxu0 %v4628_v62  ;;  %v6838_v62 = vld [vmem:[%s8639_s10 + $0x88] sm:$0xff]  }
0x26c2   : > { %6555 = vmatprep.subr.bf16.mxu0 %v6948_v4 }
0x26c4   : > { %v4632_v49 = vpop.permute.xlu1 %4631 }
0x26c5   : > { %6556 = vmatpush3.bf16.msra.mxu0 %v4630_v22  ;;  %v6839_v22 = vld [vmem:[%s8639_s10 + $0xd0] sm:$0xff]  }
0x26c6   : > { %6557 = vmatprep.subr.bf16.mxu0 %v6948_v4 }
0x26c7   : > { %v6920_v33 = vpop.eup %6919 }
0x26c8   : > { %4616 = vadd.xlane.f32.xlu0 %v6920_v33  ;;  %v4636_v54 = vpop.permute.xlu1 %4635 }
0x26c9   : > { %6558 = vmatpush3.bf16.msra.mxu0 %v4632_v49  ;;  %v6841_v49 = vld [vmem:[%s8639_s10 + $0xd8] sm:$0xff]  }
0x26ca   : > { %6559 = vmatprep.subr.bf16.mxu0 %v6948_v4 }
0x26cc   : > { %v4689_v45 = vpop.permute.xlu1 %4688 }
0x26cd   : > { %6560 = vmatpush3.bf16.msra.mxu0 %v4634_v13  ;;  %v4699_v20 = vsel %vm808_vm1, %v8388_v46, %v4689_v45  ;;  %v6813_v46 = vld [vmem:[%s8638_s9 + $0x84] ss:$8 sps:$4 sm:$0xff]   ;;  %v6842_v13 = vld [vmem:[%s8639_s10 + $0x98] sm:$0xff]  }
0x26ce   : > { %6561 = vmatprep.subr.bf16.mxu0 %v6948_v4  ;;  %4927 = vmatprep.subr.bf16.mxu1 %v6813_v46 }
0x26cf   : > { %4928 = vmatpush1.bf16.msra.mxu1 %v6811_v52 }
0x26d0   : > { %4929 = vmatprep.subr.bf16.mxu1 %v6816_v55 }
0x26d1   : > { %6562 = vmatpush3.bf16.msra.mxu0 %v4636_v54  ;;  %v6843_v54 = vld [vmem:[%s8639_s10 + $0xe0] sm:$0xff]  }
0x26d2   : > { %6563 = vmatprep.subr.bf16.mxu0 %v6948_v4 }
0x26de   : > { %4637 = vrot.lane.b32.xlu0 %v8255_v58, %s8660_s20  ;;  %v6803_v58 = vld [vmem:[%s8637_s8 + $0x40] sm:$0xff]  }
0x26e2   : > { %4692 = vrot.lane.b32.xlu0 %v4518_v63, %s8659_s22 }
0x2755   : > { %v4617_v27 = vpop.xlane.xlu0 %4616 }
0x2756   : > { %6921 = vrcp.f32 %v4617_v27  ;;  %v6844_v27 = vld [vmem:[%s8639_s10 + $0xa0] sm:$0xff]  }
0x2759   : > { %v4638_v37 = vpop.permute.xlu0 %4637 }
0x275a   : > { %6564 = vmatpush3.bf16.msra.mxu0 %v4638_v37  ;;  %v6845_v37 = vld [vmem:[%s8639_s10 + $0xe8] sm:$0xff]  }
0x275b   : > { %6569 = vmatprep.subr.bf16.mxu0 %v6948_v4 }
0x275d   : > { %v4693_v14 = vpop.permute.xlu0 %4692 }
0x275e   : > { %v4700_v47 = vsel %vm1276_vm4, %v4699_v20, %v4693_v14 }
0x2760   : > { %v6922_v18 = vpop.eup %6921 }
0x2761   : > { %v4619_v3 = vmul.f32 %v6922_v18, %v6920_v33  ;;  %v6840_v33 = vld [vmem:[%s8639_s10 + $0x90] sm:$0xff]   ;;  %v6846_v18 = vld [vmem:[%s8639_s10 + $0xa8] sm:$0xff]  }
0x2763   : > { %5611 = vst [vmem:[%s7577_s18 + $0x38] sm:$0xff] %v4619_v3  ;;  %v4622_v8 = vpack.c.bf16 %v4619_v3, %v4619_v3  ;;  %v6847_v3 = vld [vmem:[%s8639_s10 + $0xf0] sm:$0xff]  }
0x2765   : > { %6566 = vmatmul.mubr.bf16.vlgmr.msra.gmra.mrb[132].mxu0 %v4622_v8 }
0x2766   : > { %6585 = vmatprep.mubr.msk.bf16.mxu0 %vm6949_vm0, %v6948_v4  ;;  %6570 = vmatpush3.bf16.msra.mxu0 %v6803_v58 }
0x2767   : > { %6571 = vmatprep.subr.bf16.mxu0 %v6948_v4 }
0x276a   : > { %6572 = vmatpush3.bf16.msra.mxu0 %v6804_v28 }
0x276b   : > { %6573 = vmatprep.subr.bf16.mxu0 %v6948_v4 }
0x276e   : > { %6574 = vmatpush3.bf16.msra.mxu0 %v6805_v32  ;;  %v4822_v32 = vrot.slane %v8208_v31, %v2545_v44  ;;  %v6850_v44 = vld [vmem:[%s8639_s10 + $0xb8] sm:$0xff]  }
0x276f   : > { %6575 = vmatprep.subr.bf16.mxu0 %v6948_v4 }
0x2772   : > { %6576 = vmatpush3.bf16.msra.mxu0 %v6806_v26 }
0x2773   : > { %6577 = vmatprep.subr.bf16.mxu0 %v6948_v4 }
0x2776   : > { %6578 = vmatpush3.bf16.msra.mxu0 %v6807_v35 }
0x2777   : > { %6579 = vmatprep.subr.bf16.mxu0 %v6948_v4 }
0x277a   : > { %6580 = vmatpush3.bf16.msra.mxu0 %v6808_v0  ;;  %v4827_v0 = vrot.slane %v8208_v31, %v2550_v41 }
0x277b   : > { %6581 = vmatprep.subr.bf16.mxu0 %v6948_v4 }
0x277e   : > { %6582 = vmatpush3.bf16.msra.mxu0 %v6809_v40 }
0x277f   : > { %6583 = vmatprep.subr.bf16.mxu0 %v6948_v4 }
0x2782   : > { %6584 = vmatpush3.bf16.msra.mxu0 %v6810_v7 }
0x2783   : > { %5991 = vmatprep.subr.bf16.mxu0 %v6835_v36 }
0x2838   : > { %v4681_v9 = vpop.f32.mrb[132].mxu0 }
0x2839   : > { %4696 = vrot.lane.b32.xlu1 %v4681_v9, %s8657_s16  ;;  %v6567_v23 = vpop.f32.mrb[133].mxu0 }
0x283a   : > { %v4684_v12 = vpop.f32.mrb[134].mxu0  ;;  %v6848_v23 = vld [vmem:[%s8639_s10 + $0xb0] sm:$0xff]  }
0x283b   : > { %v6568_v6 = vpop.f32.mrb[135].mxu0  ;;  %v6849_v12 = vld [vmem:[%s8639_s10 + $0xf8] sm:$0xff]  }
0x28ab   : > { %v4697_v50 = vpop.permute.xlu1 %4696 }
0x28ac   : > { %v4701_v4 = vsel %vm1278_vm5, %v4700_v47, %v4697_v50 }
0x28ad   : > { %v4702_v61 = vpack.c.bf16 %v4701_v4, %v4701_v4 }
0x28af   : > { %6586 = vmatmul.mubr.bf16.vlgmr.msra.gmra.mrb[136].mxu0 %v4702_v61 }
0x28b0   : > { %5992 = vmatpush3.bf16.msra.mxu0 %v6836_v57 }
0x28b1   : > { %5993 = vmatprep.subr.bf16.mxu0 %v6837_v34 }
0x28b4   : > { %5994 = vmatpush3.bf16.msra.mxu0 %v6838_v62 }
0x28b5   : > { %5995 = vmatprep.subr.bf16.mxu0 %v6839_v22 }
0x28b8   : > { %5996 = vmatpush3.bf16.msra.mxu0 %v6840_v33 }
0x28b9   : > { %5997 = vmatprep.subr.bf16.mxu0 %v6841_v49 }
0x28bc   : > { %5998 = vmatpush3.bf16.msra.mxu0 %v6842_v13 }
0x28bd   : > { %5999 = vmatprep.subr.bf16.mxu0 %v6843_v54 }
0x28c0   : > { %6000 = vmatpush3.bf16.msra.mxu0 %v6844_v27 }
0x28c1   : > { %6001 = vmatprep.subr.bf16.mxu0 %v6845_v37 }
0x28c4   : > { %6002 = vmatpush3.bf16.msra.mxu0 %v6846_v18 }
0x28c5   : > { %6003 = vmatprep.subr.bf16.mxu0 %v6847_v3 }
0x28c8   : > { %6004 = vmatpush3.bf16.msra.mxu0 %v6848_v23 }
0x28c9   : > { %6005 = vmatprep.subr.bf16.mxu0 %v6849_v12 }
0x28cc   : > { %6006 = vmatpush3.bf16.msra.mxu0 %v6850_v44 }
0x2982   : > { %v4802_v51 = vpop.f32.mrb[136].mxu0 }
0x2983   : > { %v4803_v15 = vadd.f32 %v4802_v51, %v8227_v25  ;;  %v6587_v39 = vpop.f32.mrb[137].mxu0  ;;  %v6814_v25 = vld [vmem:[%s8638_s9 + $0x90] ss:$8 sps:$4 sm:$0xff]  }
0x2984   : > { %v4805_v53 = vpop.f32.mrb[138].mxu0  ;;  %4930 = vmatpush1.bf16.msra.mxu1 %v6814_v25 }
0x2985   : > { %4808 = vadd.xlane.f32.xlu0 %v4803_v15  ;;  %v6588_v43 = vpop.f32.mrb[139].mxu0  ;;  %4931 = vmatprep.subr.bf16.mxu1 %v6819_v59 }
0x2988   : > { %4932 = vmatpush1.bf16.msra.mxu1 %v6817_v16 }
0x2989   : > { %4933 = vmatprep.subr.bf16.mxu1 %v6822_v1 }
0x298c   : > { %4934 = vmatpush1.bf16.msra.mxu1 %v6820_v5 }
0x298d   : > { %4935 = vmatprep.subr.bf16.mxu1 %v6825_v10 }
0x2990   : > { %4936 = vmatpush1.bf16.msra.mxu1 %v6823_v11 }
0x2991   : > { %4937 = vmatprep.subr.bf16.mxu1 %v6828_v48 }
0x2994   : > { %4938 = vmatpush1.bf16.msra.mxu1 %v6826_v21 }
0x2995   : > { %4939 = vmatprep.subr.bf16.mxu1 %v6831_v24 }
0x2998   : > { %4940 = vmatpush1.bf16.msra.mxu1 %v6829_v29 }
0x2999   : > { %4941 = vmatprep.subr.bf16.mxu1 %v6834_v30 }
0x299c   : > { %4942 = vmatpush1.bf16.msra.mxu1 %v6832_v2 }
0x2a12   : > { %v4809_v60 = vpop.xlane.xlu0 %4808 }
0x2a13   : > { %v4810_v17 = vmul.f32 0.0078125, %v4809_v60  ;;  %v6938_v60 = vld [vmem:[%s8640_s11 + $0x8] sm:$0x3f] }
0x2a15   : > { %v4811_v56 = vsub.f32 %v4803_v15, %v4810_v17  ;;  %v5155_v17 = vrot.slane %v6938_v60, %v2876_v19 }
0x2a17   : > { %v4812_v63 = vmul.f32 %v4811_v56, %v4811_v56 }
0x2a19   : > { %4813 = vadd.xlane.f32.xlu1 %v4812_v63  ;;  %v5160_v63 = vrot.slane %v6938_v60, %v2881_v42 }
0x2aa6   : > { %v4814_v8 = vpop.xlane.xlu1 %4813 }
0x2aa7   : > { %v4815_v58 = vmul.f32 0.0078125, %v4814_v8 }
0x2aa9   : > { %v4816_v28 = vadd.f32 1e-05, %v4815_v58 }
0x2aab   : > { %6923 = vrsqrt.f32 %v4816_v28 }
0x2ab5   : > { %v6924_v26 = vpop.eup %6923 }
0x2ab6   : > { %v4818_v35 = vmul.f32 %v6924_v26, %v4811_v56 }
0x2ab8   : > { %v4823_v40 = vmul.f32 %v4822_v32, %v4818_v35 }
0x2aba   : > { %v4828_v7 = vadd.f32 %v4827_v0, %v4823_v40 }
0x2abc   : > { %v4829_v9 = vpack.c.bf16 %v4828_v7, %v4828_v7 }
0x2abe   : > { %4960 = vmatmul.mubr.bf16.vlgmr.msra.gmra.mrb[100].mxu1 %v4829_v9 }
0x2b91   : > { %v4961_v41 = vpop.f32.mrb[100].mxu1 }
0x2b92   : > { %v4968_v31 = vmax.f32 %v4961_v41, 0.0  ;;  %v4963_v6 = vpop.f32.mrb[101].mxu1 }
0x2b93   : > { %v4969_v45 = vmax.f32 %v4963_v6, 0.0  ;;  %v4965_v14 = vpop.f32.mrb[102].mxu1 }
0x2b94   : > { %v4966_v20 = vpop.f32.mrb[103].mxu1  ;;  %v4970_v50 = vpack.c.bf16 %v4968_v31, %v4968_v31 }
0x2b95   : > { %v4971_v47 = vpack.c.bf16 %v4969_v45, %v4969_v45 }
0x2b97   : > { %5133 = vmatprep.mubr.bf16.mxu0 %v4971_v47 }
0x2b98   : > { %5134 = vmatmul.mubr.bf16.vlgmr.msra.gmra.mrb[140].mxu0 %v4970_v50 }
0x2c6b   : > { %v6007_v4 = vpop.f32.mrb[140].mxu0 }
0x2c6c   : > { %v6008_v61 = vpop.f32.mrb[141].mxu0 }
0x2c6d   : > { %v6009_v51 = vadd.f32 %v6008_v61, %v6007_v4  ;;  %v6010_v15 = vpop.f32.mrb[142].mxu0 }
0x2c6e   : > { %v6011_v39 = vpop.f32.mrb[143].mxu0 }
0x2c6f   : > { %v5136_v53 = vadd.f32 %v6009_v51, %v4828_v7 }
0x2c71   : > { %5141 = vadd.xlane.f32.xlu0 %v5136_v53 }
0x2cfe   : > { %v5142_v43 = vpop.xlane.xlu0 %5141 }
0x2cff   : > { %v5143_v52 = vmul.f32 0.0078125, %v5142_v43 }
0x2d01   : > { %v5144_v46 = vsub.f32 %v5136_v53, %v5143_v52 }
0x2d03   : > { %v5145_v55 = vmul.f32 %v5144_v46, %v5144_v46 }
0x2d05   : > { %5146 = vadd.xlane.f32.xlu0 %v5145_v55 }
0x2d92   : > { %v5147_v25 = vpop.xlane.xlu0 %5146 }
0x2d93   : > { %v5148_v59 = vmul.f32 0.0078125, %v5147_v25 }
0x2d95   : > { %v5149_v16 = vadd.f32 1e-05, %v5148_v59 }
0x2d97   : > { %6925 = vrsqrt.f32 %v5149_v16 }
0x2da1   : > { %v6926_v56 = vpop.eup %6925 }
0x2da2   : > { %v5151_v1 = vmul.f32 %v6926_v56, %v5144_v46 }
0x2da4   : > { %v5156_v5 = vmul.f32 %v5155_v17, %v5151_v1 }
0x2da6   : > { %v5161_v10 = vadd.f32 %v5160_v63, %v5156_v5 }
0x2da8   : > { %5162 = vst [vmem:[%s531_s23] sm:$0xff] %v5161_v10 }
0x2da9 PF: > { %s25_s29 = sadd.s32 1, %s6945_s29  }
0x2daa   : > { %p22_p4 = scmp.ge.s32.totalorder %s25_s29, 4  }
0x2dac   :  { %24 = sbr.rel (!%p22_p4) target bundleno = 5 (0x5), region = 153 }

</bundles_post_ra>
